<compile_context>
chip_gen: v7x
topology: tpu7x:2x2x1
jax: 0.10.0
libtpu: 0.0.40
codegen_flags: <defaults>
</compile_context>

<pallas_src>
import functools

import numpy as np
import jax
import jax.numpy as jnp
from jax.experimental import pallas as pl
from jax.experimental.pallas import tpu as pltpu

EPS = 1e-5


# ----------------------------- Pallas kernels ------------------------------

def _matmul_shift_relu_kernel(x_ref, w_ref, b_ref, o_ref):
    # x: (TM, K) f32   w: (K, Cout) bf16   b: (1, Cout) f32 -> o: (TM, Cout) bf16
    xb = x_ref[...].astype(jnp.bfloat16)
    acc = jnp.dot(xb, w_ref[...], preferred_element_type=jnp.float32)
    o_ref[...] = jnp.maximum(acc + b_ref[...], 0.0).astype(o_ref.dtype)


def _conv3x3_s1_kernel(th, Wo_p, x_ref, w_ref, b_ref, o_ref):
    # Row-tiled fused im2col + 3x3/stride-1 conv + BN(+bias) + ReLU.
    # x: (1, Hp, Wp, Cin) zero-padded activation   w: (3,3,Cin,Cout) bf16
    # b: (1, Cout) f32                             o: (1, th*Wo_p, Cout)
    r = pl.program_id(1)
    row0 = pl.multiple_of(r * th, th)
    xv = x_ref[0, pl.ds(row0, th + 2), :, :]          # (th+2, Wp, Cin) halo band
    cout = o_ref.shape[-1]
    # acc initialised from the broadcast shift: epilogue is only relu + cast.
    acc = jnp.broadcast_to(b_ref[...], (th * Wo_p, cout))
    for kh in range(3):                                # 9 shifted MXU dots, f32 acc
        for kw in range(3):
            xs = xv[kh:kh + th, kw:kw + Wo_p, :]
            xs = xs.reshape(th * Wo_p, xs.shape[-1]).astype(jnp.bfloat16)
            acc = acc + jnp.dot(xs, w_ref[kh, kw],
                                preferred_element_type=jnp.float32)
    o_ref[0] = jnp.maximum(acc, 0.0).astype(o_ref.dtype)


def _dual_conv3x3_s2_kernel(Ho, Wo_p, n1, x1_ref, x2_ref, w1_ref, w2_ref,
                            b_ref, o_ref):
    # Both final 3x3/stride-2 convs fused: two dot-accumulate chains (no zero
    # weight blocks), one wide store in torch.cat channel order [n1 | n2].
    # x*: (1, 4, Hs, Ws, C*) phase-split zero-padded bf16 activations
    # w*: (3,3,C*,n*) bf16    b: (1, n1+n2) f32    o: (1, Ho*Wo_p, n1+n2) f32
    xv1 = x1_ref[0]
    xv2 = x2_ref[0]
    n2 = w2_ref.shape[-1]
    m = Ho * Wo_p
    acc1 = jnp.broadcast_to(b_ref[:, :n1], (m, n1))
    acc2 = jnp.broadcast_to(b_ref[:, n1:], (m, n2))
    for kh in range(3):
        for kw in range(3):
            p = (kh % 2) * 2 + (kw % 2)
            dh, dw = kh // 2, kw // 2
            xs1 = xv1[p, dh:dh + Ho, dw:dw + Wo_p, :]
            xs1 = xs1.reshape(m, xs1.shape[-1]).astype(jnp.bfloat16)
            acc1 = acc1 + jnp.dot(xs1, w1_ref[kh, kw],
                                  preferred_element_type=jnp.float32)
            xs2 = xv2[p, dh:dh + Ho, dw:dw + Wo_p, :]
            xs2 = xs2.reshape(m, xs2.shape[-1]).astype(jnp.bfloat16)
            acc2 = acc2 + jnp.dot(xs2, w2_ref[kh, kw],
                                  preferred_element_type=jnp.float32)
    o_ref[0] = jnp.maximum(jnp.concatenate([acc1, acc2], axis=-1),
                           0.0).astype(o_ref.dtype)


def _maxpool3x3_kernel(Ho, Wo, x_ref, o_ref):
    # Fused 3x3 stride-2 ceil_mode maxpool on phase-split (-inf padded) input.
    # x: (1, 4, Hs, Ws, C) f32  ->  o: (1, Ho, Wo, C) f32
    xv = x_ref[0]
    acc = xv[0, 0:Ho, 0:Wo, :]
    for kh in range(3):
        for kw in range(3):
            if kh == 0 and kw == 0:
                continue
            p = (kh % 2) * 2 + (kw % 2)
            dh, dw = kh // 2, kw // 2
            acc = jnp.maximum(acc, xv[p, dh:dh + Ho, dw:dw + Wo, :])
    o_ref[0] = acc


# ------------------------------ call wrappers --------------------------------

def _pick_tm(M, lo=256, hi=2048):
    # Largest power-of-two row tile with at least 2 grid steps (megacore).
    tm = hi
    while tm > lo and M < 2 * tm:
        tm //= 2
    return max(lo, tm)


def _round_up(x, m):
    return ((x + m - 1) // m) * m


def matmul_shift_relu(x2d, w_bf, shift):
    """relu(x @ w + shift) over M rows; bf16 output, M padded to the tile."""
    M, K = x2d.shape
    Cout = w_bf.shape[-1]
    tm = _pick_tm(M)
    Mp = pl.cdiv(M, tm) * tm
    if Mp != M:
        x2d = jnp.pad(x2d, ((0, Mp - M), (0, 0)))
    out = pl.pallas_call(
        _matmul_shift_relu_kernel,
        out_shape=jax.ShapeDtypeStruct((Mp, Cout), jnp.bfloat16),
        grid=(Mp // tm,),
        in_specs=[
            pl.BlockSpec((tm, K), lambda i: (i, 0)),
            pl.BlockSpec((K, Cout), lambda i: (0, 0)),
            pl.BlockSpec((1, Cout), lambda i: (0, 0)),
        ],
        out_specs=pl.BlockSpec((tm, Cout), lambda i: (i, 0)),
        compiler_params=pltpu.CompilerParams(dimension_semantics=("parallel",)),
        cost_estimate=pl.CostEstimate(
            flops=2 * Mp * K * Cout, transcendentals=0,
            bytes_accessed=Mp * K * 4 + K * Cout * 2 + Cout * 4 + Mp * Cout * 2),
    )(x2d, w_bf, shift)
    return out[:M] if Mp != M else out


def pad_phase_split(x, k, s, Ho, Wo, conv_pad, pad_value):
    """NHWC -> (N, s*s, Hs, Ws, C): pad once, split into stride phases so the
    kernel only needs contiguous (Ho, Wo) window slices (fused im2col).
    TODO(synk): still one wrapper-side HBM pass per stride-2 op."""
    N, H, W, C = x.shape
    Hs = Ho + (k - 1) // s
    Ws = Wo + (k - 1) // s
    Hp, Wp = s * Hs, s * Ws
    xp = jnp.pad(x, ((0, 0), (conv_pad, Hp - H - conv_pad),
                     (conv_pad, Wp - W - conv_pad), (0, 0)),
                 constant_values=pad_value)
    phases = [xp[:, ph::s, pw::s, :] for ph in range(s) for pw in range(s)]
    return jnp.stack(phases, axis=1)


def conv3x3_s1_shift_relu(x, w_bf, shift, th=8):
    """3x3 conv (pad=1, stride=1) + folded-BN shift + ReLU, NHWC, bf16 out."""
    N, H, W, C = x.shape
    Cout = w_bf.shape[-1]
    Ho, Wo = H, W
    Wo_p = _round_up(Wo, 8)                 # layout-preserving in-kernel flatten
    Hp, Wp = Ho + 2, Wo_p + 2
    xp = jnp.pad(x, ((0, 0), (1, Hp - H - 1), (1, Wp - W - 1), (0, 0)))
    th = min(th, Ho)
    while Ho % th:
        th -= 1
    R = Ho // th
    kern = functools.partial(_conv3x3_s1_kernel, th, Wo_p)
    out = pl.pallas_call(
        kern,
        out_shape=jax.ShapeDtypeStruct((N, Ho * Wo_p, Cout), jnp.bfloat16),
        grid=(N, R),
        in_specs=[
            pl.BlockSpec((1, Hp, Wp, C), lambda n, r: (n, 0, 0, 0)),
            pl.BlockSpec((3, 3, C, Cout), lambda n, r: (0, 0, 0, 0)),
            pl.BlockSpec((1, Cout), lambda n, r: (0, 0)),
        ],
        out_specs=pl.BlockSpec((1, th * Wo_p, Cout), lambda n, r: (n, r, 0)),
        compiler_params=pltpu.CompilerParams(
            dimension_semantics=("parallel", "arbitrary")),
        cost_estimate=pl.CostEstimate(
            flops=2 * N * Ho * Wo_p * 9 * C * Cout, transcendentals=0,
            bytes_accessed=(N * Hp * Wp * C * 2 + 9 * C * Cout * 2
                            + Cout * 4 + N * Ho * Wo_p * Cout * 2)),
    )(xp, w_bf, shift)
    out = out.reshape(N, Ho, Wo_p, Cout)
    return out[:, :, :Wo, :] if Wo_p != Wo else out


def dual_conv3x3_s2_shift_relu(x1, x2, w1_bf, w2_bf, shift):
    """Both final 3x3/stride-2 convs fused in one kernel, outputs concatenated
    along channels in torch.cat order; f32 output."""
    N, H, W, C1 = x1.shape
    C2 = x2.shape[-1]
    n1, n2 = w1_bf.shape[-1], w2_bf.shape[-1]
    Ho = (H + 2 - 3) // 2 + 1
    Wo = (W + 2 - 3) // 2 + 1
    Wo_p = _round_up(Wo, 8)
    x1p = pad_phase_split(x1, 3, 2, Ho, Wo_p, conv_pad=1, pad_value=0.0)
    x2p = pad_phase_split(x2, 3, 2, Ho, Wo_p, conv_pad=1, pad_value=0.0)
    Pn, Hs, Ws = x1p.shape[1:4]
    kern = functools.partial(_dual_conv3x3_s2_kernel, Ho, Wo_p, n1)
    out = pl.pallas_call(
        kern,
        out_shape=jax.ShapeDtypeStruct((N, Ho * Wo_p, n1 + n2), jnp.float32),
        grid=(N,),
        in_specs=[
            pl.BlockSpec((1, Pn, Hs, Ws, C1), lambda n: (n, 0, 0, 0, 0)),
            pl.BlockSpec((1, Pn, Hs, Ws, C2), lambda n: (n, 0, 0, 0, 0)),
            pl.BlockSpec((3, 3, C1, n1), lambda n: (0, 0, 0, 0)),
            pl.BlockSpec((3, 3, C2, n2), lambda n: (0, 0, 0, 0)),
            pl.BlockSpec((1, n1 + n2), lambda n: (0, 0)),
        ],
        out_specs=pl.BlockSpec((1, Ho * Wo_p, n1 + n2), lambda n: (n, 0, 0)),
        compiler_params=pltpu.CompilerParams(dimension_semantics=("parallel",)),
        cost_estimate=pl.CostEstimate(
            flops=2 * N * Ho * Wo_p * 9 * (C1 * n1 + C2 * n2), transcendentals=0,
            bytes_accessed=(x1p.size * 2 + x2p.size * 2
                            + 9 * (C1 * n1 + C2 * n2) * 2
                            + (n1 + n2) * 4 + N * Ho * Wo_p * (n1 + n2) * 4)),
    )(x1p, x2p, w1_bf, w2_bf, shift)
    out = out.reshape(N, Ho, Wo_p, n1 + n2)
    return out[:, :, :Wo, :] if Wo_p != Wo else out


def maxpool3x3_s2_ceil(x):
    """3x3 / stride-2 maxpool with ceil_mode=True, NHWC, fused in one kernel."""
    N, H, W, C = x.shape
    k, s = 3, 2
    Ho = -(-(H - k) // s) + 1
    Wo = -(-(W - k) // s) + 1
    xph = pad_phase_split(x, k, s, Ho, Wo, conv_pad=0, pad_value=-jnp.inf)
    Pn, Hs, Ws = xph.shape[1:4]
    kern = functools.partial(_maxpool3x3_kernel, Ho, Wo)
    return pl.pallas_call(
        kern,
        out_shape=jax.ShapeDtypeStruct((N, Ho, Wo, C), jnp.float32),
        grid=(N,),
        in_specs=[pl.BlockSpec((1, Pn, Hs, Ws, C), lambda n: (n, 0, 0, 0, 0))],
        out_specs=pl.BlockSpec((1, Ho, Wo, C), lambda n: (n, 0, 0, 0)),
        compiler_params=pltpu.CompilerParams(dimension_semantics=("parallel",)),
    )(xph)


# ------------------------------- parameters ---------------------------------

def make_conv_bn(key, k, cin, cout):
    """Deterministic Conv2d + BatchNorm2d params; BN(eval) + conv bias folded
    into the (bf16) weights and a per-channel f32 shift."""
    k1, k2, k3, k4, k5, k6 = jax.random.split(key, 6)
    w = jax.random.normal(k1, (k, k, cin, cout), jnp.float32) * 0.1   # HWIO
    bias = jax.random.normal(k2, (cout,), jnp.float32) * 0.1
    gamma = jax.random.uniform(k3, (cout,), jnp.float32, 0.5, 1.5)
    beta = jax.random.normal(k4, (cout,), jnp.float32) * 0.1
    mean = jax.random.normal(k5, (cout,), jnp.float32) * 0.1
    var = jax.random.uniform(k6, (cout,), jnp.float32, 0.5, 1.5)
    scale = gamma / jnp.sqrt(var + EPS)
    shift = (beta - mean * scale + bias * scale).reshape(1, cout)
    w_bf = (w * scale).astype(jnp.bfloat16)        # BN scale folded into weights
    return dict(w_bf=w_bf, shift=shift)


def make_params(key, in_dim, dimr3x3, dim3x3, dimdr3x3, dimd3x3):
    k1, k2, k3, k4, k5 = jax.random.split(key, 5)
    P = {
        "r3x3":   make_conv_bn(k1, 1, in_dim,   dimr3x3),
        "c3x3":   make_conv_bn(k2, 3, dimr3x3,  dim3x3),
        "dr3x3":  make_conv_bn(k3, 1, in_dim,   dimdr3x3),
        "d3x3_1": make_conv_bn(k4, 3, dimdr3x3, dimd3x3),
        "d3x3_2": make_conv_bn(k5, 3, dimd3x3,  dimd3x3),
    }
    P["dims"] = (dimr3x3, dim3x3, dimdr3x3, dimd3x3)
    # Both 1x1 reduces fused into one matmul (wider output lanes, one call).
    P["reduce_w"] = jnp.concatenate(
        [P["r3x3"]["w_bf"].reshape(in_dim, dimr3x3),
         P["dr3x3"]["w_bf"].reshape(in_dim, dimdr3x3)], axis=-1)
    P["reduce_b"] = jnp.concatenate(
        [P["r3x3"]["shift"], P["dr3x3"]["shift"]], axis=-1)
    # Final stride-2 convs share one kernel but keep separate (dense) weights.
    P["final_b"] = jnp.concatenate(
        [P["c3x3"]["shift"], P["d3x3_2"]["shift"]], axis=-1)
    return P


# --------------------------------- forward ----------------------------------

def forward(x_nchw, P):
    """BNInceptionStrideModule.forward (NCHW in, NCHW out)."""
    x = jnp.transpose(x_nchw, (0, 2, 3, 1))              # -> NHWC, f32
    N, H, W, Cin = x.shape
    dimr3x3, dim3x3, dimdr3x3, dimd3x3 = P["dims"]

    # both 1x1-reduce branches: one fused matmul + BN + ReLU (bf16 out)
    y = matmul_shift_relu(x.reshape(N * H * W, Cin), P["reduce_w"], P["reduce_b"])
    y = y.reshape(N, H, W, dimr3x3 + dimdr3x3)
    b1, b2 = y[..., :dimr3x3], y[..., dimr3x3:]

    # branch-2 middle conv: 3x3 stride 1 (row-tiled, bf16 out)
    b2 = conv3x3_s1_shift_relu(b2, P["d3x3_1"]["w_bf"], P["d3x3_1"]["shift"])

    # final stride-2 3x3 of both branches fused (no wrapper concat, no zero
    # weight blocks), channels come out already in torch.cat order
    out12 = dual_conv3x3_s2_shift_relu(
        b1, b2, P["c3x3"]["w_bf"], P["d3x3_2"]["w_bf"], P["final_b"])

    # pool branch: fused 3x3/2 maxpool, ceil_mode=True
    out3 = maxpool3x3_s2_ceil(x)

    out = jnp.concatenate([out12, out3], axis=-1)        # [3x3 | d3x3 | pool]
    return jnp.transpose(out, (0, 3, 1, 2))              # -> NCHW


# ---------------------------- pure-JAX reference ----------------------------

def ref_forward(x_nchw, P):
    x = jnp.transpose(x_nchw, (0, 2, 3, 1))

    def cbr(h, layer, stride, pad):
        # identical quantization points as the Pallas path: bf16 MXU operands
        # (= bf16-stored intermediates), f32 accumulation/epilogue.
        hq = h.astype(jnp.bfloat16).astype(jnp.float32)
        wq = P[layer]["w_bf"].astype(jnp.float32)
        y = jax.lax.conv_general_dilated(
            hq, wq, (stride, stride), [(pad, pad), (pad, pad)],
            dimension_numbers=("NHWC", "HWIO", "NHWC"))
        return jnp.maximum(y + P[layer]["shift"].reshape(1, 1, 1, -1), 0.0)

    out1 = cbr(cbr(x, "r3x3", 1, 0), "c3x3", 2, 1)
    b2 = cbr(cbr(x, "dr3x3", 1, 0), "d3x3_1", 1, 1)
    out2 = cbr(b2, "d3x3_2", 2, 1)

    N, H, W, C = x.shape
    k, s = 3, 2
    Ho = -(-(H - k) // s) + 1
    Wo = -(-(W - k) // s) + 1
    Hp, Wp = (Ho - 1) * s + k, (Wo - 1) * s + k
    xp = jnp.pad(x, ((0, 0), (0, Hp - H), (0, Wp - W), (0, 0)),
                 constant_values=-jnp.inf)
    out3 = jax.lax.reduce_window(xp, -jnp.inf, jax.lax.max,
                                 (1, k, k, 1), (1, s, s, 1), "VALID")

    out = jnp.concatenate([out1, out2, out3], axis=-1)
    return jnp.transpose(out, (0, 3, 1, 2))


# ---------------------------------- main ------------------------------------

if __name__ == "__main__":
    key = jax.random.PRNGKey(0)
    N, Cin, H, W = 2, 4, 16, 16
    dimr3x3, dim3x3, dimdr3x3, dimd3x3 = 8, 8, 8, 8

    kx, kp = jax.random.split(key)
    x = jax.random.normal(kx, (N, Cin, H, W), jnp.float32)
    P = make_params(kp, Cin, dimr3x3, dim3x3, dimdr3x3, dimd3x3)

    fwd = jax.jit(lambda xx: forward(xx, P))
    out = jax.block_until_ready(fwd(x))
    ref = jax.block_until_ready(ref_forward(x, P))

    assert out.shape == (N, dim3x3 + dimd3x3 + Cin, 8, 8), out.shape
    np.testing.assert_allclose(np.asarray(out), np.asarray(ref),
                               rtol=2e-3, atol=2e-3)
    print("KERNEL_OK")
</pallas_src>

<mosaic_0001>
module attributes {stable_mosaic.version = 11 : i64} {
  func.func @_matmul_shift_relu_kernel(%arg0: i32, %arg1: memref<256x4xf32, #tpu.memory_space<vmem>>, %arg2: memref<4x16xbf16, #tpu.memory_space<vmem>>, %arg3: memref<1x16xf32, #tpu.memory_space<vmem>>, %arg4: memref<256x16xbf16, #tpu.memory_space<vmem>>) attributes {dimension_semantics = [#tpu.dimension_semantics<parallel>], iteration_bounds = array<i64: 2>, scalar_prefetch = 0 : i64, scratch_operands = 0 : i64, tpu.core_type = #tpu.core_type<tc>, window_params = [{transform_indices = @transform_0, window_bounds = array<i64: 256, 4>}, {pipeline_mode = #tpu.pipeline_mode<synchronous>, transform_indices = @transform_1, window_bounds = array<i64: 4, 16>}, {pipeline_mode = #tpu.pipeline_mode<synchronous>, transform_indices = @transform_2, window_bounds = array<i64: 1, 16>}, {transform_indices = @transform_3, window_bounds = array<i64: 256, 16>}]} {
    %c0 = arith.constant 0 : index
    %c0_0 = arith.constant 0 : index
    %0 = vector.load %arg1[%c0, %c0_0] : memref<256x4xf32, #tpu.memory_space<vmem>>, vector<256x4xf32>
    %1 = arith.truncf %0 : vector<256x4xf32> to vector<256x4xbf16>
    %c0_1 = arith.constant 0 : index
    %c0_2 = arith.constant 0 : index
    %2 = vector.load %arg2[%c0_1, %c0_2] : memref<4x16xbf16, #tpu.memory_space<vmem>>, vector<4x16xbf16>
    %cst = arith.constant dense<0.000000e+00> : vector<256x16xf32>
    %3 = tpu.matmul %1, %2, %cst {dimension_numbers = #tpu.dot_dimension_numbers<[1], [0], [0], [1], [0, 0, 1, 1], [], []>} : vector<256x4xbf16>, vector<4x16xbf16>, vector<256x16xf32> -> vector<256x16xf32>
    %c0_3 = arith.constant 0 : index
    %c0_4 = arith.constant 0 : index
    %4 = vector.load %arg3[%c0_3, %c0_4] : memref<1x16xf32, #tpu.memory_space<vmem>>, vector<1x16xf32>
    %5 = vector.broadcast %4 : vector<1x16xf32> to vector<256x16xf32>
    %6 = arith.addf %3, %5 : vector<256x16xf32>
    %cst_5 = arith.constant 0.000000e+00 : f32
    %7 = vector.broadcast %cst_5 : f32 to vector<256x16xf32>
    %8 = arith.maximumf %6, %7 : vector<256x16xf32>
    %9 = arith.truncf %8 : vector<256x16xf32> to vector<256x16xbf16>
    %c0_6 = arith.constant 0 : index
    %c0_7 = arith.constant 0 : index
    %10 = vector.load %arg4[%c0_6, %c0_7] : memref<256x16xbf16, #tpu.memory_space<vmem>>, vector<256x16xbf16>
    tpu.vector_store %arg4[%c0_6, %c0_7], %9 {strides = array<i32>} : memref<256x16xbf16, #tpu.memory_space<vmem>>, vector<256x16xbf16>,
    return
  }
  func.func @transform_0(%arg0: i32) -> (i32, i32) {
    %c0_i32 = arith.constant 0 : i32
    %c0_i32_0 = arith.constant 0 : i32
    return %arg0, %c0_i32 : i32, i32
  }
  func.func @transform_1(%arg0: i32) -> (i32, i32) {
    %c0_i32 = arith.constant 0 : i32
    %c0_i32_0 = arith.constant 0 : i32
    %c0_i32_1 = arith.constant 0 : i32
    return %c0_i32, %c0_i32_0 : i32, i32
  }
  func.func @transform_2(%arg0: i32) -> (i32, i32) {
    %c0_i32 = arith.constant 0 : i32
    %c0_i32_0 = arith.constant 0 : i32
    %c0_i32_1 = arith.constant 0 : i32
    return %c0_i32, %c0_i32_0 : i32, i32
  }
  func.func @transform_3(%arg0: i32) -> (i32, i32) {
    %c0_i32 = arith.constant 0 : i32
    %c0_i32_0 = arith.constant 0 : i32
    return %arg0, %c0_i32 : i32, i32
  }
}

module attributes {stable_mosaic.version = 11 : i64} {
  func.func @_maxpool3x3_kernel(%arg0: i32, %arg1: memref<1x4x9x9x4xf32, #tpu.memory_space<vmem>>, %arg2: memref<1x8x8x4xf32, #tpu.memory_space<vmem>>) attributes {dimension_semantics = [#tpu.dimension_semantics<parallel>], iteration_bounds = array<i64: 2>, scalar_prefetch = 0 : i64, scratch_operands = 0 : i64, tpu.core_type = #tpu.core_type<tc>, window_params = [{transform_indices = @transform_0, window_bounds = array<i64: 1, 4, 9, 9, 4>}, {transform_indices = @transform_1, window_bounds = array<i64: 1, 8, 8, 4>}]} {
    %c0 = arith.constant 0 : index
    %c0_0 = arith.constant 0 : index
    %c0_1 = arith.constant 0 : index
    %c0_2 = arith.constant 0 : index
    %c0_3 = arith.constant 0 : index
    %0 = vector.load %arg1[%c0, %c0_0, %c0_1, %c0_2, %c0_3] : memref<1x4x9x9x4xf32, #tpu.memory_space<vmem>>, vector<1x4x9x9x4xf32>
    %1 = vector.shape_cast %0 : vector<1x4x9x9x4xf32> to vector<4x9x9x4xf32>
    %2 = vector.extract_strided_slice %1 {offsets = [0, 0, 0, 0], sizes = [1, 8, 8, 4], strides = [1, 1, 1, 1]} : vector<4x9x9x4xf32> to vector<1x8x8x4xf32>
    %3 = vector.shape_cast %2 : vector<1x8x8x4xf32> to vector<8x8x4xf32>
    %4 = vector.extract_strided_slice %1 {offsets = [1, 0, 0, 0], sizes = [1, 8, 8, 4], strides = [1, 1, 1, 1]} : vector<4x9x9x4xf32> to vector<1x8x8x4xf32>
    %5 = vector.shape_cast %4 : vector<1x8x8x4xf32> to vector<8x8x4xf32>
    %6 = arith.maximumf %3, %5 : vector<8x8x4xf32>
    %7 = vector.extract_strided_slice %1 {offsets = [0, 0, 1, 0], sizes = [1, 8, 8, 4], strides = [1, 1, 1, 1]} : vector<4x9x9x4xf32> to vector<1x8x8x4xf32>
    %8 = vector.shape_cast %7 : vector<1x8x8x4xf32> to vector<8x8x4xf32>
    %9 = arith.maximumf %6, %8 : vector<8x8x4xf32>
    %10 = vector.extract_strided_slice %1 {offsets = [2, 0, 0, 0], sizes = [1, 8, 8, 4], strides = [1, 1, 1, 1]} : vector<4x9x9x4xf32> to vector<1x8x8x4xf32>
    %11 = vector.shape_cast %10 : vector<1x8x8x4xf32> to vector<8x8x4xf32>
    %12 = arith.maximumf %9, %11 : vector<8x8x4xf32>
    %13 = vector.extract_strided_slice %1 {offsets = [3, 0, 0, 0], sizes = [1, 8, 8, 4], strides = [1, 1, 1, 1]} : vector<4x9x9x4xf32> to vector<1x8x8x4xf32>
    %14 = vector.shape_cast %13 : vector<1x8x8x4xf32> to vector<8x8x4xf32>
    %15 = arith.maximumf %12, %14 : vector<8x8x4xf32>
    %16 = vector.extract_strided_slice %1 {offsets = [2, 0, 1, 0], sizes = [1, 8, 8, 4], strides = [1, 1, 1, 1]} : vector<4x9x9x4xf32> to vector<1x8x8x4xf32>
    %17 = vector.shape_cast %16 : vector<1x8x8x4xf32> to vector<8x8x4xf32>
    %18 = arith.maximumf %15, %17 : vector<8x8x4xf32>
    %19 = vector.extract_strided_slice %1 {offsets = [0, 1, 0, 0], sizes = [1, 8, 8, 4], strides = [1, 1, 1, 1]} : vector<4x9x9x4xf32> to vector<1x8x8x4xf32>
    %20 = vector.shape_cast %19 : vector<1x8x8x4xf32> to vector<8x8x4xf32>
    %21 = arith.maximumf %18, %20 : vector<8x8x4xf32>
    %22 = vector.extract_strided_slice %1 {offsets = [1, 1, 0, 0], sizes = [1, 8, 8, 4], strides = [1, 1, 1, 1]} : vector<4x9x9x4xf32> to vector<1x8x8x4xf32>
    %23 = vector.shape_cast %22 : vector<1x8x8x4xf32> to vector<8x8x4xf32>
    %24 = arith.maximumf %21, %23 : vector<8x8x4xf32>
    %25 = vector.extract_strided_slice %1 {offsets = [0, 1, 1, 0], sizes = [1, 8, 8, 4], strides = [1, 1, 1, 1]} : vector<4x9x9x4xf32> to vector<1x8x8x4xf32>
    %26 = vector.shape_cast %25 : vector<1x8x8x4xf32> to vector<8x8x4xf32>
    %27 = arith.maximumf %24, %26 : vector<8x8x4xf32>
    %c0_4 = arith.constant 0 : index
    %c0_5 = arith.constant 0 : index
    %c0_6 = arith.constant 0 : index
    %c0_7 = arith.constant 0 : index
    %28 = vector.load %arg2[%c0_4, %c0_5, %c0_6, %c0_7] : memref<1x8x8x4xf32, #tpu.memory_space<vmem>>, vector<1x8x8x4xf32>
    %29 = vector.shape_cast %28 : vector<1x8x8x4xf32> to vector<8x8x4xf32>
    %30 = vector.shape_cast %27 : vector<8x8x4xf32> to vector<1x8x8x4xf32>
    tpu.vector_store %arg2[%c0_4, %c0_5, %c0_6, %c0_7], %30 {strides = array<i32>} : memref<1x8x8x4xf32, #tpu.memory_space<vmem>>, vector<1x8x8x4xf32>,
    return
  }
  func.func @transform_0(%arg0: i32) -> (i32, i32, i32, i32, i32) {
    %c0_i32 = arith.constant 0 : i32
    %c0_i32_0 = arith.constant 0 : i32
    %c0_i32_1 = arith.constant 0 : i32
    %c0_i32_2 = arith.constant 0 : i32
    %c0_i32_3 = arith.constant 0 : i32
    return %arg0, %c0_i32, %c0_i32_0, %c0_i32_1, %c0_i32_2 : i32, i32, i32, i32, i32
  }
  func.func @transform_1(%arg0: i32) -> (i32, i32, i32, i32) {
    %c0_i32 = arith.constant 0 : i32
    %c0_i32_0 = arith.constant 0 : i32
    %c0_i32_1 = arith.constant 0 : i32
    %c0_i32_2 = arith.constant 0 : i32
    return %arg0, %c0_i32, %c0_i32_0, %c0_i32_1 : i32, i32, i32, i32
  }
}

module attributes {stable_mosaic.version = 11 : i64} {
  func.func @_conv3x3_s1_kernel(%arg0: i32, %arg1: i32, %arg2: memref<1x18x18x8xbf16, #tpu.memory_space<vmem>>, %arg3: memref<3x3x8x8xbf16, #tpu.memory_space<vmem>>, %arg4: memref<1x8xf32, #tpu.memory_space<vmem>>, %arg5: memref<1x128x8xbf16, #tpu.memory_space<vmem>>) attributes {dimension_semantics = [#tpu.dimension_semantics<parallel>, #tpu.dimension_semantics<arbitrary>], iteration_bounds = array<i64: 2, 2>, scalar_prefetch = 0 : i64, scratch_operands = 0 : i64, tpu.core_type = #tpu.core_type<tc>, window_params = [{transform_indices = @transform_0, window_bounds = array<i64: 1, 18, 18, 8>}, {pipeline_mode = #tpu.pipeline_mode<synchronous>, transform_indices = @transform_1, window_bounds = array<i64: 3, 3, 8, 8>}, {pipeline_mode = #tpu.pipeline_mode<synchronous>, transform_indices = @transform_2, window_bounds = array<i64: 1, 8>}, {transform_indices = @transform_3, window_bounds = array<i64: 1, 128, 8>}]} {
    %c8_i32 = arith.constant 8 : i32
    %0 = arith.muli %arg1, %c8_i32 : i32
    %1 = tpu.assume_multiple %0, 8 : i32
    %c0 = arith.constant 0 : index
    %2 = arith.index_cast %1 : i32 to index
    %c0_0 = arith.constant 0 : index
    %c0_1 = arith.constant 0 : index
    %3 = vector.load %arg2[%c0, %2, %c0_0, %c0_1] : memref<1x18x18x8xbf16, #tpu.memory_space<vmem>>, vector<1x10x18x8xbf16>
    %4 = vector.shape_cast %3 : vector<1x10x18x8xbf16> to vector<10x18x8xbf16>
    %c0_2 = arith.constant 0 : index
    %c0_3 = arith.constant 0 : index
    %5 = vector.load %arg4[%c0_2, %c0_3] : memref<1x8xf32, #tpu.memory_space<vmem>>, vector<1x8xf32>
    %6 = vector.shape_cast %5 : vector<1x8xf32> to vector<1x8xf32>
    %7 = vector.broadcast %6 : vector<1x8xf32> to vector<128x8xf32>
    %8 = vector.extract_strided_slice %4 {offsets = [0, 0, 0], sizes = [8, 16, 8], strides = [1, 1, 1]} : vector<10x18x8xbf16> to vector<8x16x8xbf16>
    %9 = vector.shape_cast %8 : vector<8x16x8xbf16> to vector<128x8xbf16>
    %c0_4 = arith.constant 0 : index
    %c0_5 = arith.constant 0 : index
    %c0_6 = arith.constant 0 : index
    %c0_7 = arith.constant 0 : index
    %10 = vector.load %arg3[%c0_4, %c0_5, %c0_6, %c0_7] : memref<3x3x8x8xbf16, #tpu.memory_space<vmem>>, vector<1x1x8x8xbf16>
    %11 = vector.shape_cast %10 : vector<1x1x8x8xbf16> to vector<8x8xbf16>
    %cst = arith.constant dense<0.000000e+00> : vector<128x8xf32>
    %12 = tpu.matmul %9, %11, %cst {dimension_numbers = #tpu.dot_dimension_numbers<[1], [0], [0], [1], [0, 0, 1, 1], [], []>} : vector<128x8xbf16>, vector<8x8xbf16>, vector<128x8xf32> -> vector<128x8xf32>
    %13 = arith.addf %7, %12 : vector<128x8xf32>
    %14 = vector.extract_strided_slice %4 {offsets = [0, 1, 0], sizes = [8, 16, 8], strides = [1, 1, 1]} : vector<10x18x8xbf16> to vector<8x16x8xbf16>
    %15 = vector.shape_cast %14 : vector<8x16x8xbf16> to vector<128x8xbf16>
    %c0_8 = arith.constant 0 : index
    %c1 = arith.constant 1 : index
    %c0_9 = arith.constant 0 : index
    %c0_10 = arith.constant 0 : index
    %16 = vector.load %arg3[%c0_8, %c1, %c0_9, %c0_10] : memref<3x3x8x8xbf16, #tpu.memory_space<vmem>>, vector<1x1x8x8xbf16>
    %17 = vector.shape_cast %16 : vector<1x1x8x8xbf16> to vector<8x8xbf16>
    %cst_11 = arith.constant dense<0.000000e+00> : vector<128x8xf32>
    %18 = tpu.matmul %15, %17, %cst_11 {dimension_numbers = #tpu.dot_dimension_numbers<[1], [0], [0], [1], [0, 0, 1, 1], [], []>} : vector<128x8xbf16>, vector<8x8xbf16>, vector<128x8xf32> -> vector<128x8xf32>
    %19 = arith.addf %13, %18 : vector<128x8xf32>
    %20 = vector.extract_strided_slice %4 {offsets = [0, 2, 0], sizes = [8, 16, 8], strides = [1, 1, 1]} : vector<10x18x8xbf16> to vector<8x16x8xbf16>
    %21 = vector.shape_cast %20 : vector<8x16x8xbf16> to vector<128x8xbf16>
    %c0_12 = arith.constant 0 : index
    %c2 = arith.constant 2 : index
    %c0_13 = arith.constant 0 : index
    %c0_14 = arith.constant 0 : index
    %22 = vector.load %arg3[%c0_12, %c2, %c0_13, %c0_14] : memref<3x3x8x8xbf16, #tpu.memory_space<vmem>>, vector<1x1x8x8xbf16>
    %23 = vector.shape_cast %22 : vector<1x1x8x8xbf16> to vector<8x8xbf16>
    %cst_15 = arith.constant dense<0.000000e+00> : vector<128x8xf32>
    %24 = tpu.matmul %21, %23, %cst_15 {dimension_numbers = #tpu.dot_dimension_numbers<[1], [0], [0], [1], [0, 0, 1, 1], [], []>} : vector<128x8xbf16>, vector<8x8xbf16>, vector<128x8xf32> -> vector<128x8xf32>
    %25 = arith.addf %19, %24 : vector<128x8xf32>
    %26 = vector.extract_strided_slice %4 {offsets = [1, 0, 0], sizes = [8, 16, 8], strides = [1, 1, 1]} : vector<10x18x8xbf16> to vector<8x16x8xbf16>
    %27 = vector.shape_cast %26 : vector<8x16x8xbf16> to vector<128x8xbf16>
    %c1_16 = arith.constant 1 : index
    %c0_17 = arith.constant 0 : index
    %c0_18 = arith.constant 0 : index
    %c0_19 = arith.constant 0 : index
    %28 = vector.load %arg3[%c1_16, %c0_17, %c0_18, %c0_19] : memref<3x3x8x8xbf16, #tpu.memory_space<vmem>>, vector<1x1x8x8xbf16>
    %29 = vector.shape_cast %28 : vector<1x1x8x8xbf16> to vector<8x8xbf16>
    %cst_20 = arith.constant dense<0.000000e+00> : vector<128x8xf32>
    %30 = tpu.matmul %27, %29, %cst_20 {dimension_numbers = #tpu.dot_dimension_numbers<[1], [0], [0], [1], [0, 0, 1, 1], [], []>} : vector<128x8xbf16>, vector<8x8xbf16>, vector<128x8xf32> -> vector<128x8xf32>
    %31 = arith.addf %25, %30 : vector<128x8xf32>
    %32 = vector.extract_strided_slice %4 {offsets = [1, 1, 0], sizes = [8, 16, 8], strides = [1, 1, 1]} : vector<10x18x8xbf16> to vector<8x16x8xbf16>
    %33 = vector.shape_cast %32 : vector<8x16x8xbf16> to vector<128x8xbf16>
    %c1_21 = arith.constant 1 : index
    %c1_22 = arith.constant 1 : index
    %c0_23 = arith.constant 0 : index
    %c0_24 = arith.constant 0 : index
    %34 = vector.load %arg3[%c1_21, %c1_22, %c0_23, %c0_24] : memref<3x3x8x8xbf16, #tpu.memory_space<vmem>>, vector<1x1x8x8xbf16>
    %35 = vector.shape_cast %34 : vector<1x1x8x8xbf16> to vector<8x8xbf16>
    %cst_25 = arith.constant dense<0.000000e+00> : vector<128x8xf32>
    %36 = tpu.matmul %33, %35, %cst_25 {dimension_numbers = #tpu.dot_dimension_numbers<[1], [0], [0], [1], [0, 0, 1, 1], [], []>} : vector<128x8xbf16>, vector<8x8xbf16>, vector<128x8xf32> -> vector<128x8xf32>
    %37 = arith.addf %31, %36 : vector<128x8xf32>
    %38 = vector.extract_strided_slice %4 {offsets = [1, 2, 0], sizes = [8, 16, 8], strides = [1, 1, 1]} : vector<10x18x8xbf16> to vector<8x16x8xbf16>
    %39 = vector.shape_cast %38 : vector<8x16x8xbf16> to vector<128x8xbf16>
    %c1_26 = arith.constant 1 : index
    %c2_27 = arith.constant 2 : index
    %c0_28 = arith.constant 0 : index
    %c0_29 = arith.constant 0 : index
    %40 = vector.load %arg3[%c1_26, %c2_27, %c0_28, %c0_29] : memref<3x3x8x8xbf16, #tpu.memory_space<vmem>>, vector<1x1x8x8xbf16>
    %41 = vector.shape_cast %40 : vector<1x1x8x8xbf16> to vector<8x8xbf16>
    %cst_30 = arith.constant dense<0.000000e+00> : vector<128x8xf32>
    %42 = tpu.matmul %39, %41, %cst_30 {dimension_numbers = #tpu.dot_dimension_numbers<[1], [0], [0], [1], [0, 0, 1, 1], [], []>} : vector<128x8xbf16>, vector<8x8xbf16>, vector<128x8xf32> -> vector<128x8xf32>
    %43 = arith.addf %37, %42 : vector<128x8xf32>
    %44 = vector.extract_strided_slice %4 {offsets = [2, 0, 0], sizes = [8, 16, 8], strides = [1, 1, 1]} : vector<10x18x8xbf16> to vector<8x16x8xbf16>
    %45 = vector.shape_cast %44 : vector<8x16x8xbf16> to vector<128x8xbf16>
    %c2_31 = arith.constant 2 : index
    %c0_32 = arith.constant 0 : index
    %c0_33 = arith.constant 0 : index
    %c0_34 = arith.constant 0 : index
    %46 = vector.load %arg3[%c2_31, %c0_32, %c0_33, %c0_34] : memref<3x3x8x8xbf16, #tpu.memory_space<vmem>>, vector<1x1x8x8xbf16>
    %47 = vector.shape_cast %46 : vector<1x1x8x8xbf16> to vector<8x8xbf16>
    %cst_35 = arith.constant dense<0.000000e+00> : vector<128x8xf32>
    %48 = tpu.matmul %45, %47, %cst_35 {dimension_numbers = #tpu.dot_dimension_numbers<[1], [0], [0], [1], [0, 0, 1, 1], [], []>} : vector<128x8xbf16>, vector<8x8xbf16>, vector<128x8xf32> -> vector<128x8xf32>
    %49 = arith.addf %43, %48 : vector<128x8xf32>
    %50 = vector.extract_strided_slice %4 {offsets = [2, 1, 0], sizes = [8, 16, 8], strides = [1, 1, 1]} : vector<10x18x8xbf16> to vector<8x16x8xbf16>
    %51 = vector.shape_cast %50 : vector<8x16x8xbf16> to vector<128x8xbf16>
    %c2_36 = arith.constant 2 : index
    %c1_37 = arith.constant 1 : index
    %c0_38 = arith.constant 0 : index
    %c0_39 = arith.constant 0 : index
    %52 = vector.load %arg3[%c2_36, %c1_37, %c0_38, %c0_39] : memref<3x3x8x8xbf16, #tpu.memory_space<vmem>>, vector<1x1x8x8xbf16>
    %53 = vector.shape_cast %52 : vector<1x1x8x8xbf16> to vector<8x8xbf16>
    %cst_40 = arith.constant dense<0.000000e+00> : vector<128x8xf32>
    %54 = tpu.matmul %51, %53, %cst_40 {dimension_numbers = #tpu.dot_dimension_numbers<[1], [0], [0], [1], [0, 0, 1, 1], [], []>} : vector<128x8xbf16>, vector<8x8xbf16>, vector<128x8xf32> -> vector<128x8xf32>
    %55 = arith.addf %49, %54 : vector<128x8xf32>
    %56 = vector.extract_strided_slice %4 {offsets = [2, 2, 0], sizes = [8, 16, 8], strides = [1, 1, 1]} : vector<10x18x8xbf16> to vector<8x16x8xbf16>
    %57 = vector.shape_cast %56 : vector<8x16x8xbf16> to vector<128x8xbf16>
    %c2_41 = arith.constant 2 : index
    %c2_42 = arith.constant 2 : index
    %c0_43 = arith.constant 0 : index
    %c0_44 = arith.constant 0 : index
    %58 = vector.load %arg3[%c2_41, %c2_42, %c0_43, %c0_44] : memref<3x3x8x8xbf16, #tpu.memory_space<vmem>>, vector<1x1x8x8xbf16>
    %59 = vector.shape_cast %58 : vector<1x1x8x8xbf16> to vector<8x8xbf16>
    %cst_45 = arith.constant dense<0.000000e+00> : vector<128x8xf32>
    %60 = tpu.matmul %57, %59, %cst_45 {dimension_numbers = #tpu.dot_dimension_numbers<[1], [0], [0], [1], [0, 0, 1, 1], [], []>} : vector<128x8xbf16>, vector<8x8xbf16>, vector<128x8xf32> -> vector<128x8xf32>
    %61 = arith.addf %55, %60 : vector<128x8xf32>
    %cst_46 = arith.constant 0.000000e+00 : f32
    %62 = vector.broadcast %cst_46 : f32 to vector<128x8xf32>
    %63 = arith.maximumf %61, %62 : vector<128x8xf32>
    %64 = arith.truncf %63 : vector<128x8xf32> to vector<128x8xbf16>
    %c0_47 = arith.constant 0 : index
    %c0_48 = arith.constant 0 : index
    %c0_49 = arith.constant 0 : index
    %65 = vector.load %arg5[%c0_47, %c0_48, %c0_49] : memref<1x128x8xbf16, #tpu.memory_space<vmem>>, vector<1x128x8xbf16>
    %66 = vector.shape_cast %65 : vector<1x128x8xbf16> to vector<128x8xbf16>
    %67 = vector.shape_cast %64 : vector<128x8xbf16> to vector<1x128x8xbf16>
    tpu.vector_store %arg5[%c0_47, %c0_48, %c0_49], %67 {strides = array<i32>} : memref<1x128x8xbf16, #tpu.memory_space<vmem>>, vector<1x128x8xbf16>,
    return
  }
  func.func @transform_0(%arg0: i32, %arg1: i32) -> (i32, i32, i32, i32) {
    %c0_i32 = arith.constant 0 : i32
    %c0_i32_0 = arith.constant 0 : i32
    %c0_i32_1 = arith.constant 0 : i32
    %c0_i32_2 = arith.constant 0 : i32
    return %arg0, %c0_i32, %c0_i32_0, %c0_i32_1 : i32, i32, i32, i32
  }
  func.func @transform_1(%arg0: i32, %arg1: i32) -> (i32, i32, i32, i32) {
    %c0_i32 = arith.constant 0 : i32
    %c0_i32_0 = arith.constant 0 : i32
    %c0_i32_1 = arith.constant 0 : i32
    %c0_i32_2 = arith.constant 0 : i32
    %c0_i32_3 = arith.constant 0 : i32
    return %c0_i32, %c0_i32_0, %c0_i32_1, %c0_i32_2 : i32, i32, i32, i32
  }
  func.func @transform_2(%arg0: i32, %arg1: i32) -> (i32, i32) {
    %c0_i32 = arith.constant 0 : i32
    %c0_i32_0 = arith.constant 0 : i32
    %c0_i32_1 = arith.constant 0 : i32
    return %c0_i32, %c0_i32_0 : i32, i32
  }
  func.func @transform_3(%arg0: i32, %arg1: i32) -> (i32, i32, i32) {
    %c0_i32 = arith.constant 0 : i32
    %c0_i32_0 = arith.constant 0 : i32
    return %arg0, %arg1, %c0_i32 : i32, i32, i32
  }
}

module attributes {stable_mosaic.version = 11 : i64} {
  func.func @_dual_conv3x3_s2_kernel(%arg0: i32, %arg1: memref<1x4x9x9x8xbf16, #tpu.memory_space<vmem>>, %arg2: memref<1x4x9x9x8xbf16, #tpu.memory_space<vmem>>, %arg3: memref<3x3x8x8xbf16, #tpu.memory_space<vmem>>, %arg4: memref<3x3x8x8xbf16, #tpu.memory_space<vmem>>, %arg5: memref<1x16xf32, #tpu.memory_space<vmem>>, %arg6: memref<1x64x16xf32, #tpu.memory_space<vmem>>) attributes {dimension_semantics = [#tpu.dimension_semantics<parallel>], iteration_bounds = array<i64: 2>, scalar_prefetch = 0 : i64, scratch_operands = 0 : i64, tpu.core_type = #tpu.core_type<tc>, window_params = [{transform_indices = @transform_0, window_bounds = array<i64: 1, 4, 9, 9, 8>}, {transform_indices = @transform_1, window_bounds = array<i64: 1, 4, 9, 9, 8>}, {pipeline_mode = #tpu.pipeline_mode<synchronous>, transform_indices = @transform_2, window_bounds = array<i64: 3, 3, 8, 8>}, {pipeline_mode = #tpu.pipeline_mode<synchronous>, transform_indices = @transform_3, window_bounds = array<i64: 3, 3, 8, 8>}, {pipeline_mode = #tpu.pipeline_mode<synchronous>, transform_indices = @transform_4, window_bounds = array<i64: 1, 16>}, {transform_indices = @transform_5, window_bounds = array<i64: 1, 64, 16>}]} {
    %c0 = arith.constant 0 : index
    %c0_0 = arith.constant 0 : index
    %c0_1 = arith.constant 0 : index
    %c0_2 = arith.constant 0 : index
    %c0_3 = arith.constant 0 : index
    %0 = vector.load %arg1[%c0, %c0_0, %c0_1, %c0_2, %c0_3] : memref<1x4x9x9x8xbf16, #tpu.memory_space<vmem>>, vector<1x4x9x9x8xbf16>
    %1 = vector.shape_cast %0 : vector<1x4x9x9x8xbf16> to vector<4x9x9x8xbf16>
    %c0_4 = arith.constant 0 : index
    %c0_5 = arith.constant 0 : index
    %c0_6 = arith.constant 0 : index
    %c0_7 = arith.constant 0 : index
    %c0_8 = arith.constant 0 : index
    %2 = vector.load %arg2[%c0_4, %c0_5, %c0_6, %c0_7, %c0_8] : memref<1x4x9x9x8xbf16, #tpu.memory_space<vmem>>, vector<1x4x9x9x8xbf16>
    %3 = vector.shape_cast %2 : vector<1x4x9x9x8xbf16> to vector<4x9x9x8xbf16>
    %c0_9 = arith.constant 0 : index
    %c0_10 = arith.constant 0 : index
    %4 = vector.load %arg5[%c0_9, %c0_10] : memref<1x16xf32, #tpu.memory_space<vmem>>, vector<1x8xf32>
    %5 = vector.shape_cast %4 : vector<1x8xf32> to vector<1x8xf32>
    %6 = vector.broadcast %5 : vector<1x8xf32> to vector<64x8xf32>
    %c0_11 = arith.constant 0 : index
    %c8 = arith.constant 8 : index
    %7 = vector.load %arg5[%c0_11, %c8] : memref<1x16xf32, #tpu.memory_space<vmem>>, vector<1x8xf32>
    %8 = vector.shape_cast %7 : vector<1x8xf32> to vector<1x8xf32>
    %9 = vector.broadcast %8 : vector<1x8xf32> to vector<64x8xf32>
    %10 = vector.extract_strided_slice %1 {offsets = [0, 0, 0, 0], sizes = [1, 8, 8, 8], strides = [1, 1, 1, 1]} : vector<4x9x9x8xbf16> to vector<1x8x8x8xbf16>
    %11 = vector.shape_cast %10 : vector<1x8x8x8xbf16> to vector<8x8x8xbf16>
    %12 = vector.shape_cast %11 : vector<8x8x8xbf16> to vector<64x8xbf16>
    %c0_12 = arith.constant 0 : index
    %c0_13 = arith.constant 0 : index
    %c0_14 = arith.constant 0 : index
    %c0_15 = arith.constant 0 : index
    %13 = vector.load %arg3[%c0_12, %c0_13, %c0_14, %c0_15] : memref<3x3x8x8xbf16, #tpu.memory_space<vmem>>, vector<1x1x8x8xbf16>
    %14 = vector.shape_cast %13 : vector<1x1x8x8xbf16> to vector<8x8xbf16>
    %cst = arith.constant dense<0.000000e+00> : vector<64x8xf32>
    %15 = tpu.matmul %12, %14, %cst {dimension_numbers = #tpu.dot_dimension_numbers<[1], [0], [0], [1], [0, 0, 1, 1], [], []>} : vector<64x8xbf16>, vector<8x8xbf16>, vector<64x8xf32> -> vector<64x8xf32>
    %16 = arith.addf %6, %15 : vector<64x8xf32>
    %17 = vector.extract_strided_slice %3 {offsets = [0, 0, 0, 0], sizes = [1, 8, 8, 8], strides = [1, 1, 1, 1]} : vector<4x9x9x8xbf16> to vector<1x8x8x8xbf16>
    %18 = vector.shape_cast %17 : vector<1x8x8x8xbf16> to vector<8x8x8xbf16>
    %19 = vector.shape_cast %18 : vector<8x8x8xbf16> to vector<64x8xbf16>
    %c0_16 = arith.constant 0 : index
    %c0_17 = arith.constant 0 : index
    %c0_18 = arith.constant 0 : index
    %c0_19 = arith.constant 0 : index
    %20 = vector.load %arg4[%c0_16, %c0_17, %c0_18, %c0_19] : memref<3x3x8x8xbf16, #tpu.memory_space<vmem>>, vector<1x1x8x8xbf16>
    %21 = vector.shape_cast %20 : vector<1x1x8x8xbf16> to vector<8x8xbf16>
    %cst_20 = arith.constant dense<0.000000e+00> : vector<64x8xf32>
    %22 = tpu.matmul %19, %21, %cst_20 {dimension_numbers = #tpu.dot_dimension_numbers<[1], [0], [0], [1], [0, 0, 1, 1], [], []>} : vector<64x8xbf16>, vector<8x8xbf16>, vector<64x8xf32> -> vector<64x8xf32>
    %23 = arith.addf %9, %22 : vector<64x8xf32>
    %24 = vector.extract_strided_slice %1 {offsets = [1, 0, 0, 0], sizes = [1, 8, 8, 8], strides = [1, 1, 1, 1]} : vector<4x9x9x8xbf16> to vector<1x8x8x8xbf16>
    %25 = vector.shape_cast %24 : vector<1x8x8x8xbf16> to vector<8x8x8xbf16>
    %26 = vector.shape_cast %25 : vector<8x8x8xbf16> to vector<64x8xbf16>
    %c0_21 = arith.constant 0 : index
    %c1 = arith.constant 1 : index
    %c0_22 = arith.constant 0 : index
    %c0_23 = arith.constant 0 : index
    %27 = vector.load %arg3[%c0_21, %c1, %c0_22, %c0_23] : memref<3x3x8x8xbf16, #tpu.memory_space<vmem>>, vector<1x1x8x8xbf16>
    %28 = vector.shape_cast %27 : vector<1x1x8x8xbf16> to vector<8x8xbf16>
    %cst_24 = arith.constant dense<0.000000e+00> : vector<64x8xf32>
    %29 = tpu.matmul %26, %28, %cst_24 {dimension_numbers = #tpu.dot_dimension_numbers<[1], [0], [0], [1], [0, 0, 1, 1], [], []>} : vector<64x8xbf16>, vector<8x8xbf16>, vector<64x8xf32> -> vector<64x8xf32>
    %30 = arith.addf %16, %29 : vector<64x8xf32>
    %31 = vector.extract_strided_slice %3 {offsets = [1, 0, 0, 0], sizes = [1, 8, 8, 8], strides = [1, 1, 1, 1]} : vector<4x9x9x8xbf16> to vector<1x8x8x8xbf16>
    %32 = vector.shape_cast %31 : vector<1x8x8x8xbf16> to vector<8x8x8xbf16>
    %33 = vector.shape_cast %32 : vector<8x8x8xbf16> to vector<64x8xbf16>
    %c0_25 = arith.constant 0 : index
    %c1_26 = arith.constant 1 : index
    %c0_27 = arith.constant 0 : index
    %c0_28 = arith.constant 0 : index
    %34 = vector.load %arg4[%c0_25, %c1_26, %c0_27, %c0_28] : memref<3x3x8x8xbf16, #tpu.memory_space<vmem>>, vector<1x1x8x8xbf16>
    %35 = vector.shape_cast %34 : vector<1x1x8x8xbf16> to vector<8x8xbf16>
    %cst_29 = arith.constant dense<0.000000e+00> : vector<64x8xf32>
    %36 = tpu.matmul %33, %35, %cst_29 {dimension_numbers = #tpu.dot_dimension_numbers<[1], [0], [0], [1], [0, 0, 1, 1], [], []>} : vector<64x8xbf16>, vector<8x8xbf16>, vector<64x8xf32> -> vector<64x8xf32>
    %37 = arith.addf %23, %36 : vector<64x8xf32>
    %38 = vector.extract_strided_slice %1 {offsets = [0, 0, 1, 0], sizes = [1, 8, 8, 8], strides = [1, 1, 1, 1]} : vector<4x9x9x8xbf16> to vector<1x8x8x8xbf16>
    %39 = vector.shape_cast %38 : vector<1x8x8x8xbf16> to vector<8x8x8xbf16>
    %40 = vector.shape_cast %39 : vector<8x8x8xbf16> to vector<64x8xbf16>
    %c0_30 = arith.constant 0 : index
    %c2 = arith.constant 2 : index
    %c0_31 = arith.constant 0 : index
    %c0_32 = arith.constant 0 : index
    %41 = vector.load %arg3[%c0_30, %c2, %c0_31, %c0_32] : memref<3x3x8x8xbf16, #tpu.memory_space<vmem>>, vector<1x1x8x8xbf16>
    %42 = vector.shape_cast %41 : vector<1x1x8x8xbf16> to vector<8x8xbf16>
    %cst_33 = arith.constant dense<0.000000e+00> : vector<64x8xf32>
    %43 = tpu.matmul %40, %42, %cst_33 {dimension_numbers = #tpu.dot_dimension_numbers<[1], [0], [0], [1], [0, 0, 1, 1], [], []>} : vector<64x8xbf16>, vector<8x8xbf16>, vector<64x8xf32> -> vector<64x8xf32>
    %44 = arith.addf %30, %43 : vector<64x8xf32>
    %45 = vector.extract_strided_slice %3 {offsets = [0, 0, 1, 0], sizes = [1, 8, 8, 8], strides = [1, 1, 1, 1]} : vector<4x9x9x8xbf16> to vector<1x8x8x8xbf16>
    %46 = vector.shape_cast %45 : vector<1x8x8x8xbf16> to vector<8x8x8xbf16>
    %47 = vector.shape_cast %46 : vector<8x8x8xbf16> to vector<64x8xbf16>
    %c0_34 = arith.constant 0 : index
    %c2_35 = arith.constant 2 : index
    %c0_36 = arith.constant 0 : index
    %c0_37 = arith.constant 0 : index
    %48 = vector.load %arg4[%c0_34, %c2_35, %c0_36, %c0_37] : memref<3x3x8x8xbf16, #tpu.memory_space<vmem>>, vector<1x1x8x8xbf16>
    %49 = vector.shape_cast %48 : vector<1x1x8x8xbf16> to vector<8x8xbf16>
    %cst_38 = arith.constant dense<0.000000e+00> : vector<64x8xf32>
    %50 = tpu.matmul %47, %49, %cst_38 {dimension_numbers = #tpu.dot_dimension_numbers<[1], [0], [0], [1], [0, 0, 1, 1], [], []>} : vector<64x8xbf16>, vector<8x8xbf16>, vector<64x8xf32> -> vector<64x8xf32>
    %51 = arith.addf %37, %50 : vector<64x8xf32>
    %52 = vector.extract_strided_slice %1 {offsets = [2, 0, 0, 0], sizes = [1, 8, 8, 8], strides = [1, 1, 1, 1]} : vector<4x9x9x8xbf16> to vector<1x8x8x8xbf16>
    %53 = vector.shape_cast %52 : vector<1x8x8x8xbf16> to vector<8x8x8xbf16>
    %54 = vector.shape_cast %53 : vector<8x8x8xbf16> to vector<64x8xbf16>
    %c1_39 = arith.constant 1 : index
    %c0_40 = arith.constant 0 : index
    %c0_41 = arith.constant 0 : index
    %c0_42 = arith.constant 0 : index
    %55 = vector.load %arg3[%c1_39, %c0_40, %c0_41, %c0_42] : memref<3x3x8x8xbf16, #tpu.memory_space<vmem>>, vector<1x1x8x8xbf16>
    %56 = vector.shape_cast %55 : vector<1x1x8x8xbf16> to vector<8x8xbf16>
    %cst_43 = arith.constant dense<0.000000e+00> : vector<64x8xf32>
    %57 = tpu.matmul %54, %56, %cst_43 {dimension_numbers = #tpu.dot_dimension_numbers<[1], [0], [0], [1], [0, 0, 1, 1], [], []>} : vector<64x8xbf16>, vector<8x8xbf16>, vector<64x8xf32> -> vector<64x8xf32>
    %58 = arith.addf %44, %57 : vector<64x8xf32>
    %59 = vector.extract_strided_slice %3 {offsets = [2, 0, 0, 0], sizes = [1, 8, 8, 8], strides = [1, 1, 1, 1]} : vector<4x9x9x8xbf16> to vector<1x8x8x8xbf16>
    %60 = vector.shape_cast %59 : vector<1x8x8x8xbf16> to vector<8x8x8xbf16>
    %61 = vector.shape_cast %60 : vector<8x8x8xbf16> to vector<64x8xbf16>
    %c1_44 = arith.constant 1 : index
    %c0_45 = arith.constant 0 : index
    %c0_46 = arith.constant 0 : index
    %c0_47 = arith.constant 0 : index
    %62 = vector.load %arg4[%c1_44, %c0_45, %c0_46, %c0_47] : memref<3x3x8x8xbf16, #tpu.memory_space<vmem>>, vector<1x1x8x8xbf16>
    %63 = vector.shape_cast %62 : vector<1x1x8x8xbf16> to vector<8x8xbf16>
    %cst_48 = arith.constant dense<0.000000e+00> : vector<64x8xf32>
    %64 = tpu.matmul %61, %63, %cst_48 {dimension_numbers = #tpu.dot_dimension_numbers<[1], [0], [0], [1], [0, 0, 1, 1], [], []>} : vector<64x8xbf16>, vector<8x8xbf16>, vector<64x8xf32> -> vector<64x8xf32>
    %65 = arith.addf %51, %64 : vector<64x8xf32>
    %66 = vector.extract_strided_slice %1 {offsets = [3, 0, 0, 0], sizes = [1, 8, 8, 8], strides = [1, 1, 1, 1]} : vector<4x9x9x8xbf16> to vector<1x8x8x8xbf16>
    %67 = vector.shape_cast %66 : vector<1x8x8x8xbf16> to vector<8x8x8xbf16>
    %68 = vector.shape_cast %67 : vector<8x8x8xbf16> to vector<64x8xbf16>
    %c1_49 = arith.constant 1 : index
    %c1_50 = arith.constant 1 : index
    %c0_51 = arith.constant 0 : index
    %c0_52 = arith.constant 0 : index
    %69 = vector.load %arg3[%c1_49, %c1_50, %c0_51, %c0_52] : memref<3x3x8x8xbf16, #tpu.memory_space<vmem>>, vector<1x1x8x8xbf16>
    %70 = vector.shape_cast %69 : vector<1x1x8x8xbf16> to vector<8x8xbf16>
    %cst_53 = arith.constant dense<0.000000e+00> : vector<64x8xf32>
    %71 = tpu.matmul %68, %70, %cst_53 {dimension_numbers = #tpu.dot_dimension_numbers<[1], [0], [0], [1], [0, 0, 1, 1], [], []>} : vector<64x8xbf16>, vector<8x8xbf16>, vector<64x8xf32> -> vector<64x8xf32>
    %72 = arith.addf %58, %71 : vector<64x8xf32>
    %73 = vector.extract_strided_slice %3 {offsets = [3, 0, 0, 0], sizes = [1, 8, 8, 8], strides = [1, 1, 1, 1]} : vector<4x9x9x8xbf16> to vector<1x8x8x8xbf16>
    %74 = vector.shape_cast %73 : vector<1x8x8x8xbf16> to vector<8x8x8xbf16>
    %75 = vector.shape_cast %74 : vector<8x8x8xbf16> to vector<64x8xbf16>
    %c1_54 = arith.constant 1 : index
    %c1_55 = arith.constant 1 : index
    %c0_56 = arith.constant 0 : index
    %c0_57 = arith.constant 0 : index
    %76 = vector.load %arg4[%c1_54, %c1_55, %c0_56, %c0_57] : memref<3x3x8x8xbf16, #tpu.memory_space<vmem>>, vector<1x1x8x8xbf16>
    %77 = vector.shape_cast %76 : vector<1x1x8x8xbf16> to vector<8x8xbf16>
    %cst_58 = arith.constant dense<0.000000e+00> : vector<64x8xf32>
    %78 = tpu.matmul %75, %77, %cst_58 {dimension_numbers = #tpu.dot_dimension_numbers<[1], [0], [0], [1], [0, 0, 1, 1], [], []>} : vector<64x8xbf16>, vector<8x8xbf16>, vector<64x8xf32> -> vector<64x8xf32>
    %79 = arith.addf %65, %78 : vector<64x8xf32>
    %80 = vector.extract_strided_slice %1 {offsets = [2, 0, 1, 0], sizes = [1, 8, 8, 8], strides = [1, 1, 1, 1]} : vector<4x9x9x8xbf16> to vector<1x8x8x8xbf16>
    %81 = vector.shape_cast %80 : vector<1x8x8x8xbf16> to vector<8x8x8xbf16>
    %82 = vector.shape_cast %81 : vector<8x8x8xbf16> to vector<64x8xbf16>
    %c1_59 = arith.constant 1 : index
    %c2_60 = arith.constant 2 : index
    %c0_61 = arith.constant 0 : index
    %c0_62 = arith.constant 0 : index
    %83 = vector.load %arg3[%c1_59, %c2_60, %c0_61, %c0_62] : memref<3x3x8x8xbf16, #tpu.memory_space<vmem>>, vector<1x1x8x8xbf16>
    %84 = vector.shape_cast %83 : vector<1x1x8x8xbf16> to vector<8x8xbf16>
    %cst_63 = arith.constant dense<0.000000e+00> : vector<64x8xf32>
    %85 = tpu.matmul %82, %84, %cst_63 {dimension_numbers = #tpu.dot_dimension_numbers<[1], [0], [0], [1], [0, 0, 1, 1], [], []>} : vector<64x8xbf16>, vector<8x8xbf16>, vector<64x8xf32> -> vector<64x8xf32>
    %86 = arith.addf %72, %85 : vector<64x8xf32>
    %87 = vector.extract_strided_slice %3 {offsets = [2, 0, 1, 0], sizes = [1, 8, 8, 8], strides = [1, 1, 1, 1]} : vector<4x9x9x8xbf16> to vector<1x8x8x8xbf16>
    %88 = vector.shape_cast %87 : vector<1x8x8x8xbf16> to vector<8x8x8xbf16>
    %89 = vector.shape_cast %88 : vector<8x8x8xbf16> to vector<64x8xbf16>
    %c1_64 = arith.constant 1 : index
    %c2_65 = arith.constant 2 : index
    %c0_66 = arith.constant 0 : index
    %c0_67 = arith.constant 0 : index
    %90 = vector.load %arg4[%c1_64, %c2_65, %c0_66, %c0_67] : memref<3x3x8x8xbf16, #tpu.memory_space<vmem>>, vector<1x1x8x8xbf16>
    %91 = vector.shape_cast %90 : vector<1x1x8x8xbf16> to vector<8x8xbf16>
    %cst_68 = arith.constant dense<0.000000e+00> : vector<64x8xf32>
    %92 = tpu.matmul %89, %91, %cst_68 {dimension_numbers = #tpu.dot_dimension_numbers<[1], [0], [0], [1], [0, 0, 1, 1], [], []>} : vector<64x8xbf16>, vector<8x8xbf16>, vector<64x8xf32> -> vector<64x8xf32>
    %93 = arith.addf %79, %92 : vector<64x8xf32>
    %94 = vector.extract_strided_slice %1 {offsets = [0, 1, 0, 0], sizes = [1, 8, 8, 8], strides = [1, 1, 1, 1]} : vector<4x9x9x8xbf16> to vector<1x8x8x8xbf16>
    %95 = vector.shape_cast %94 : vector<1x8x8x8xbf16> to vector<8x8x8xbf16>
    %96 = vector.shape_cast %95 : vector<8x8x8xbf16> to vector<64x8xbf16>
    %c2_69 = arith.constant 2 : index
    %c0_70 = arith.constant 0 : index
    %c0_71 = arith.constant 0 : index
    %c0_72 = arith.constant 0 : index
    %97 = vector.load %arg3[%c2_69, %c0_70, %c0_71, %c0_72] : memref<3x3x8x8xbf16, #tpu.memory_space<vmem>>, vector<1x1x8x8xbf16>
    %98 = vector.shape_cast %97 : vector<1x1x8x8xbf16> to vector<8x8xbf16>
    %cst_73 = arith.constant dense<0.000000e+00> : vector<64x8xf32>
    %99 = tpu.matmul %96, %98, %cst_73 {dimension_numbers = #tpu.dot_dimension_numbers<[1], [0], [0], [1], [0, 0, 1, 1], [], []>} : vector<64x8xbf16>, vector<8x8xbf16>, vector<64x8xf32> -> vector<64x8xf32>
    %100 = arith.addf %86, %99 : vector<64x8xf32>
    %101 = vector.extract_strided_slice %3 {offsets = [0, 1, 0, 0], sizes = [1, 8, 8, 8], strides = [1, 1, 1, 1]} : vector<4x9x9x8xbf16> to vector<1x8x8x8xbf16>
    %102 = vector.shape_cast %101 : vector<1x8x8x8xbf16> to vector<8x8x8xbf16>
    %103 = vector.shape_cast %102 : vector<8x8x8xbf16> to vector<64x8xbf16>
    %c2_74 = arith.constant 2 : index
    %c0_75 = arith.constant 0 : index
    %c0_76 = arith.constant 0 : index
    %c0_77 = arith.constant 0 : index
    %104 = vector.load %arg4[%c2_74, %c0_75, %c0_76, %c0_77] : memref<3x3x8x8xbf16, #tpu.memory_space<vmem>>, vector<1x1x8x8xbf16>
    %105 = vector.shape_cast %104 : vector<1x1x8x8xbf16> to vector<8x8xbf16>
    %cst_78 = arith.constant dense<0.000000e+00> : vector<64x8xf32>
    %106 = tpu.matmul %103, %105, %cst_78 {dimension_numbers = #tpu.dot_dimension_numbers<[1], [0], [0], [1], [0, 0, 1, 1], [], []>} : vector<64x8xbf16>, vector<8x8xbf16>, vector<64x8xf32> -> vector<64x8xf32>
    %107 = arith.addf %93, %106 : vector<64x8xf32>
    %108 = vector.extract_strided_slice %1 {offsets = [1, 1, 0, 0], sizes = [1, 8, 8, 8], strides = [1, 1, 1, 1]} : vector<4x9x9x8xbf16> to vector<1x8x8x8xbf16>
    %109 = vector.shape_cast %108 : vector<1x8x8x8xbf16> to vector<8x8x8xbf16>
    %110 = vector.shape_cast %109 : vector<8x8x8xbf16> to vector<64x8xbf16>
    %c2_79 = arith.constant 2 : index
    %c1_80 = arith.constant 1 : index
    %c0_81 = arith.constant 0 : index
    %c0_82 = arith.constant 0 : index
    %111 = vector.load %arg3[%c2_79, %c1_80, %c0_81, %c0_82] : memref<3x3x8x8xbf16, #tpu.memory_space<vmem>>, vector<1x1x8x8xbf16>
    %112 = vector.shape_cast %111 : vector<1x1x8x8xbf16> to vector<8x8xbf16>
    %cst_83 = arith.constant dense<0.000000e+00> : vector<64x8xf32>
    %113 = tpu.matmul %110, %112, %cst_83 {dimension_numbers = #tpu.dot_dimension_numbers<[1], [0], [0], [1], [0, 0, 1, 1], [], []>} : vector<64x8xbf16>, vector<8x8xbf16>, vector<64x8xf32> -> vector<64x8xf32>
    %114 = arith.addf %100, %113 : vector<64x8xf32>
    %115 = vector.extract_strided_slice %3 {offsets = [1, 1, 0, 0], sizes = [1, 8, 8, 8], strides = [1, 1, 1, 1]} : vector<4x9x9x8xbf16> to vector<1x8x8x8xbf16>
    %116 = vector.shape_cast %115 : vector<1x8x8x8xbf16> to vector<8x8x8xbf16>
    %117 = vector.shape_cast %116 : vector<8x8x8xbf16> to vector<64x8xbf16>
    %c2_84 = arith.constant 2 : index
    %c1_85 = arith.constant 1 : index
    %c0_86 = arith.constant 0 : index
    %c0_87 = arith.constant 0 : index
    %118 = vector.load %arg4[%c2_84, %c1_85, %c0_86, %c0_87] : memref<3x3x8x8xbf16, #tpu.memory_space<vmem>>, vector<1x1x8x8xbf16>
    %119 = vector.shape_cast %118 : vector<1x1x8x8xbf16> to vector<8x8xbf16>
    %cst_88 = arith.constant dense<0.000000e+00> : vector<64x8xf32>
    %120 = tpu.matmul %117, %119, %cst_88 {dimension_numbers = #tpu.dot_dimension_numbers<[1], [0], [0], [1], [0, 0, 1, 1], [], []>} : vector<64x8xbf16>, vector<8x8xbf16>, vector<64x8xf32> -> vector<64x8xf32>
    %121 = arith.addf %107, %120 : vector<64x8xf32>
    %122 = vector.extract_strided_slice %1 {offsets = [0, 1, 1, 0], sizes = [1, 8, 8, 8], strides = [1, 1, 1, 1]} : vector<4x9x9x8xbf16> to vector<1x8x8x8xbf16>
    %123 = vector.shape_cast %122 : vector<1x8x8x8xbf16> to vector<8x8x8xbf16>
    %124 = vector.shape_cast %123 : vector<8x8x8xbf16> to vector<64x8xbf16>
    %c2_89 = arith.constant 2 : index
    %c2_90 = arith.constant 2 : index
    %c0_91 = arith.constant 0 : index
    %c0_92 = arith.constant 0 : index
    %125 = vector.load %arg3[%c2_89, %c2_90, %c0_91, %c0_92] : memref<3x3x8x8xbf16, #tpu.memory_space<vmem>>, vector<1x1x8x8xbf16>
    %126 = vector.shape_cast %125 : vector<1x1x8x8xbf16> to vector<8x8xbf16>
    %cst_93 = arith.constant dense<0.000000e+00> : vector<64x8xf32>
    %127 = tpu.matmul %124, %126, %cst_93 {dimension_numbers = #tpu.dot_dimension_numbers<[1], [0], [0], [1], [0, 0, 1, 1], [], []>} : vector<64x8xbf16>, vector<8x8xbf16>, vector<64x8xf32> -> vector<64x8xf32>
    %128 = arith.addf %114, %127 : vector<64x8xf32>
    %129 = vector.extract_strided_slice %3 {offsets = [0, 1, 1, 0], sizes = [1, 8, 8, 8], strides = [1, 1, 1, 1]} : vector<4x9x9x8xbf16> to vector<1x8x8x8xbf16>
    %130 = vector.shape_cast %129 : vector<1x8x8x8xbf16> to vector<8x8x8xbf16>
    %131 = vector.shape_cast %130 : vector<8x8x8xbf16> to vector<64x8xbf16>
    %c2_94 = arith.constant 2 : index
    %c2_95 = arith.constant 2 : index
    %c0_96 = arith.constant 0 : index
    %c0_97 = arith.constant 0 : index
    %132 = vector.load %arg4[%c2_94, %c2_95, %c0_96, %c0_97] : memref<3x3x8x8xbf16, #tpu.memory_space<vmem>>, vector<1x1x8x8xbf16>
    %133 = vector.shape_cast %132 : vector<1x1x8x8xbf16> to vector<8x8xbf16>
    %cst_98 = arith.constant dense<0.000000e+00> : vector<64x8xf32>
    %134 = tpu.matmul %131, %133, %cst_98 {dimension_numbers = #tpu.dot_dimension_numbers<[1], [0], [0], [1], [0, 0, 1, 1], [], []>} : vector<64x8xbf16>, vector<8x8xbf16>, vector<64x8xf32> -> vector<64x8xf32>
    %135 = arith.addf %121, %134 : vector<64x8xf32>
    %136 = tpu.concatenate %128, %135 in 1 : vector<64x8xf32>, vector<64x8xf32> -> vector<64x16xf32>
    %cst_99 = arith.constant 0.000000e+00 : f32
    %137 = vector.broadcast %cst_99 : f32 to vector<64x16xf32>
    %138 = arith.maximumf %136, %137 : vector<64x16xf32>
    %c0_100 = arith.constant 0 : index
    %c0_101 = arith.constant 0 : index
    %c0_102 = arith.constant 0 : index
    %139 = vector.load %arg6[%c0_100, %c0_101, %c0_102] : memref<1x64x16xf32, #tpu.memory_space<vmem>>, vector<1x64x16xf32>
    %140 = vector.shape_cast %139 : vector<1x64x16xf32> to vector<64x16xf32>
    %141 = vector.shape_cast %138 : vector<64x16xf32> to vector<1x64x16xf32>
    tpu.vector_store %arg6[%c0_100, %c0_101, %c0_102], %141 {strides = array<i32>} : memref<1x64x16xf32, #tpu.memory_space<vmem>>, vector<1x64x16xf32>,
    return
  }
  func.func @transform_0(%arg0: i32) -> (i32, i32, i32, i32, i32) {
    %c0_i32 = arith.constant 0 : i32
    %c0_i32_0 = arith.constant 0 : i32
    %c0_i32_1 = arith.constant 0 : i32
    %c0_i32_2 = arith.constant 0 : i32
    %c0_i32_3 = arith.constant 0 : i32
    return %arg0, %c0_i32, %c0_i32_0, %c0_i32_1, %c0_i32_2 : i32, i32, i32, i32, i32
  }
  func.func @transform_1(%arg0: i32) -> (i32, i32, i32, i32, i32) {
    %c0_i32 = arith.constant 0 : i32
    %c0_i32_0 = arith.constant 0 : i32
    %c0_i32_1 = arith.constant 0 : i32
    %c0_i32_2 = arith.constant 0 : i32
    %c0_i32_3 = arith.constant 0 : i32
    return %arg0, %c0_i32, %c0_i32_0, %c0_i32_1, %c0_i32_2 : i32, i32, i32, i32, i32
  }
  func.func @transform_2(%arg0: i32) -> (i32, i32, i32, i32) {
    %c0_i32 = arith.constant 0 : i32
    %c0_i32_0 = arith.constant 0 : i32
    %c0_i32_1 = arith.constant 0 : i32
    %c0_i32_2 = arith.constant 0 : i32
    %c0_i32_3 = arith.constant 0 : i32
    return %c0_i32, %c0_i32_0, %c0_i32_1, %c0_i32_2 : i32, i32, i32, i32
  }
  func.func @transform_3(%arg0: i32) -> (i32, i32, i32, i32) {
    %c0_i32 = arith.constant 0 : i32
    %c0_i32_0 = arith.constant 0 : i32
    %c0_i32_1 = arith.constant 0 : i32
    %c0_i32_2 = arith.constant 0 : i32
    %c0_i32_3 = arith.constant 0 : i32
    return %c0_i32, %c0_i32_0, %c0_i32_1, %c0_i32_2 : i32, i32, i32, i32
  }
  func.func @transform_4(%arg0: i32) -> (i32, i32) {
    %c0_i32 = arith.constant 0 : i32
    %c0_i32_0 = arith.constant 0 : i32
    %c0_i32_1 = arith.constant 0 : i32
    return %c0_i32, %c0_i32_0 : i32, i32
  }
  func.func @transform_5(%arg0: i32) -> (i32, i32, i32) {
    %c0_i32 = arith.constant 0 : i32
    %c0_i32_0 = arith.constant 0 : i32
    %c0_i32_1 = arith.constant 0 : i32
    return %arg0, %c0_i32, %c0_i32_0 : i32, i32, i32
  }
}

</mosaic_0001>

<bundles_post_ra>
// kernel: _lambda_.7
= control target key start
LH: loop header
LB: loop body
LE: loop exit
PB: predicated region body
PF: predicated region fallthrough
CT: control target
= control target key end

     0   :  { %s437_s6 = smov 0   ;;  %s589_s0 = inlined_call_operand.vmem [shape: f32[2,4,9,9,4], index: 0, kind: input, shape index: {}]   ;;  %s590_s1 = inlined_call_operand.vmem [shape: f32[2,8,8,4], index: 1, kind: output, shape index: {}]  }
   0x1 LB: > { %s399_s7 = sadd.s32 4294967295, %s425_s6   ;;  %p403_p0 = scmp.ge.s32.totalorder %s425_s6, 1  ;;  %s425_s6 = sphi %s437_s6, %s11_s6  }
   0x2   : > { %p87_p1 = scmp.lt.s32.totalorder %s425_s6, 3 }
   0x4   : > { %p88_p2 = pnand %p403_p0, %p87_p1 }
   0x5   : > { %p107_p3 = scmp.lt.s32.totalorder (!%p88_p2), %s399_s7, 1  ;;  %vm192_vm0 = vcmask (!%p88_p2), 1046528   ;;  %vm335_vm1 = vcmask (!%p88_p2), 31744  }
   0x6   : > { %91 = sbr.rel (%p88_p2) target bundleno = 58 (0x3a), region = 24 }
   0xd   : > { %s592_s7 = smov (!%p107_p3, %s399_s7), 1 }
   0xe   : > { %s410_s8 = smul.u32 576, %s592_s7  ;;  %s409_s12 = sshll.u32 %s592_s7, 6 }
   0xf   : > { %s530_s15 = scalar_lea.vmem %s590_s1, %s409_s12 }
  0x10   : > { %s451_s11 = scalar_lea.vmem %s589_s0, %s410_s8 }
  0x11   : > { %v117_v0 = vld [vmem:[%s451_s11] sm:$0xff]  ;;  %v118_v1 = vld [vmem:[%s451_s11 + $0x8] sm:$0x1]  ;;  %v456_v2 = vld [vmem:[%s451_s11 + $0x10] sm:$0xff] }
  0x12   : > { %v120_v3 = vld [vmem:[%s451_s11 + $0x18] sm:$0x1]  ;;  %v135_v4 = vld [vmem:[%s451_s11 + $0x90] sm:$0xff]  ;;  %v461_v5 = vld [vmem:[%s451_s11 + $0xa0] sm:$0xff]  ;;  %v193_v6 = vrot.slane %v117_v0, 1  ;;  %v194_v7 = vrot.slane %v118_v1, 1 }
  0x13   : > { %v144_v8 = vld [vmem:[%s451_s11 + $0x120] sm:$0xff]  ;;  %v145_v9 = vld [vmem:[%s451_s11 + $0x128] sm:$0x1]  ;;  %v146_v10 = vld [vmem:[%s451_s11 + $0x130] sm:$0xff]  ;;  %v168_v11 = vmax.f32 %v117_v0, %v135_v4  ;;  %v169_v12 = vmax.f32 %v456_v2, %v461_v5  ;;  %v196_v13 = vrot.slane %v456_v2, 1  ;;  %v197_v14 = vrot.slane %v120_v3, 1 }
  0x14   : > { %v160_v15 = vld [vmem:[%s451_s11 + $0x1b0] sm:$0xff]  ;;  %v195_v16 = vsel %vm192_vm0, %v193_v6, %v194_v7  ;;  %v265_v17 = vrot.slane %v144_v8, 1  ;;  %v266_v18 = vrot.slane %v145_v9, 1  ;;  %v268_v19 = vrot.slane %v146_v10, 1  ;;  %v121_v20 = vld [vmem:[%s451_s11 + $0x20] sm:$0xff] }
  0x15   : > { %v473_v21 = vsel %vm192_vm0, %v196_v13, %v197_v14  ;;  %v225_v22 = vmax.f32 %v168_v11, %v195_v16  ;;  %v122_v23 = vld [vmem:[%s451_s11 + $0x28] sm:$0x1]  ;;  %v477_v24 = vld [vmem:[%s451_s11 + $0xb0] sm:$0xff]  ;;  %v147_v25 = vld [vmem:[%s451_s11 + $0x138] sm:$0x1]  ;;  %v199_v26 = vrot.slane %v121_v20, 1 }
  0x16   : > { %v161_v27 = vld [vmem:[%s451_s11 + $0x1c0] sm:$0xff]  ;;  %v226_v28 = vmax.f32 %v169_v12, %v473_v21  ;;  %v170_v30 = vmax.f32 %v121_v20, %v477_v24  ;;  %v200_v31 = vrot.slane %v122_v23, 1  ;;  %v123_v32 = vld [vmem:[%s451_s11 + $0x30] sm:$0xff]  ;;  %v267_v34 = vsel %vm192_vm0, %v265_v17, %v266_v18  ;;  %v124_v37 = vld [vmem:[%s451_s11 + $0x38] sm:$0x1] }
  0x17   : > { %v148_v29 = vld [vmem:[%s451_s11 + $0x140] sm:$0xff]  ;;  %v233_v33 = vmax.f32 %v225_v22, %v144_v8  ;;  %v269_v35 = vrot.slane %v147_v25, 1  ;;  %v150_v39 = vld [vmem:[%s451_s11 + $0x150] sm:$0xff]  ;;  %v149_v42 = vld [vmem:[%s451_s11 + $0x148] sm:$0x1]  ;;  %v202_v44 = vrot.slane %v123_v32, 1 }
  0x18   : > { %v271_v36 = vrot.slane %v148_v29, 1  ;;  %v488_v38 = vld [vmem:[%s451_s11 + $0xc0] sm:$0xff]  ;;  %v234_v40 = vmax.f32 %v226_v28, %v146_v10  ;;  %v201_v41 = vsel %vm192_vm0, %v199_v26, %v200_v31  ;;  %v203_v49 = vrot.slane %v124_v37, 1  ;;  %v126_v50 = vld [vmem:[%s451_s11 + $0x48] sm:$0x1]  ;;  %v500_v51 = vld [vmem:[%s451_s11 + $0xd0] sm:$0xff] }
  0x19   : > { %v171_v43 = vmax.f32 %v123_v32, %v488_v38  ;;  %v495_v45 = vld [vmem:[%s451_s11 + $0x40] sm:$0xff]  ;;  %v241_v46 = vmax.f32 %v233_v33, %v160_v15  ;;  %v227_v47 = vmax.f32 %v170_v30, %v201_v41  ;;  %v270_v48 = vsel %vm192_vm0, %v268_v19, %v269_v35  ;;  %v162_v53 = vld [vmem:[%s451_s11 + $0x1d0] sm:$0xff]  ;;  %v151_v56 = vld [vmem:[%s451_s11 + $0x158] sm:$0x1] }
  0x1a   : > { %v242_v52 = vmax.f32 %v234_v40, %v161_v27  ;;  %v272_v54 = vrot.slane %v149_v42, 1  ;;  %v274_v55 = vrot.slane %v150_v39, 1  ;;  %v152_v57 = vld [vmem:[%s451_s11 + $0x160] sm:$0xff]  ;;  %v172_v58 = vmax.f32 %v495_v45, %v500_v51  ;;  %v510_v63 = vld [vmem:[%s451_s11 + $0x50] sm:$0xff]  ;;  %v128_v12 = vld [vmem:[%s451_s11 + $0x58] sm:$0x1] }
  0x1b   : > { %v297_v59 = vmax.f32 %v241_v46, %v267_v34  ;;  %v235_v60 = vmax.f32 %v227_v47, %v148_v29  ;;  %v204_v61 = vsel %vm192_vm0, %v202_v44, %v203_v49  ;;  %v205_v62 = vrot.slane %v495_v45, 1  ;;  %v513_v0 = vld [vmem:[%s451_s11 + $0xe0] sm:$0xff]  ;;  %v153_v16 = vld [vmem:[%s451_s11 + $0x168] sm:$0x1]  ;;  %v154_v23 = vld [vmem:[%s451_s11 + $0x170] sm:$0xff] }
  0x1c   : > { %v298_v1 = vmax.f32 %v242_v52, %v270_v48  ;;  %v228_v3 = vmax.f32 %v171_v43, %v204_v61  ;;  %v273_v4 = vsel %vm192_vm0, %v271_v36, %v272_v54  ;;  %v206_v6 = vrot.slane %v126_v50, 1  ;;  %v163_v9 = vld [vmem:[%s451_s11 + $0x1e0] sm:$0xff]  ;;  %v164_v26 = vld [vmem:[%s451_s11 + $0x1f0] sm:$0xff]  ;;  %v130_v34 = vld [vmem:[%s451_s11 + $0x68] sm:$0x1] }
  0x1d   : > { %v305_v7 = vmax.f32 %v297_v59, %v456_v2  ;;  %v243_v8 = vmax.f32 %v235_v60, %v162_v53  ;;  %v275_v10 = vrot.slane %v151_v56, 1  ;;  %v277_v11 = vrot.slane %v152_v57, 1  ;;  %v129_v33 = vld [vmem:[%s451_s11 + $0x60] sm:$0xff]  ;;  %v539_v35 = vld [vmem:[%s451_s11 + $0xf0] sm:$0xff]  ;;  %v155_v40 = vld [vmem:[%s451_s11 + $0x178] sm:$0x1] }
  0x1e   : > { %v306_v13 = vmax.f32 %v298_v1, %v121_v20  ;;  %v236_v14 = vmax.f32 %v228_v3, %v150_v39  ;;  %v207_v15 = vsel %vm192_vm0, %v205_v62, %v206_v6  ;;  %v173_v17 = vmax.f32 %v510_v63, %v513_v0  ;;  %v156_v44 = vld [vmem:[%s451_s11 + $0x180] sm:$0xff]  ;;  %v131_v46 = vld [vmem:[%s451_s11 + $0x70] sm:$0xff]  ;;  %v132_v56 = vld [vmem:[%s451_s11 + $0x78] sm:$0x1] }
  0x1f   : > { %v313_v18 = vmax.f32 %v305_v7, %v461_v5  ;;  %v299_v19 = vmax.f32 %v243_v8, %v273_v4  ;;  %v229_v2 = vmax.f32 %v172_v58, %v207_v15  ;;  %v276_v22 = vsel %vm192_vm0, %v274_v55, %v275_v10  ;;  %v142_v47 = vld [vmem:[%s451_s11 + $0x100] sm:$0xff]  ;;  %v158_v4 = vld [vmem:[%s451_s11 + $0x190] sm:$0xff]  ;;  %v159_v6 = vld [vmem:[%s451_s11 + $0x198] sm:$0x1] }
  0x20   : > { %v314_v20 = vmax.f32 %v306_v13, %v477_v24  ;;  %v244_v25 = vmax.f32 %v236_v14, %v163_v9  ;;  %v208_v5 = vrot.slane %v510_v63, 1  ;;  %v209_v27 = vrot.slane %v128_v12, 1  ;;  %v165_v48 = vld [vmem:[%s451_s11 + $0x200] sm:$0xff]  ;;  %v166_v8 = vld [vmem:[%s451_s11 + $0x210] sm:$0xff] }
  0x21   : > { %v327_v28 = vmax.f32 %v313_v18, %v473_v21  ;;  %v307_v29 = vmax.f32 %v299_v19, %v123_v32  ;;  %v237_v30 = vmax.f32 %v229_v2, %v152_v57  ;;  %v278_v31 = vrot.slane %v153_v16, 1  ;;  %v157_v57 = vld [vmem:[%s451_s11 + $0x188] sm:$0x1] }
  0x22   : > { %v328_v24 = vmax.f32 %v314_v20, %v201_v41  ;;  %v300_v36 = vmax.f32 %v244_v25, %v276_v22  ;;  %v210_v37 = vsel %vm192_vm0, %v208_v5, %v209_v27  ;;  %v280_v39 = vrot.slane %v154_v23, 1  ;;  %v167_v22 = vld [vmem:[%s451_s11 + $0x220] sm:$0xff] }
  0x23   : > { %336 = vst.msk [vmem:[%s530_s15] sm:$0xff] %vm335_vm1, %v327_v28  ;;  %v315_v21 = vmax.f32 %v307_v29, %v488_v38  ;;  %v245_v32 = vmax.f32 %v237_v30, %v164_v26  ;;  %v230_v42 = vmax.f32 %v173_v17, %v210_v37  ;;  %v279_v43 = vsel %vm192_vm0, %v277_v11, %v278_v31  ;;  %v133_v25 = vld [vmem:[%s451_s11 + $0x80] sm:$0xff]  ;;  %v134_v26 = vld [vmem:[%s451_s11 + $0x88] sm:$0x1] }
  0x24   : > { %337 = vst.msk [vmem:[%s530_s15 + $0x8] sm:$0xff] %vm335_vm1, %v328_v24  ;;  %v308_v41 = vmax.f32 %v300_v36, %v495_v45  ;;  %v174_v49 = vmax.f32 %v129_v33, %v539_v35  ;;  %v211_v50 = vrot.slane %v129_v33, 1  ;;  %v212_v52 = vrot.slane %v130_v34, 1  ;;  %v143_v24 = vld [vmem:[%s451_s11 + $0x110] sm:$0xff] }
  0x25   : > { %v329_v38 = vmax.f32 %v315_v21, %v204_v61  ;;  %v238_v53 = vmax.f32 %v230_v42, %v154_v23  ;;  %v301_v54 = vmax.f32 %v245_v32, %v279_v43  ;;  %v281_v55 = vrot.slane %v155_v40, 1 }
  0x26   : > { %v316_v58 = vmax.f32 %v308_v41, %v500_v51  ;;  %v213_v59 = vsel %vm192_vm0, %v211_v50, %v212_v52  ;;  %v283_v60 = vrot.slane %v156_v44, 1  ;;  %v175_v45 = vmax.f32 %v131_v46, %v142_v47 }
  0x27   : > { %338 = vst.msk [vmem:[%s530_s15 + $0x10] sm:$0xff] %vm335_vm1, %v329_v38  ;;  %v246_v62 = vmax.f32 %v238_v53, %v165_v48  ;;  %v309_v1 = vmax.f32 %v301_v54, %v510_v63  ;;  %v231_v61 = vmax.f32 %v174_v49, %v213_v59  ;;  %v282_v3 = vsel %vm192_vm0, %v280_v39, %v281_v55 }
  0x28   : > { %v330_v7 = vmax.f32 %v316_v58, %v207_v15  ;;  %v214_v9 = vrot.slane %v131_v46, 1  ;;  %v215_v51 = vrot.slane %v132_v56, 1  ;;  %v284_v10 = vrot.slane %v157_v57, 1 }
  0x29   : > { %v317_v11 = vmax.f32 %v309_v1, %v513_v0  ;;  %v239_v12 = vmax.f32 %v231_v61, %v156_v44  ;;  %v302_v13 = vmax.f32 %v246_v62, %v282_v3  ;;  %v286_v16 = vrot.slane %v158_v4, 1 }
  0x2a   : > { %339 = vst.msk [vmem:[%s530_s15 + $0x18] sm:$0xff] %vm335_vm1, %v330_v7  ;;  %v216_v63 = vsel %vm192_vm0, %v214_v9, %v215_v51  ;;  %v285_v14 = vsel %vm192_vm0, %v283_v60, %v284_v10  ;;  %v287_v15 = vrot.slane %v159_v6, 1  ;;  %v323_v30 = vrot.slane %v133_v25, 1 }
  0x2b   : > { %v331_v17 = vmax.f32 %v317_v11, %v210_v37  ;;  %v247_v18 = vmax.f32 %v239_v12, %v166_v8  ;;  %v310_v19 = vmax.f32 %v302_v13, %v129_v33  ;;  %v232_v2 = vmax.f32 %v175_v45, %v216_v63 }
  0x2c   : > { %v288_v5 = vsel %vm192_vm0, %v286_v16, %v287_v15  ;;  %v324_v31 = vrot.slane %v134_v26, 1 }
  0x2d   : > { %340 = vst.msk [vmem:[%s530_s15 + $0x20] sm:$0xff] %vm335_vm1, %v331_v17  ;;  %v318_v0 = vmax.f32 %v310_v19, %v539_v35  ;;  %v240_v23 = vmax.f32 %v232_v2, %v158_v4  ;;  %v303_v20 = vmax.f32 %v247_v18, %v285_v14 }
  0x2e   : > { %v325_v37 = vsel %vm192_vm0, %v323_v30, %v324_v31 }
  0x2f   : > { %v332_v27 = vmax.f32 %v318_v0, %v213_v59  ;;  %v248_v28 = vmax.f32 %v240_v23, %v167_v22  ;;  %v311_v29 = vmax.f32 %v303_v20, %v131_v46 }
  0x31   : > { %341 = vst.msk [vmem:[%s530_s15 + $0x28] sm:$0xff] %vm335_vm1, %v332_v27  ;;  %v319_v33 = vmax.f32 %v311_v29, %v142_v47  ;;  %v304_v34 = vmax.f32 %v248_v28, %v288_v5 }
  0x33   : > { %v333_v36 = vmax.f32 %v319_v33, %v216_v63  ;;  %v312_v35 = vmax.f32 %v304_v34, %v133_v25 }
  0x35   : > { %342 = vst.msk [vmem:[%s530_s15 + $0x30] sm:$0xff] %vm335_vm1, %v333_v36  ;;  %v320_v39 = vmax.f32 %v312_v35, %v143_v24 }
  0x37   : > { %v334_v40 = vmax.f32 %v320_v39, %v325_v37 }
  0x39   : > { %343 = vst.msk [vmem:[%s530_s15 + $0x38] sm:$0xff] %vm335_vm1, %v334_v40 }
  0x3a PF: > { %s11_s6 = sadd.s32 1, %s425_s6  }
  0x3b   : > { %p8_p4 = scmp.ge.s32.totalorder %s11_s6, 4  }
  0x3d   :  { %10 = sbr.rel (!%p8_p4) target bundleno = 1 (0x1), region = 54 }

// kernel: _lambda_.4
= control target key start
LH: loop header
LB: loop body
LE: loop exit
PB: predicated region body
PF: predicated region fallthrough
CT: control target
= control target key end

     0   :  { %s877_s12 = smov 0   ;;  %s1054_s0 = inlined_call_operand.vmem [shape: f32[512,4], index: 0, kind: input, shape index: {}]   ;;  %s1055_s1 = inlined_call_operand.vmem [shape: bf16[4,16], index: 1, kind: input, shape index: {}]   ;;  %s1056_s2 = inlined_call_operand.vmem [shape: f32[1,16], index: 2, kind: input, shape index: {}]   ;;  %s1057_s3 = inlined_call_operand.vmem [shape: bf16[512,16], index: 3, kind: output, shape index: {}]  }
   0x1 LB: > { %s694_s13 = sadd.s32 4294967295, %s855_s12   ;;  %p698_p0 = scmp.ge.s32.totalorder %s855_s12, 1  ;;  %s855_s12 = sphi %s877_s12, %s13_s12  }
   0x2   : > { %p138_p1 = scmp.lt.s32.totalorder %s855_s12, 3 }
   0x4   : > { %p139_p2 = pnand %p698_p0, %p138_p1 }
   0x5   : > { %v223_v0 = vld [vmem:[%s1055_s1] sm:$0x3] (!%p139_p2)  ;;  %vm280_vm0 = vcmask (!%p139_p2), 1041408   ;;  %s699_s16 = sshll.u32 (!%p139_p2), %s694_s13, 5  ;;  %vm231_vm1 = vcmask (!%p139_p2), 31744   ;;  %vm605_vm2 = vcmask (!%p139_p2), 125952  }
   0x6   : > { %142 = sbr.rel (%p139_p2) target bundleno = 267 (0x10b), region = 32  ;;  %839 = vmatprep.subr.msk.bf16.mxu0 (!%p139_p2), %vm280_vm0, %v223_v0  ;;  %840 = vmatprep.subr.msk.bf16.mxu1 (!%p139_p2), %vm280_vm0, %v223_v0  ;;  %v282_v1 = vsel (!%p139_p2), %vm280_vm0, %v223_v0, 0  ;;  %p163_p3 = scmp.lt.s32.totalorder (!%p139_p2), %s699_s16, 63  ;;  %v947_v50 = vld [vmem:[%s1056_s2] ss:$0 sm:$0xff] (!%p139_p2) }
   0x7   : > { %804 = vmatpush3.bf16.msra.mxu0 (!%p139_p2), %v282_v1  ;;  %838 = vmatpush3.bf16.msra.mxu1 (!%p139_p2), %v282_v1 }
   0xd   : > { %s1059_s16 = smov (!%p163_p3, %s699_s16), 63 }
   0xe   : > { %s700_s17 = sshll.u32 %s1059_s16, 3  ;;  %s702_s23 = sshll.u32 %s1059_s16, 2 }
   0xf   : > { %s894_s20 = scalar_lea.vmem %s1054_s0, %s700_s17  ;;  %s958_s26 = scalar_lea.vmem %s1057_s3, %s702_s23 }
  0x10   : > { %v175_v2 = vld [vmem:[%s894_s20] sm:$0xff]  ;;  %v176_v3 = vld [vmem:[%s894_s20 + $0x8] sm:$0xff]  ;;  %v177_v7 = vld [vmem:[%s894_s20 + $0x10] sm:$0xff] }
  0x11   : > { %v191_v4 = vld [vmem:[%s894_s20 + $0x80] sm:$0xff]  ;;  %v207_v5 = vpack.c.bf16 %v176_v3, %v175_v2  ;;  %v192_v6 = vld [vmem:[%s894_s20 + $0x88] sm:$0xff]  ;;  %v178_v8 = vld [vmem:[%s894_s20 + $0x18] sm:$0xff] }
  0x12   : > { %v215_v9 = vpack.c.bf16 %v192_v6, %v191_v4  ;;  %v208_v10 = vpack.c.bf16 %v178_v8, %v177_v7  ;;  %v193_v11 = vld [vmem:[%s894_s20 + $0x90] sm:$0xff]  ;;  %v194_v12 = vld [vmem:[%s894_s20 + $0x98] sm:$0xff]  ;;  %v179_v13 = vld [vmem:[%s894_s20 + $0x20] sm:$0xff] }
  0x13   : > { %805 = vmatprep.mubr.msk.bf16.mxu0 %vm231_vm1, %v207_v5  ;;  %v216_v14 = vpack.c.bf16 %v194_v12, %v193_v11  ;;  %v180_v15 = vld [vmem:[%s894_s20 + $0x28] sm:$0xff]  ;;  %v195_v16 = vld [vmem:[%s894_s20 + $0xa0] sm:$0xff]  ;;  %v181_v20 = vld [vmem:[%s894_s20 + $0x30] sm:$0xff] }
  0x14   : > { %v196_v17 = vld [vmem:[%s894_s20 + $0xa8] sm:$0xff]  ;;  %821 = vmatprep.mubr.msk.bf16.mxu1 %vm231_vm1, %v215_v9  ;;  %806 = vmatmul.mubr.msk.bf16.vlgmr.msra.gmra.mrb[0].mxu0 %vm231_vm1, %v208_v10  ;;  %v209_v18 = vpack.c.bf16 %v180_v15, %v179_v13  ;;  %v182_v21 = vld [vmem:[%s894_s20 + $0x38] sm:$0xff]  ;;  %v197_v22 = vld [vmem:[%s894_s20 + $0xb0] sm:$0xff] }
  0x15   : > { %v217_v19 = vpack.c.bf16 %v196_v17, %v195_v16  ;;  %822 = vmatmul.mubr.msk.bf16.vlgmr.msra.gmra.mrb[0].mxu1 %vm231_vm1, %v216_v14  ;;  %v198_v23 = vld [vmem:[%s894_s20 + $0xb8] sm:$0xff]  ;;  %v183_v24 = vld [vmem:[%s894_s20 + $0x40] sm:$0xff]  ;;  %v184_v25 = vld [vmem:[%s894_s20 + $0x48] sm:$0xff]  ;;  %v210_v28 = vpack.c.bf16 %v182_v21, %v181_v20 }
  0x16   : > { %809 = vmatprep.mubr.msk.bf16.mxu0 %vm231_vm1, %v209_v18  ;;  %v199_v26 = vld [vmem:[%s894_s20 + $0xc0] sm:$0xff]  ;;  %v200_v27 = vld [vmem:[%s894_s20 + $0xc8] sm:$0xff]  ;;  %v218_v29 = vpack.c.bf16 %v198_v23, %v197_v22  ;;  %v211_v30 = vpack.c.bf16 %v184_v25, %v183_v24  ;;  %v185_v32 = vld [vmem:[%s894_s20 + $0x50] sm:$0xff] }
  0x17   : > { %825 = vmatprep.mubr.msk.bf16.mxu1 %vm231_vm1, %v217_v19  ;;  %v219_v31 = vpack.c.bf16 %v200_v27, %v199_v26  ;;  %v186_v33 = vld [vmem:[%s894_s20 + $0x58] sm:$0xff]  ;;  %v201_v34 = vld [vmem:[%s894_s20 + $0xd0] sm:$0xff]  ;;  %v187_v36 = vld [vmem:[%s894_s20 + $0x60] sm:$0xff] }
  0x18   : > { %v202_v35 = vld [vmem:[%s894_s20 + $0xd8] sm:$0xff]  ;;  %v188_v37 = vld [vmem:[%s894_s20 + $0x68] sm:$0xff]  ;;  %v203_v38 = vld [vmem:[%s894_s20 + $0xe0] sm:$0xff]  ;;  %v212_v40 = vpack.c.bf16 %v186_v33, %v185_v32 }
  0x19   : > { %v204_v39 = vld [vmem:[%s894_s20 + $0xe8] sm:$0xff]  ;;  %v220_v41 = vpack.c.bf16 %v202_v35, %v201_v34  ;;  %v213_v42 = vpack.c.bf16 %v188_v37, %v187_v36  ;;  %v189_v44 = vld [vmem:[%s894_s20 + $0x70] sm:$0xff]  ;;  %v190_v45 = vld [vmem:[%s894_s20 + $0x78] sm:$0xff] }
  0x1a   : > { %v221_v43 = vpack.c.bf16 %v204_v39, %v203_v38  ;;  %v205_v46 = vld [vmem:[%s894_s20 + $0xf0] sm:$0xff]  ;;  %v206_v47 = vld [vmem:[%s894_s20 + $0xf8] sm:$0xff]  ;;  %v214_v48 = vpack.c.bf16 %v190_v45, %v189_v44 }
  0x1b   : > { %v222_v49 = vpack.c.bf16 %v206_v47, %v205_v46 }
  0x1c   : > { %810 = vmatmul.mubr.msk.bf16.gmra.mrb[4].mxu0 %vm231_vm1, %v210_v28 }
  0x1d   : > { %826 = vmatmul.mubr.msk.bf16.gmra.mrb[4].mxu1 %vm231_vm1, %v218_v29  ;;  %813 = vmatprep.mubr.msk.bf16.mxu0 %vm231_vm1, %v211_v30 }
  0x1e   : > { %829 = vmatprep.mubr.msk.bf16.mxu1 %vm231_vm1, %v219_v31 }
  0x24   : > { %814 = vmatmul.mubr.msk.bf16.gmra.mrb[8].mxu0 %vm231_vm1, %v212_v40 }
  0x25   : > { %830 = vmatmul.mubr.msk.bf16.gmra.mrb[8].mxu1 %vm231_vm1, %v220_v41  ;;  %817 = vmatprep.mubr.msk.bf16.mxu0 %vm231_vm1, %v213_v42 }
  0x26   : > { %833 = vmatprep.mubr.msk.bf16.mxu1 %vm231_vm1, %v221_v43 }
  0x2c   : > { %818 = vmatmul.mubr.msk.bf16.gmra.mrb[12].mxu0 %vm231_vm1, %v214_v48 }
  0x2d   : > { %834 = vmatmul.mubr.msk.bf16.gmra.mrb[12].mxu1 %vm231_vm1, %v222_v49 }
  0xe7   : > { %v807_v51 = vpop.f32.mrb[0].mxu0 }
  0xe8   : > { %v327_v52 = vadd.f32 %v807_v51, %v947_v50  ;;  %v823_v53 = vpop.f32.mrb[0].mxu1  ;;  %v318_v54 = vpop.f32.mrb[1].mxu0 }
  0xe9   : > { %v391_v55 = vadd.f32 %v823_v53, %v947_v50  ;;  %v319_v56 = vadd.f32 %v947_v50, %v318_v54  ;;  %v382_v57 = vpop.f32.mrb[1].mxu1  ;;  %v808_v58 = vpop.f32.mrb[2].mxu0 }
  0xea   : > { %v447_v59 = vmax.f32 %v327_v52, 0.0  ;;  %v383_v60 = vadd.f32 %v947_v50, %v382_v57  ;;  %v330_v61 = vadd.f32 %v808_v58, %v947_v50  ;;  %v824_v62 = vpop.f32.mrb[2].mxu1  ;;  %v321_v63 = vpop.f32.mrb[3].mxu0 }
  0xeb   : > { %v463_v0 = vmax.f32 %v391_v55, 0.0  ;;  %v445_v1 = vmax.f32 %v319_v56, 0.0  ;;  %v394_v2 = vadd.f32 %v824_v62, %v947_v50  ;;  %v322_v3 = vadd.f32 %v947_v50, %v321_v63  ;;  %v385_v4 = vpop.f32.mrb[3].mxu1 }
  0xec   : > { %v756_v5 = vpack.c.bf16 %v447_v59, %v447_v59  ;;  %v461_v6 = vmax.f32 %v383_v60, 0.0  ;;  %v448_v7 = vmax.f32 %v330_v61, 0.0  ;;  %v386_v8 = vadd.f32 %v947_v50, %v385_v4 }
  0xed   : > { %v772_v9 = vpack.c.bf16 %v463_v0, %v463_v0  ;;  %v754_v10 = vpack.c.bf16 %v445_v1, %v445_v1  ;;  %v464_v11 = vmax.f32 %v394_v2, 0.0  ;;  %v446_v12 = vmax.f32 %v322_v3, 0.0 }
  0xee   : > { %608 = vst.msk [vmem:[%s958_s26 + $0x8] sm:$0xf] %vm605_vm2, %v756_v5  ;;  %v770_v13 = vpack.c.bf16 %v461_v6, %v461_v6  ;;  %v757_v14 = vpack.c.bf16 %v448_v7, %v448_v7  ;;  %v462_v15 = vmax.f32 %v386_v8, 0.0 }
  0xef   : > { %624 = vst.msk [vmem:[%s958_s26 + $0x48] sm:$0xf] %vm605_vm2, %v772_v9  ;;  %606 = vst.msk [vmem:[%s958_s26] sm:$0xf] %vm605_vm2, %v754_v10  ;;  %v773_v16 = vpack.c.bf16 %v464_v11, %v464_v11  ;;  %v755_v17 = vpack.c.bf16 %v446_v12, %v446_v12  ;;  %v811_v18 = vpop.f32.mrb[4].mxu0 }
  0xf0   : > { %622 = vst.msk [vmem:[%s958_s26 + $0x40] sm:$0xf] %vm605_vm2, %v770_v13  ;;  %609 = vst.msk [vmem:[%s958_s26 + $0xc] sm:$0xf] %vm605_vm2, %v757_v14  ;;  %v771_v19 = vpack.c.bf16 %v462_v15, %v462_v15  ;;  %v343_v20 = vadd.f32 %v811_v18, %v947_v50  ;;  %v827_v21 = vpop.f32.mrb[4].mxu1  ;;  %v334_v22 = vpop.f32.mrb[5].mxu0 }
  0xf1   : > { %625 = vst.msk [vmem:[%s958_s26 + $0x4c] sm:$0xf] %vm605_vm2, %v773_v16  ;;  %607 = vst.msk [vmem:[%s958_s26 + $0x4] sm:$0xf] %vm605_vm2, %v755_v17  ;;  %v407_v23 = vadd.f32 %v827_v21, %v947_v50  ;;  %v335_v24 = vadd.f32 %v947_v50, %v334_v22  ;;  %v398_v25 = vpop.f32.mrb[5].mxu1  ;;  %v812_v26 = vpop.f32.mrb[6].mxu0 }
  0xf2   : > { %623 = vst.msk [vmem:[%s958_s26 + $0x44] sm:$0xf] %vm605_vm2, %v771_v19  ;;  %v451_v27 = vmax.f32 %v343_v20, 0.0  ;;  %v399_v28 = vadd.f32 %v947_v50, %v398_v25  ;;  %v346_v29 = vadd.f32 %v812_v26, %v947_v50  ;;  %v828_v30 = vpop.f32.mrb[6].mxu1  ;;  %v337_v31 = vpop.f32.mrb[7].mxu0 }
  0xf3   : > { %v467_v32 = vmax.f32 %v407_v23, 0.0  ;;  %v449_v33 = vmax.f32 %v335_v24, 0.0  ;;  %v410_v34 = vadd.f32 %v828_v30, %v947_v50  ;;  %v338_v35 = vadd.f32 %v947_v50, %v337_v31  ;;  %v401_v36 = vpop.f32.mrb[7].mxu1 }
  0xf4   : > { %v760_v37 = vpack.c.bf16 %v451_v27, %v451_v27  ;;  %v465_v38 = vmax.f32 %v399_v28, 0.0  ;;  %v452_v39 = vmax.f32 %v346_v29, 0.0  ;;  %v402_v40 = vadd.f32 %v947_v50, %v401_v36 }
  0xf5   : > { %v776_v41 = vpack.c.bf16 %v467_v32, %v467_v32  ;;  %v758_v42 = vpack.c.bf16 %v449_v33, %v449_v33  ;;  %v468_v43 = vmax.f32 %v410_v34, 0.0  ;;  %v450_v44 = vmax.f32 %v338_v35, 0.0 }
  0xf6   : > { %612 = vst.msk [vmem:[%s958_s26 + $0x18] sm:$0xf] %vm605_vm2, %v760_v37  ;;  %v774_v45 = vpack.c.bf16 %v465_v38, %v465_v38  ;;  %v761_v46 = vpack.c.bf16 %v452_v39, %v452_v39  ;;  %v466_v47 = vmax.f32 %v402_v40, 0.0 }
  0xf7   : > { %628 = vst.msk [vmem:[%s958_s26 + $0x58] sm:$0xf] %vm605_vm2, %v776_v41  ;;  %610 = vst.msk [vmem:[%s958_s26 + $0x10] sm:$0xf] %vm605_vm2, %v758_v42  ;;  %v777_v48 = vpack.c.bf16 %v468_v43, %v468_v43  ;;  %v759_v49 = vpack.c.bf16 %v450_v44, %v450_v44  ;;  %v815_v51 = vpop.f32.mrb[8].mxu0 }
  0xf8   : > { %626 = vst.msk [vmem:[%s958_s26 + $0x50] sm:$0xf] %vm605_vm2, %v774_v45  ;;  %613 = vst.msk [vmem:[%s958_s26 + $0x1c] sm:$0xf] %vm605_vm2, %v761_v46  ;;  %v775_v52 = vpack.c.bf16 %v466_v47, %v466_v47  ;;  %v359_v53 = vadd.f32 %v815_v51, %v947_v50  ;;  %v831_v54 = vpop.f32.mrb[8].mxu1  ;;  %v350_v55 = vpop.f32.mrb[9].mxu0 }
  0xf9   : > { %629 = vst.msk [vmem:[%s958_s26 + $0x5c] sm:$0xf] %vm605_vm2, %v777_v48  ;;  %611 = vst.msk [vmem:[%s958_s26 + $0x14] sm:$0xf] %vm605_vm2, %v759_v49  ;;  %v423_v56 = vadd.f32 %v831_v54, %v947_v50  ;;  %v351_v57 = vadd.f32 %v947_v50, %v350_v55  ;;  %v414_v58 = vpop.f32.mrb[9].mxu1  ;;  %v816_v59 = vpop.f32.mrb[10].mxu0 }
  0xfa   : > { %627 = vst.msk [vmem:[%s958_s26 + $0x54] sm:$0xf] %vm605_vm2, %v775_v52  ;;  %v455_v60 = vmax.f32 %v359_v53, 0.0  ;;  %v415_v61 = vadd.f32 %v947_v50, %v414_v58  ;;  %v362_v62 = vadd.f32 %v816_v59, %v947_v50  ;;  %v832_v63 = vpop.f32.mrb[10].mxu1  ;;  %v353_v0 = vpop.f32.mrb[11].mxu0 }
  0xfb   : > { %v471_v1 = vmax.f32 %v423_v56, 0.0  ;;  %v453_v2 = vmax.f32 %v351_v57, 0.0  ;;  %v426_v3 = vadd.f32 %v832_v63, %v947_v50  ;;  %v354_v4 = vadd.f32 %v947_v50, %v353_v0  ;;  %v417_v5 = vpop.f32.mrb[11].mxu1 }
  0xfc   : > { %v764_v6 = vpack.c.bf16 %v455_v60, %v455_v60  ;;  %v469_v7 = vmax.f32 %v415_v61, 0.0  ;;  %v456_v8 = vmax.f32 %v362_v62, 0.0  ;;  %v418_v9 = vadd.f32 %v947_v50, %v417_v5 }
  0xfd   : > { %v780_v10 = vpack.c.bf16 %v471_v1, %v471_v1  ;;  %v762_v11 = vpack.c.bf16 %v453_v2, %v453_v2  ;;  %v472_v12 = vmax.f32 %v426_v3, 0.0  ;;  %v454_v13 = vmax.f32 %v354_v4, 0.0 }
  0xfe   : > { %616 = vst.msk [vmem:[%s958_s26 + $0x28] sm:$0xf] %vm605_vm2, %v764_v6  ;;  %v778_v14 = vpack.c.bf16 %v469_v7, %v469_v7  ;;  %v765_v15 = vpack.c.bf16 %v456_v8, %v456_v8  ;;  %v470_v16 = vmax.f32 %v418_v9, 0.0 }
  0xff   : > { %632 = vst.msk [vmem:[%s958_s26 + $0x68] sm:$0xf] %vm605_vm2, %v780_v10  ;;  %614 = vst.msk [vmem:[%s958_s26 + $0x20] sm:$0xf] %vm605_vm2, %v762_v11  ;;  %v781_v17 = vpack.c.bf16 %v472_v12, %v472_v12  ;;  %v763_v18 = vpack.c.bf16 %v454_v13, %v454_v13  ;;  %v819_v19 = vpop.f32.mrb[12].mxu0 }
 0x100   : > { %630 = vst.msk [vmem:[%s958_s26 + $0x60] sm:$0xf] %vm605_vm2, %v778_v14  ;;  %617 = vst.msk [vmem:[%s958_s26 + $0x2c] sm:$0xf] %vm605_vm2, %v765_v15  ;;  %v779_v20 = vpack.c.bf16 %v470_v16, %v470_v16  ;;  %v375_v21 = vadd.f32 %v819_v19, %v947_v50  ;;  %v835_v22 = vpop.f32.mrb[12].mxu1  ;;  %v366_v23 = vpop.f32.mrb[13].mxu0 }
 0x101   : > { %633 = vst.msk [vmem:[%s958_s26 + $0x6c] sm:$0xf] %vm605_vm2, %v781_v17  ;;  %615 = vst.msk [vmem:[%s958_s26 + $0x24] sm:$0xf] %vm605_vm2, %v763_v18  ;;  %v439_v24 = vadd.f32 %v835_v22, %v947_v50  ;;  %v367_v25 = vadd.f32 %v947_v50, %v366_v23  ;;  %v430_v26 = vpop.f32.mrb[13].mxu1  ;;  %v820_v27 = vpop.f32.mrb[14].mxu0 }
 0x102   : > { %631 = vst.msk [vmem:[%s958_s26 + $0x64] sm:$0xf] %vm605_vm2, %v779_v20  ;;  %v459_v28 = vmax.f32 %v375_v21, 0.0  ;;  %v431_v29 = vadd.f32 %v947_v50, %v430_v26  ;;  %v378_v30 = vadd.f32 %v820_v27, %v947_v50  ;;  %v836_v31 = vpop.f32.mrb[14].mxu1  ;;  %v369_v32 = vpop.f32.mrb[15].mxu0 }
 0x103   : > { %v475_v33 = vmax.f32 %v439_v24, 0.0  ;;  %v457_v34 = vmax.f32 %v367_v25, 0.0  ;;  %v442_v35 = vadd.f32 %v836_v31, %v947_v50  ;;  %v370_v36 = vadd.f32 %v947_v50, %v369_v32  ;;  %v433_v37 = vpop.f32.mrb[15].mxu1 }
 0x104   : > { %v768_v38 = vpack.c.bf16 %v459_v28, %v459_v28  ;;  %v473_v39 = vmax.f32 %v431_v29, 0.0  ;;  %v460_v40 = vmax.f32 %v378_v30, 0.0  ;;  %v434_v41 = vadd.f32 %v947_v50, %v433_v37 }
 0x105   : > { %v784_v42 = vpack.c.bf16 %v475_v33, %v475_v33  ;;  %v766_v43 = vpack.c.bf16 %v457_v34, %v457_v34  ;;  %v476_v44 = vmax.f32 %v442_v35, 0.0  ;;  %v458_v45 = vmax.f32 %v370_v36, 0.0 }
 0x106   : > { %620 = vst.msk [vmem:[%s958_s26 + $0x38] sm:$0xf] %vm605_vm2, %v768_v38  ;;  %v782_v46 = vpack.c.bf16 %v473_v39, %v473_v39  ;;  %v769_v47 = vpack.c.bf16 %v460_v40, %v460_v40  ;;  %v474_v48 = vmax.f32 %v434_v41, 0.0 }
 0x107   : > { %636 = vst.msk [vmem:[%s958_s26 + $0x78] sm:$0xf] %vm605_vm2, %v784_v42  ;;  %618 = vst.msk [vmem:[%s958_s26 + $0x30] sm:$0xf] %vm605_vm2, %v766_v43  ;;  %v785_v49 = vpack.c.bf16 %v476_v44, %v476_v44  ;;  %v767_v51 = vpack.c.bf16 %v458_v45, %v458_v45 }
 0x108   : > { %634 = vst.msk [vmem:[%s958_s26 + $0x70] sm:$0xf] %vm605_vm2, %v782_v46  ;;  %621 = vst.msk [vmem:[%s958_s26 + $0x3c] sm:$0xf] %vm605_vm2, %v769_v47  ;;  %v783_v50 = vpack.c.bf16 %v474_v48, %v474_v48 }
 0x109   : > { %637 = vst.msk [vmem:[%s958_s26 + $0x7c] sm:$0xf] %vm605_vm2, %v785_v49  ;;  %619 = vst.msk [vmem:[%s958_s26 + $0x34] sm:$0xf] %vm605_vm2, %v767_v51 }
 0x10a   : > { %635 = vst.msk [vmem:[%s958_s26 + $0x74] sm:$0xf] %vm605_vm2, %v783_v50 }
 0x10b PF: > { %s13_s12 = sadd.s32 1, %s855_s12  }
 0x10c   : > { %p10_p4 = scmp.ge.s32.totalorder %s13_s12, 4  }
 0x10e   :  { %12 = sbr.rel (!%p10_p4) target bundleno = 1 (0x1), region = 62 }

// kernel: _lambda_.5
= control target key start
LH: loop header
LB: loop body
LE: loop exit
PB: predicated region body
PF: predicated region fallthrough
CT: control target
= control target key end

     0   :  { %s2686_s12 = smov 0   ;;  %s2688_s13 = smov 0   ;;  %s3370_s0 = inlined_call_operand.vmem [shape: bf16[2,18,18,8], index: 0, kind: input, shape index: {}]   ;;  %s3371_s1 = inlined_call_operand.vmem [shape: bf16[3,3,8,8], index: 1, kind: input, shape index: {}]   ;;  %s3372_s2 = inlined_call_operand.vmem [shape: f32[1,8], index: 2, kind: input, shape index: {}]   ;;  %s3373_s3 = inlined_call_operand.vmem [shape: bf16[2,256,8], index: 3, kind: output, shape index: {}]  }
   0x1   :  { %s2690_s14 = smov 0   ;;  %s2692_s15 = smov 0  }
   0x2   :  { %s2694_s16 = smov 0  }
   0x3 LB: > { %s22_s17 = sadd.s32 1, %s2656_s14  ;;  %s25_s18 = sadd.s32 1, %s2660_s15  ;;  %s2664_s16 = sphi %s2694_s16, %s13_s16   ;;  %s2660_s15 = sphi %s2692_s15, %s3381_s15   ;;  %s2656_s14 = sphi %s2690_s14, %s3380_s14   ;;  %s2652_s13 = sphi %s2688_s13, %s3379_s13   ;;  %s2648_s12 = sphi %s2686_s12, %s3378_s12  }
   0x4   : > { %p23_p0 = scmp.ge.s32.totalorder %s22_s17, 2  ;;  %p2012_p1 = scmp.ge.s32.totalorder %s2664_s16, 1 }
   0x5   : > { %p151_p2 = scmp.lt.s32.totalorder %s2664_s16, 5 }
   0x6   : > { %s3383_s17 = smov (%p23_p0, %s22_s17), 0  ;;  %s3385_s18 = smov (!%p23_p0, %s25_s18), %s2660_s15 }
   0x7   : > { %p152_p3 = pnand %p2012_p1, %p151_p2  ;;  %p27_p4 = scmp.ge.s32.totalorder %s3385_s18, 2 }
   0x8   : > { %v236_v0 = vld [vmem:[%s3371_s1] sm:$0xf] (!%p152_p3)  ;;  %vm302_vm0 = vcmask (!%p152_p3), 1043456   ;;  %p179_p5 = scmp.lt.s32.totalorder (!%p152_p3), %s2652_s13, 1  ;;  %v2726_v2 = vld [vmem:[%s3371_s1 + $0x10] sm:$0xf] (!%p152_p3) }
   0x9   : > { %s3387_s18 = smov (%p27_p4, %s3385_s18), 0  ;;  %155 = sbr.rel (%p152_p3) target bundleno = 400 (0x190), region = 32 }
   0xa   : > { %2565 = vmatprep.subr.msk.bf16.mxu1 (!%p152_p3), %vm302_vm0, %v236_v0  ;;  %v304_v1 = vsel (!%p152_p3), %vm302_vm0, %v236_v0, 0  ;;  %v2037_v3 = vld [vmem:[%s3371_s1 + $0x4] sm:$0xf] (!%p152_p3)  ;;  %2569 = vmatprep.subr.msk.bf16.mxu0 (!%p152_p3), %vm302_vm0, %v2726_v2  ;;  %v2737_v4 = vsel (!%p152_p3), %vm302_vm0, %v2726_v2, 0  ;;  %s2159_s25 = smul.u32 (!%p152_p3), 96, %s2648_s12  ;;  %vm277_vm1 = vcmask (!%p152_p3), 64512  }
   0xb   : > { %2258 = vmatpush3.bf16.msra.mxu1 (!%p152_p3), %v304_v1  ;;  %2330 = vmatpush3.bf16.msra.mxu0 (!%p152_p3), %v2737_v4  ;;  %v2100_v5 = vld [vmem:[%s3371_s1 + $0x14] sm:$0xf] (!%p152_p3)  ;;  %v665_v6 = vsel (!%p152_p3), %vm302_vm0, %v2037_v3, 0  ;;  %v2756_v7 = vld [vmem:[%s3371_s1 + $0x18] sm:$0xf] (!%p152_p3)  ;;  %vm788_vm5 = vcmask (!%p152_p3), 1042432  }
   0xc   : > { %2566 = vmatprep.subr.msk.bf16.mxu1 (!%p152_p3), %vm302_vm0, %v2037_v3  ;;  %2571 = vmatprep.subr.msk.bf16.mxu0 (!%p152_p3), %vm302_vm0, %v2100_v5  ;;  %v2062_v8 = vld [vmem:[%s3371_s1 + $0x8] sm:$0xf] (!%p152_p3)  ;;  %vm419_vm2 = vsmask.f32 (!%p152_p3), 3328  ;;  %vm420_vm3 = vsmask.f32 (!%p152_p3), 7440 }
   0xd   : > { %v2792_v24 = vsel (!%p152_p3), %vm302_vm0, %v2100_v5, 0  ;;  %v2803_v27 = vsel (!%p152_p3), %vm302_vm0, %v2756_v7, 0  ;;  %v2806_v28 = vsel (!%p152_p3), %vm302_vm0, %v2062_v8, 0  ;;  %vm2863_vm4 = vmor (!%p152_p3), %vm419_vm2, %vm420_vm3  ;;  %vm789_vm6 = vcmask (!%p152_p3), 1046532   ;;  %s2014_s23 = sshll.u32 (!%p152_p3), %s2648_s12, 4 }
   0xe   : > { %vm2951_vm7 = vmor (!%p152_p3), %vm788_vm5, %vm789_vm6  ;;  %p187_p6 = scmp.lt.s32.totalorder (!%p152_p3), %s2014_s23, 31  ;;  %vm1905_vm8 = vcmask (!%p152_p3), 60416  }
  0x10   : > { %s3389_s13 = smov (!%p179_p5, %s2652_s13), 1  ;;  %s3391_s23 = smov (!%p187_p6, %s2014_s23), 31 }
  0x11   : > { %s2575_s28 = smul.u32 216, %s3389_s13  ;;  %s2015_s24 = sshll.u32 %s3389_s13, 5 }
  0x12   : > { %s190_s27 = sadd.s32 %s2015_s24, %s3391_s23 }
  0x13   : > { %s183_s4 = scalar_lea.vmem %s3370_s0, %s2575_s28  ;;  %s2016_s28 = sshll.u32 %s190_s27, 2 }
  0x14   : > { %s2750_s5 = scalar_lea.vmem %s183_s4, %s2159_s25  ;;  %s3309_s29 = scalar_lea.vmem %s3373_s3, %s2016_s28 }
  0x15   : > { %v2762_v9 = vld [vmem:[%s2750_s5] sm:$0xf]  ;;  %v2765_v10 = vld [vmem:[%s2750_s5 + $0x4] sm:$0xf]  ;;  %v2768_v11 = vld [vmem:[%s2750_s5 + $0xc] sm:$0xf] }
  0x16   : > { %v2021_v12 = vcombine.low %v2762_v9, %v2765_v10  ;;  %v423_v13 = vshrl.u32 %v2762_v9, 16  ;;  %v426_v14 = vshll.u32 %v2762_v9, 16  ;;  %v432_v15 = vshll.u32 %v2765_v10, 16  ;;  %v2776_v16 = vld [vmem:[%s2750_s5 + $0x10] sm:$0xf] }
  0x17   : > { %v436_v17 = vshrl.u32 %v2765_v10, 16  ;;  %v793_v18 = vrot.slane %v2765_v10, 5  ;;  %v2782_v19 = vcombine.low %v2768_v11, %v2776_v16  ;;  %v2785_v20 = vld [vmem:[%s2750_s5 + $0x18] sm:$0xf]  ;;  %v2789_v23 = vld [vmem:[%s2750_s5 + $0x1c] sm:$0xf] }
  0x18   : > { %2259 = vmatprep.mubr.msk.bf16.mxu1 %vm277_vm1, %v2021_v12  ;;  %v425_v21 = vrot.slane %v423_v13, 4  ;;  %v428_v22 = vrot.slane %v426_v14, 5  ;;  %v2054_v25 = vrot.slane %v2762_v9, 9  ;;  %v2799_v26 = vcombine.low %v2785_v20, %v2789_v23  ;;  %v2812_v31 = vld [vmem:[%s2750_s5 + $0x24] sm:$0xf] }
  0x19   : > { %2260 = vmatmul.mubr.msk.bf16.vlgmr.msra.gmra.mrb[0].mxu1 %vm277_vm1, %v2782_v19  ;;  %v2808_v29 = vrot.slane %v432_v15, 5  ;;  %v471_v30 = vshrl.u32 %v2785_v20, 16  ;;  %v2815_v32 = vld [vmem:[%s2750_s5 + $0x28] sm:$0xf]  ;;  %v2817_v34 = vrot.slane %v436_v17, 4  ;;  %v2821_v35 = vrot.slane %v793_v18, 4 }
  0x1a   : > { %2276 = vmatpush3.bf16.msra.mxu1 %v665_v6  ;;  %v429_v33 = vor.u32 %v428_v22, %v425_v21  ;;  %2263 = vmatprep.mubr.msk.bf16.mxu1 %vm277_vm1, %v2799_v26  ;;  %v474_v36 = vshll.u32 %v2785_v20, 16  ;;  %v2827_v37 = vld [vmem:[%s2750_s5 + $0x14] sm:$0x1]  ;;  %v484_v38 = vshrl.u32 %v2789_v23, 16  ;;  %v2056_v39 = vrot.slane %v2785_v20, 9 }
  0x1b   : > { %2567 = vmatprep.subr.msk.bf16.mxu1 %vm302_vm0, %v2062_v8  ;;  %v807_v40 = vrot.slane %v2789_v23, 5  ;;  %v447_v41 = vshrl.u32 %v2768_v11, 16  ;;  %v2836_v42 = vcombine.low %v2812_v31, %v2815_v32  ;;  %v450_v43 = vshll.u32 %v2768_v11, 16  ;;  %v2842_v46 = vld [vmem:[%s2750_s5 + $0x20] sm:$0x1] }
  0x1c   : > { %v456_v44 = vshll.u32 %v2776_v16, 16  ;;  %v460_v45 = vshrl.u32 %v2776_v16, 16  ;;  %v495_v47 = vshrl.u32 %v2812_v31, 16  ;;  %v466_v49 = vshll.u32 %v2827_v37, 16  ;;  %v2852_v63 = vld [vmem:[%s2750_s5 + $0x30] sm:$0xf] }
  0x1d   : > { %v449_v48 = vrot.slane %v447_v41, 4  ;;  %v473_v50 = vrot.slane %v471_v30, 4  ;;  %v452_v51 = vrot.slane %v450_v43, 5  ;;  %v476_v54 = vrot.slane %v474_v36, 5  ;;  %v2855_v0 = vld [vmem:[%s2750_s5 + $0x34] sm:$0xf] }
  0x1e   : > { %v458_v52 = vrot.slane %v456_v44, 5  ;;  %v462_v53 = vrot.slane %v460_v45, 4  ;;  %v498_v55 = vshll.u32 %v2812_v31, 16  ;;  %v480_v56 = vshll.u32 %v2789_v23, 16  ;;  %v2872_v12 = vld [vmem:[%s2750_s5 + $0x3c] sm:$0xf] }
  0x1f   : > { %v486_v57 = vrot.slane %v484_v38, 4  ;;  %v490_v58 = vshll.u32 %v2842_v46, 16  ;;  %v453_v59 = vor.u32 %v452_v51, %v449_v48  ;;  %v468_v61 = vrot.slane %v466_v49, 5  ;;  %v2875_v13 = vld [vmem:[%s2750_s5 + $0x40] sm:$0xf] }
  0x20   : > { %v463_v60 = vor.u32 %v462_v53, %v458_v52  ;;  %v477_v62 = vor.u32 %v476_v54, %v473_v50  ;;  %v2857_v1 = vrot.slane %v429_v33, 4  ;;  %v439_v3 = vor.u32 %v2817_v34, %v2808_v29  ;;  %v2883_v36 = vld [vmem:[%s2750_s5 + $0x2c] sm:$0x1]  ;;  %v2899_v51 = vld [vmem:[%s2750_s5 + $0x38] sm:$0x1] }
  0x21   : > { %2264 = vmatmul.mubr.msk.bf16.gmra.mrb[4].mxu1 %vm277_vm1, %v2836_v42  ;;  %v482_v6 = vrot.slane %v480_v56, 5  ;;  %v2869_v8 = vcombine.low %v2852_v63, %v2855_v0  ;;  %v508_v14 = vshrl.u32 %v2815_v32, 16  ;;  %v454_v15 = vrot.slane %v453_v59, 4 }
  0x22   : > { %v464_v17 = vrot.slane %v463_v60, 4  ;;  %v478_v21 = vrot.slane %v477_v62, 4  ;;  %v492_v30 = vrot.slane %v490_v58, 5  ;;  %v519_v33 = vshrl.u32 %v2852_v63, 16 }
  0x23   : > { %v487_v22 = vor.u32 %v486_v57, %v482_v6  ;;  %2267 = vmatprep.mubr.msk.bf16.mxu1 %vm277_vm1, %v2869_v8  ;;  %v522_v34 = vshll.u32 %v2852_v63, 16  ;;  %v459_v38 = vsel %vm2863_vm4, %v454_v15, %v458_v52  ;;  %v532_v43 = vshrl.u32 %v2855_v0, 16  ;;  %v2904_v57 = vld [vmem:[%s2750_s5 + $0x48] sm:$0xf]  ;;  %v2921_v15 = vld [vmem:[%s2750_s5 + $0x54] sm:$0xf] }
  0x24   : > { %v469_v41 = vsel %vm2863_vm4, %v464_v17, %v468_v61  ;;  %v2892_v44 = vcombine.low %v2872_v12, %v2875_v13  ;;  %v483_v48 = vsel %vm2863_vm4, %v478_v21, %v482_v6  ;;  %v497_v50 = vrot.slane %v495_v47, 4 }
  0x25   : > { %v2894_v45 = vcombine.low %v459_v38, %v469_v41  ;;  %v488_v49 = vrot.slane %v487_v22, 4  ;;  %v500_v52 = vrot.slane %v498_v55, 5  ;;  %v504_v53 = vshll.u32 %v2815_v32, 16  ;;  %v2912_v55 = vld [vmem:[%s2750_s5 + $0x4c] sm:$0xf] }
  0x26   : > { %v510_v54 = vrot.slane %v508_v14, 4  ;;  %v514_v56 = vshll.u32 %v2883_v36, 16  ;;  %v521_v59 = vrot.slane %v519_v33, 4  ;;  %v524_v47 = vrot.slane %v522_v34, 5  ;;  %v2925_v33 = vld [vmem:[%s2750_s5 + $0x58] sm:$0xf] }
  0x27   : > { %2331 = vmatprep.mubr.msk.bf16.mxu0 %vm277_vm1, %v2894_v45  ;;  %v493_v58 = vsel %vm2863_vm4, %v488_v49, %v492_v30  ;;  %v528_v60 = vshll.u32 %v2855_v0, 16  ;;  %v809_v61 = vrot.slane %v807_v40, 4  ;;  %v501_v6 = vor.u32 %v500_v52, %v497_v50 }
  0x28   : > { %v2916_v62 = vcombine.low %v483_v48, %v493_v58  ;;  %v506_v14 = vrot.slane %v504_v53, 5  ;;  %v525_v17 = vor.u32 %v524_v47, %v521_v59  ;;  %v534_v22 = vrot.slane %v532_v43, 4 }
  0x29   : > { %2268 = vmatmul.mubr.msk.bf16.gmra.mrb[8].mxu1 %vm277_vm1, %v2892_v44  ;;  %v530_v21 = vrot.slane %v528_v60, 5  ;;  %v538_v30 = vshll.u32 %v2899_v51, 16  ;;  %v502_v34 = vrot.slane %v501_v6, 4  ;;  %v516_v41 = vrot.slane %v514_v56, 5 }
  0x2a   : > { %2332 = vmatmul.mubr.msk.bf16.vlgmr.msra.gmra.mrb[0].mxu0 %vm277_vm1, %v2916_v62  ;;  %v511_v38 = vor.u32 %v510_v54, %v506_v14  ;;  %v2931_v48 = vcombine.low %v2904_v57, %v2912_v55  ;;  %v440_v49 = vrot.slane %v439_v3, 4  ;;  %v526_v50 = vrot.slane %v525_v17, 4 }
  0x2b   : > { %2348 = vmatpush3.bf16.msra.mxu0 %v2792_v24  ;;  %v535_v52 = vor.u32 %v534_v22, %v530_v21  ;;  %v540_v43 = vrot.slane %v538_v30, 5  ;;  %v803_v53 = vrot.slane %v2827_v37, 5  ;;  %v507_v58 = vsel %vm2863_vm4, %v502_v34, %v506_v14  ;;  %v2961_v14 = vld [vmem:[%s2750_s5 + $0x8] sm:$0x1] }
  0x2c   : > { %v512_v59 = vrot.slane %v511_v38, 4  ;;  %2271 = vmatprep.mubr.msk.bf16.mxu1 %vm277_vm1, %v2931_v48  ;;  %v2941_v54 = vcombine.low %v2921_v15, %v2925_v33  ;;  %2572 = vmatprep.subr.msk.bf16.mxu0 %vm302_vm0, %v2756_v7  ;;  %v810_v24 = vrot.slane %v2842_v46, 5  ;;  %v543_v3 = vshrl.u32 %v2872_v12, 16 }
  0x2d   : > { %v531_v37 = vsel %vm2863_vm4, %v526_v50, %v530_v21  ;;  %v536_v56 = vrot.slane %v535_v52, 4  ;;  %v546_v60 = vshll.u32 %v2872_v12, 16  ;;  %v2055_v7 = vrot.slane %v2768_v11, 9 }
  0x2e   : > { %v517_v6 = vsel %vm2863_vm4, %v512_v59, %v516_v41  ;;  %v800_v46 = vrot.slane %v2776_v16, 5  ;;  %v556_v17 = vshrl.u32 %v2875_v13, 16  ;;  %v567_v30 = vshrl.u32 %v2904_v57, 16  ;;  %v216_v59 = vld [vmem:[%s2750_s5 + $0x44] sm:$0x1] }
  0x2f   : > { %v2964_v21 = vcombine.low %v507_v58, %v517_v6  ;;  %v541_v22 = vsel %vm2863_vm4, %v536_v56, %v540_v43  ;;  %v808_v38 = vsel %vm2951_vm7, %v2056_v39, %v807_v40  ;;  %v811_v41 = vsel %vm2951_vm7, %v809_v61, %v810_v24  ;;  %v3016_v6 = vld [vmem:[%s2750_s5 + $0x50] sm:$0x1] }
  0x30   : > { %v2969_v34 = vcombine.low %v531_v37, %v541_v22  ;;  %v801_v11 = vsel %vm2951_vm7, %v2055_v7, %v800_v46  ;;  %v802_v16 = vrot.slane %v800_v46, 4  ;;  %v442_v50 = vshll.u32 %v2961_v14, 16 }
  0x31   : > { %2272 = vmatmul.mubr.msk.bf16.gmra.mrb[12].mxu1 %vm277_vm1, %v2941_v54  ;;  %2335 = vmatprep.mubr.msk.bf16.mxu0 %vm277_vm1, %v2964_v21  ;;  %v2057_v52 = vrot.slane %v2812_v31, 9  ;;  %v814_v43 = vrot.slane %v2815_v32, 5  ;;  %v570_v20 = vshll.u32 %v2904_v57, 16  ;;  %v817_v39 = vrot.slane %v2883_v36, 5 }
  0x32   : > { %2336 = vmatmul.mubr.msk.bf16.gmra.mrb[4].mxu0 %vm277_vm1, %v2969_v34  ;;  %v804_v23 = vsel %vm2951_vm7, %v802_v16, %v803_v53  ;;  %v821_v40 = vrot.slane %v2855_v0, 5  ;;  %v435_v31 = vsel %vm2863_vm4, %v2857_v1, %v2808_v29  ;;  %v444_v32 = vrot.slane %v442_v50, 5 }
  0x33   : > { %v2995_v61 = vcombine.low %v801_v11, %v804_v23  ;;  %v816_v58 = vrot.slane %v814_v43, 4  ;;  %v580_v24 = vshrl.u32 %v2912_v55, 16  ;;  %v3003_v37 = vcombine.low %v808_v38, %v811_v41 }
  0x34   : > { %v815_v36 = vsel %vm2951_vm7, %v2057_v52, %v814_v43  ;;  %v2058_v53 = vrot.slane %v2852_v63, 9  ;;  %v445_v0 = vsel %vm2863_vm4, %v440_v49, %v444_v32  ;;  %v823_v1 = vrot.slane %v821_v40, 4 }
  0x35   : > { %2349 = vmatprep.mubr.msk.bf16.mxu0 %vm277_vm1, %v2995_v61  ;;  %v818_v29 = vsel %vm2951_vm7, %v816_v58, %v817_v39  ;;  %v828_v56 = vrot.slane %v2875_v13, 5  ;;  %v2038_v7 = vcombine.low %v435_v31, %v445_v0  ;;  %v824_v46 = vrot.slane %v2899_v51, 5  ;;  %v3035_v31 = vld [vmem:[%s3371_s1 + $0x1c] sm:$0xf] }
  0x36   : > { %v2059_v22 = vrot.slane %v2872_v12, 9  ;;  %v831_v63 = vrot.slane %v216_v59, 5  ;;  %v3020_v11 = vcombine.low %v815_v36, %v818_v29  ;;  %v2060_v38 = vrot.slane %v2904_v57, 9 }
  0x37   : > { %v830_v16 = vrot.slane %v828_v56, 4  ;;  %v835_v49 = vrot.slane %v2912_v55, 5  ;;  %2277 = vmatprep.mubr.msk.bf16.mxu1 %vm277_vm1, %v2038_v7  ;;  %v838_v41 = vrot.slane %v3016_v6, 5  ;;  %v545_v50 = vrot.slane %v543_v3, 4 }
  0x38   : > { %v548_v52 = vrot.slane %v546_v60, 5  ;;  %v552_v43 = vshll.u32 %v2875_v13, 16  ;;  %v591_v51 = vshrl.u32 %v2921_v15, 16  ;;  %v822_v12 = vsel %vm2951_vm7, %v2058_v53, %v821_v40  ;;  %v3044_v40 = vld [vmem:[%s2750_s5 + $0x5c] sm:$0x1] }
  0x39   : > { %2278 = vmatmul.mubr.msk.bf16.vlgmr.msra.gmra.mrb[0].mxu1 %vm277_vm1, %v2894_v45  ;;  %v837_v23 = vrot.slane %v835_v49, 4  ;;  %v558_v39 = vrot.slane %v556_v17, 4  ;;  %v825_v13 = vsel %vm2951_vm7, %v823_v1, %v824_v46  ;;  %v562_v60 = vshll.u32 %v216_v59, 16  ;;  %v3049_v17 = vld [vmem:[%s3371_s1 + $0xc] sm:$0xf] }
  0x3a   : > { %2350 = vmatmul.mubr.msk.bf16.vlgmr.msra.gmra.mrb[0].mxu0 %vm277_vm1, %v3003_v37  ;;  %2281 = vmatprep.mubr.msk.bf16.mxu1 %vm277_vm1, %v2916_v62  ;;  %v549_v45 = vor.u32 %v548_v52, %v545_v50  ;;  %v554_v3 = vrot.slane %v552_v43, 5  ;;  %v829_v32 = vsel %vm2951_vm7, %v2059_v22, %v828_v56  ;;  %v832_v58 = vsel %vm2951_vm7, %v830_v16, %v831_v63  ;;  %v3067_v1 = vld [vmem:[%s2750_s5 + $0x60] sm:$0xf]  ;;  %v3091_v43 = vld [vmem:[%s2750_s5 + $0x68] sm:$0x1] }
  0x3b   : > { %2366 = vmatpush3.bf16.msra.mxu0 %v2803_v27  ;;  %2353 = vmatprep.mubr.msk.bf16.mxu0 %vm277_vm1, %v3020_v11  ;;  %v2061_v59 = vrot.slane %v2921_v15, 9  ;;  %v842_v36 = vrot.slane %v2925_v33, 5  ;;  %v594_v53 = vshll.u32 %v2921_v15, 16  ;;  %v836_v27 = vsel %vm2951_vm7, %v2060_v38, %v835_v49 }
  0x3c   : > { %2294 = vmatpush3.bf16.msra.mxu1 %v2806_v28  ;;  %v839_v0 = vsel %vm2951_vm7, %v837_v23, %v838_v41  ;;  %v559_v29 = vor.u32 %v558_v39, %v554_v3  ;;  %2573 = vmatprep.subr.msk.bf16.mxu0 %vm302_vm0, %v3035_v31  ;;  %v604_v56 = vshrl.u32 %v2925_v33, 16  ;;  %v550_v7 = vrot.slane %v549_v45, 4  ;;  %v3074_v28 = vld [vmem:[%s2750_s5 + $0x64] sm:$0xf] }
  0x3d   : > { %v844_v46 = vrot.slane %v842_v36, 4  ;;  %v845_v15 = vrot.slane %v3044_v40, 5  ;;  %2568 = vmatprep.subr.msk.bf16.mxu1 %vm302_vm0, %v3049_v17  ;;  %v3078_v22 = vcombine.low %v822_v12, %v825_v13  ;;  %v564_v16 = vrot.slane %v562_v60, 5 }
  0x3e   : > { %v560_v63 = vrot.slane %v559_v29, 4  ;;  %v569_v38 = vrot.slane %v567_v30, 4  ;;  %v3082_v49 = vcombine.low %v829_v32, %v832_v58  ;;  %v3084_v41 = vcombine.low %v836_v27, %v839_v0 }
  0x3f   : > { %v843_v50 = vsel %vm2951_vm7, %v2061_v59, %v842_v36  ;;  %v572_v52 = vrot.slane %v570_v20, 5  ;;  %v2099_v12 = vrot.slane %v3067_v1, 9  ;;  %v1290_v23 = vrot.slane %v3074_v28, 5 }
  0x40   : > { %v576_v39 = vshll.u32 %v2912_v55, 16  ;;  %v582_v30 = vrot.slane %v580_v24, 4  ;;  %v555_v13 = vsel %vm2863_vm4, %v550_v7, %v554_v3  ;;  %v846_v57 = vsel %vm2951_vm7, %v844_v46, %v845_v15 }
  0x41   : > { %2282 = vmatmul.mubr.msk.bf16.gmra.mrb[4].mxu1 %vm277_vm1, %v2964_v21  ;;  %v573_v20 = vor.u32 %v572_v52, %v569_v38  ;;  %v586_v45 = vshll.u32 %v3016_v6, 16  ;;  %v565_v55 = vsel %vm2863_vm4, %v560_v63, %v564_v16  ;;  %v593_v60 = vrot.slane %v591_v51, 4 }
  0x42   : > { %2354 = vmatmul.mubr.msk.bf16.gmra.mrb[4].mxu0 %vm277_vm1, %v3078_v22  ;;  %2285 = vmatprep.mubr.msk.bf16.mxu1 %vm277_vm1, %v2969_v34  ;;  %v578_v24 = vrot.slane %v576_v39, 5  ;;  %v596_v32 = vrot.slane %v594_v53, 5  ;;  %v1293_v3 = vrot.slane %v3091_v43, 5  ;;  %v600_v6 = vshll.u32 %v2925_v33, 16 }
  0x43   : > { %2357 = vmatprep.mubr.msk.bf16.mxu0 %vm277_vm1, %v3082_v49  ;;  %v574_v58 = vrot.slane %v573_v20, 4  ;;  %v606_v59 = vrot.slane %v604_v56, 4  ;;  %v588_v27 = vrot.slane %v586_v45, 5  ;;  %v610_v29 = vshll.u32 %v3044_v40, 16  ;;  %v3124_v56 = vld [vmem:[%s2750_s5 + $0x6c] sm:$0xf] }
  0x44   : > { %v583_v36 = vor.u32 %v582_v30, %v578_v24  ;;  %v597_v0 = vor.u32 %v596_v32, %v593_v60  ;;  %v3116_v7 = vcombine.low %v555_v13, %v565_v55  ;;  %v3118_v51 = vcombine.low %v843_v50, %v846_v57  ;;  %v3133_v13 = vld [vmem:[%s2750_s5 + $0x70] sm:$0xf]  ;;  %v228_v32 = vld [vmem:[%s2750_s5 + $0x74] sm:$0x1] }
  0x45   : > { %v1292_v53 = vrot.slane %v1290_v23, 4  ;;  %v602_v46 = vrot.slane %v600_v6, 5  ;;  %v579_v15 = vsel %vm2863_vm4, %v574_v58, %v578_v24  ;;  %v796_v33 = vrot.slane %v2961_v14, 5 }
  0x46   : > { %v584_v63 = vrot.slane %v583_v36, 4  ;;  %v598_v16 = vrot.slane %v597_v0, 4  ;;  %v612_v52 = vrot.slane %v610_v29, 5  ;;  %v1546_v40 = vshrl.u32 %v3124_v56, 16 }
  0x47   : > { %v607_v38 = vor.u32 %v606_v59, %v602_v46  ;;  %v1549_v39 = vshll.u32 %v3124_v56, 16  ;;  %v1291_v50 = vsel %vm2951_vm7, %v2099_v12, %v1290_v23  ;;  %v1294_v14 = vsel %vm2951_vm7, %v1292_v53, %v1293_v3 }
  0x48   : > { %v589_v30 = vsel %vm2863_vm4, %v584_v63, %v588_v27  ;;  %v1559_v45 = vshrl.u32 %v3133_v13, 16  ;;  %v603_v12 = vsel %vm2863_vm4, %v598_v16, %v602_v46  ;;  %v1548_v23 = vrot.slane %v1546_v40, 4 }
  0x49   : > { %2286 = vmatmul.mubr.msk.bf16.gmra.mrb[8].mxu1 %vm277_vm1, %v3116_v7  ;;  %v3139_v57 = vcombine.low %v579_v15, %v589_v30  ;;  %v608_v20 = vrot.slane %v607_v38, 4  ;;  %v794_v24 = vsel %vm2951_vm7, %v2054_v25, %v793_v18  ;;  %v797_v60 = vsel %vm2951_vm7, %v2821_v35, %v796_v33  ;;  %v2131_v30 = vld [vmem:[%s3371_s1 + $0x20] sm:$0xf] }
  0x4a   : > { %2358 = vmatmul.mubr.msk.bf16.gmra.mrb[8].mxu0 %vm277_vm1, %v3084_v41  ;;  %v1551_v3 = vrot.slane %v1549_v39, 5  ;;  %v3162_v58 = vcombine.low %v1291_v50, %v1294_v14  ;;  %v1555_v36 = vshll.u32 %v3133_v13, 16  ;;  %v1561_v27 = vrot.slane %v1559_v45, 4 }
  0x4b   : > { %2361 = vmatprep.mubr.msk.bf16.mxu0 %vm277_vm1, %v3118_v51  ;;  %2289 = vmatprep.mubr.msk.bf16.mxu1 %vm277_vm1, %v3139_v57  ;;  %v613_v55 = vsel %vm2863_vm4, %v608_v20, %v612_v52  ;;  %v2063_v10 = vcombine.low %v794_v24, %v797_v60  ;;  %v1565_v0 = vshll.u32 %v228_v32, 16  ;;  %v2130_v9 = vrot.slane %v3124_v56, 9 }
  0x4c   : > { %v3164_v6 = vcombine.low %v603_v12, %v613_v55  ;;  %v1552_v59 = vor.u32 %v1551_v3, %v1548_v23  ;;  %v1696_v18 = vrot.slane %v3133_v13, 5  ;;  %v1557_v29 = vrot.slane %v1555_v36, 5 }
  0x4d   : > { %v1699_v53 = vrot.slane %v228_v32, 5  ;;  %v1567_v16 = vrot.slane %v1565_v0, 5  ;;  %v1578_v50 = vsel %vm302_vm0, %v3035_v31, 0  ;;  %v1024_v47 = vsel %vm302_vm0, %v3049_v17, 0 }
  0x4e   : > { %v1553_v25 = vrot.slane %v1552_v59, 4  ;;  %v3171_v35 = vsel %vm2951_vm7, %v2130_v9, %v1696_v18  ;;  %v1698_v46 = vrot.slane %v1696_v18, 4  ;;  %v1562_v63 = vor.u32 %v1561_v27, %v1557_v29 }
  0x4f   : > { %v1140_v31 = vshrl.u32 %v3067_v1, 16  ;;  %v1143_v17 = vshll.u32 %v3067_v1, 16  ;;  %v1149_v14 = vshll.u32 %v3074_v28, 16  ;;  %v1153_v20 = vshrl.u32 %v3074_v28, 16 }
  0x50   : > { %v1558_v15 = vsel %vm2863_vm4, %v1553_v25, %v1557_v29  ;;  %v3182_v33 = vsel %vm2951_vm7, %v1698_v46, %v1699_v53  ;;  %v1563_v38 = vrot.slane %v1562_v63, 4 }
  0x51   : > { %2290 = vmatmul.mubr.msk.bf16.gmra.mrb[12].mxu1 %vm277_vm1, %v3164_v6  ;;  %v2132_v52 = vcombine.low %v3171_v35, %v3182_v33  ;;  %v1145_v45 = vrot.slane %v1143_v17, 5  ;;  %v1151_v12 = vrot.slane %v1149_v14, 5  ;;  %v1155_v23 = vrot.slane %v1153_v20, 4 }
  0x52   : > { %2362 = vmatmul.mubr.msk.bf16.gmra.mrb[12].mxu0 %vm277_vm1, %v3162_v58  ;;  %2295 = vmatprep.mubr.msk.bf16.mxu1 %vm277_vm1, %v2063_v10  ;;  %v1568_v40 = vsel %vm2863_vm4, %v1563_v38, %v1567_v16 }
  0x53   : > { %2367 = vmatprep.mubr.msk.bf16.mxu0 %vm277_vm1, %v2799_v26  ;;  %v2121_v39 = vcombine.low %v1558_v15, %v1568_v40 }
  0x59   : > { %2296 = vmatmul.mubr.msk.bf16.vlgmr.msra.gmra.mrb[0].mxu1 %vm277_vm1, %v2995_v61  ;;  %v2080_v61 = vcombine.low %v3067_v1, %v3074_v28  ;;  %v1159_v1 = vshll.u32 %v3091_v43, 16 }
  0x5a   : > { %2368 = vmatmul.mubr.msk.bf16.vlgmr.msra.gmra.mrb[0].mxu0 %vm277_vm1, %v2836_v42  ;;  %2299 = vmatprep.mubr.msk.bf16.mxu1 %vm277_vm1, %v3003_v37 }
  0x5b   : > { %2384 = vmatpush3.bf16.msra.mxu0 %v1578_v50  ;;  %2371 = vmatprep.mubr.msk.bf16.mxu0 %vm277_vm1, %v2869_v8  ;;  %v1161_v24 = vrot.slane %v1159_v1, 5 }
  0x5c   : > { %2312 = vmatpush3.bf16.msra.mxu1 %v1024_v47  ;;  %2574 = vmatprep.subr.msk.bf16.mxu0 %vm302_vm0, %v2131_v30 }
  0x5d   : > { %2570 = vmatprep.subr.msk.bf16.mxu1 %vm302_vm0, %v2726_v2  ;;  %v2111_v2 = vcombine.low %v3124_v56, %v3133_v13  ;;  %v1710_v56 = vsel %vm302_vm0, %v2131_v30, 0  ;;  %v1142_v13 = vrot.slane %v1140_v31, 4 }
  0x61   : > { %2300 = vmatmul.mubr.msk.bf16.gmra.mrb[4].mxu1 %vm277_vm1, %v3020_v11 }
  0x62   : > { %2372 = vmatmul.mubr.msk.bf16.gmra.mrb[4].mxu0 %vm277_vm1, %v2892_v44  ;;  %2303 = vmatprep.mubr.msk.bf16.mxu1 %vm277_vm1, %v3078_v22 }
  0x63   : > { %2375 = vmatprep.mubr.msk.bf16.mxu0 %vm277_vm1, %v2931_v48 }
  0x69   : > { %2304 = vmatmul.mubr.msk.bf16.gmra.mrb[8].mxu1 %vm277_vm1, %v3082_v49 }
  0x6a   : > { %2376 = vmatmul.mubr.msk.bf16.gmra.mrb[8].mxu0 %vm277_vm1, %v2941_v54  ;;  %2307 = vmatprep.mubr.msk.bf16.mxu1 %vm277_vm1, %v3084_v41 }
  0x6b   : > { %2379 = vmatprep.mubr.msk.bf16.mxu0 %vm277_vm1, %v2080_v61 }
  0x71   : > { %2308 = vmatmul.mubr.msk.bf16.gmra.mrb[12].mxu1 %vm277_vm1, %v3118_v51 }
  0x72   : > { %2380 = vmatmul.mubr.msk.bf16.gmra.mrb[12].mxu0 %vm277_vm1, %v2111_v2  ;;  %2313 = vmatprep.mubr.msk.bf16.mxu1 %vm277_vm1, %v2782_v19  ;;  %v1146_v19 = vor.u32 %v1145_v45, %v1142_v13 }
  0x73   : > { %2385 = vmatprep.mubr.msk.bf16.mxu0 %vm277_vm1, %v2916_v62  ;;  %v1156_v62 = vor.u32 %v1155_v23, %v1151_v12 }
  0x74   : > { %v1147_v28 = vrot.slane %v1146_v19, 4 }
  0x75   : > { %v1157_v55 = vrot.slane %v1156_v62, 4 }
  0x79   : > { %2314 = vmatmul.mubr.msk.bf16.vlgmr.msra.gmra.mrb[0].mxu1 %vm277_vm1, %v2799_v26  ;;  %v1162_v26 = vsel %vm2863_vm4, %v1157_v55, %v1161_v24 }
  0x7a   : > { %2386 = vmatmul.mubr.msk.bf16.vlgmr.msra.gmra.mrb[0].mxu0 %vm277_vm1, %v2964_v21  ;;  %2317 = vmatprep.mubr.msk.bf16.mxu1 %vm277_vm1, %v2836_v42 }
  0x7b   : > { %2402 = vmatpush3.bf16.msra.mxu0 %v1710_v56  ;;  %2389 = vmatprep.mubr.msk.bf16.mxu0 %vm277_vm1, %v2969_v34 }
  0x7c   : > { %2420 = vmatpush3.bf16.msra.mxu1 %v2737_v4  ;;  %v1152_v4 = vsel %vm2863_vm4, %v1147_v28, %v1151_v12 }
  0x7d   : > { %v2090_v42 = vcombine.low %v1152_v4, %v1162_v26 }
  0x81   : > { %2318 = vmatmul.mubr.msk.bf16.gmra.mrb[4].mxu1 %vm277_vm1, %v2869_v8 }
  0x82   : > { %2390 = vmatmul.mubr.msk.bf16.gmra.mrb[4].mxu0 %vm277_vm1, %v3116_v7  ;;  %2321 = vmatprep.mubr.msk.bf16.mxu1 %vm277_vm1, %v2892_v44 }
  0x83   : > { %2393 = vmatprep.mubr.msk.bf16.mxu0 %vm277_vm1, %v3139_v57 }
  0x89   : > { %2322 = vmatmul.mubr.msk.bf16.gmra.mrb[8].mxu1 %vm277_vm1, %v2931_v48 }
  0x8a   : > { %2394 = vmatmul.mubr.msk.bf16.gmra.mrb[8].mxu0 %vm277_vm1, %v3164_v6  ;;  %2325 = vmatprep.mubr.msk.bf16.mxu1 %vm277_vm1, %v2941_v54 }
  0x8b   : > { %2397 = vmatprep.mubr.msk.bf16.mxu0 %vm277_vm1, %v2090_v42 }
  0x91   : > { %2326 = vmatmul.mubr.msk.bf16.gmra.mrb[12].mxu1 %vm277_vm1, %v2080_v61 }
  0x92   : > { %2398 = vmatmul.mubr.msk.bf16.gmra.mrb[12].mxu0 %vm277_vm1, %v2121_v39  ;;  %2339 = vmatprep.mubr.msk.bf16.mxu1 %vm277_vm1, %v3116_v7 }
  0x93   : > { %2403 = vmatprep.mubr.msk.bf16.mxu0 %vm277_vm1, %v3003_v37 }
  0x99   : > { %2340 = vmatmul.mubr.msk.bf16.vlgmr.msra.gmra.mrb[8].mxu1 %vm277_vm1, %v3139_v57 }
  0x9a   : > { %2404 = vmatmul.mubr.msk.bf16.vlgmr.msra.gmra.mrb[0].mxu0 %vm277_vm1, %v3020_v11  ;;  %2343 = vmatprep.mubr.msk.bf16.mxu1 %vm277_vm1, %v3164_v6  ;;  %v3300_v11 = vld [vmem:[%s3372_s2] ss:$0 sm:$0xff] }
  0x9b   : > { %2407 = vmatprep.mubr.msk.bf16.mxu0 %vm277_vm1, %v3078_v22 }
  0xa1   : > { %2344 = vmatmul.mubr.msk.bf16.gmra.mrb[12].mxu1 %vm277_vm1, %v2090_v42 }
  0xa2   : > { %2408 = vmatmul.mubr.msk.bf16.gmra.mrb[4].mxu0 %vm277_vm1, %v3082_v49 }
  0xa3   : > { %2411 = vmatprep.mubr.msk.bf16.mxu0 %vm277_vm1, %v3084_v41 }
  0xaa   : > { %2412 = vmatmul.mubr.msk.bf16.gmra.mrb[8].mxu0 %vm277_vm1, %v3118_v51 }
  0xab   : > { %2415 = vmatprep.mubr.msk.bf16.mxu0 %vm277_vm1, %v3162_v58 }
  0xb2   : > { %2416 = vmatmul.mubr.msk.bf16.gmra.mrb[12].mxu0 %vm277_vm1, %v2132_v52 }
 0x14c   : > { %v2315_v5 = vpop.f32.mrb[0].mxu1 }
 0x14d   : > { %v1060_v8 = vpop.f32.mrb[1].mxu1  ;;  %v2421_v22 = vadd.f32 %v2315_v5, %v3300_v11 }
 0x14e   : > { %v2316_v44 = vpop.f32.mrb[2].mxu1  ;;  %v2423_v41 = vadd.f32 %v3300_v11, %v1060_v8 }
 0x14f   : > { %v1063_v48 = vpop.f32.mrb[3].mxu1  ;;  %v2425_v51 = vadd.f32 %v2316_v44, %v3300_v11 }
 0x150   : > { %v2427_v3 = vadd.f32 %v3300_v11, %v1063_v48 }
 0x154   : > { %v2319_v54 = vpop.f32.mrb[4].mxu1 }
 0x155   : > { %v1076_v21 = vpop.f32.mrb[5].mxu1  ;;  %v2429_v35 = vadd.f32 %v2319_v54, %v3300_v11 }
 0x156   : > { %v2320_v34 = vpop.f32.mrb[6].mxu1  ;;  %v2431_v63 = vadd.f32 %v3300_v11, %v1076_v21 }
 0x157   : > { %v1079_v37 = vpop.f32.mrb[7].mxu1  ;;  %v2433_v52 = vadd.f32 %v2320_v34, %v3300_v11 }
 0x158   : > { %v2435_v47 = vadd.f32 %v3300_v11, %v1079_v37 }
 0x16c   : > { %v2341_v49 = vpop.f32.mrb[8].mxu1 }
 0x16d   : > { %v2405_v43 = vpop.f32.mrb[0].mxu0  ;;  %v1240_v7 = vpop.f32.mrb[9].mxu1  ;;  %v2437_v19 = vadd.f32 %v2341_v49, %v3300_v11 }
 0x16e   : > { %v2422_v57 = vadd.f32 %v2421_v22, %v2405_v43  ;;  %v1746_v60 = vpop.f32.mrb[1].mxu0  ;;  %v2342_v32 = vpop.f32.mrb[10].mxu1  ;;  %v2439_v1 = vadd.f32 %v3300_v11, %v1240_v7 }
 0x16f   : > { %v2424_v58 = vadd.f32 %v2423_v41, %v1746_v60  ;;  %v2406_v6 = vpop.f32.mrb[2].mxu0  ;;  %v1243_v59 = vpop.f32.mrb[11].mxu1  ;;  %v2441_v24 = vadd.f32 %v2342_v32, %v3300_v11 }
 0x170   : > { %v1827_v36 = vmax.f32 %v2422_v57, 0.0  ;;  %v2426_v27 = vadd.f32 %v2425_v51, %v2406_v6  ;;  %v1749_v10 = vpop.f32.mrb[3].mxu0  ;;  %v2443_v42 = vadd.f32 %v3300_v11, %v1243_v59 }
 0x171   : > { %v1825_v0 = vmax.f32 %v2424_v58, 0.0  ;;  %v2428_v9 = vadd.f32 %v2427_v3, %v1749_v10 }
 0x172   : > { %v2162_v18 = vpack.c.bf16 %v1827_v36, %v1827_v36  ;;  %v1828_v25 = vmax.f32 %v2426_v27, 0.0 }
 0x173   : > { %v2160_v29 = vpack.c.bf16 %v1825_v0, %v1825_v0  ;;  %v1826_v53 = vmax.f32 %v2428_v9, 0.0 }
 0x174   : > { %1908 = vst.msk [vmem:[%s3309_s29 + $0x8] sm:$0xf] %vm1905_vm8, %v2162_v18  ;;  %v2163_v46 = vpack.c.bf16 %v1828_v25, %v1828_v25  ;;  %v2345_v15 = vpop.f32.mrb[12].mxu1 }
 0x175   : > { %1906 = vst.msk [vmem:[%s3309_s29] sm:$0xf] %vm1905_vm8, %v2160_v29  ;;  %v2161_v16 = vpack.c.bf16 %v1826_v53, %v1826_v53  ;;  %v2409_v33 = vpop.f32.mrb[4].mxu0  ;;  %v1256_v38 = vpop.f32.mrb[13].mxu1  ;;  %v2445_v43 = vadd.f32 %v2345_v15, %v3300_v11 }
 0x176   : > { %1909 = vst.msk [vmem:[%s3309_s29 + $0xc] sm:$0xf] %vm1905_vm8, %v2163_v46  ;;  %v2430_v40 = vadd.f32 %v2429_v35, %v2409_v33  ;;  %v1762_v39 = vpop.f32.mrb[5].mxu0  ;;  %v2346_v50 = vpop.f32.mrb[14].mxu1  ;;  %v2447_v51 = vadd.f32 %v3300_v11, %v1256_v38 }
 0x177   : > { %1907 = vst.msk [vmem:[%s3309_s29 + $0x4] sm:$0xf] %vm1905_vm8, %v2161_v16  ;;  %v2432_v30 = vadd.f32 %v2431_v63, %v1762_v39  ;;  %v2410_v61 = vpop.f32.mrb[6].mxu0  ;;  %v1259_v2 = vpop.f32.mrb[15].mxu1  ;;  %v2449_v32 = vadd.f32 %v2346_v50, %v3300_v11 }
 0x178   : > { %v1831_v31 = vmax.f32 %v2430_v40, 0.0  ;;  %v2434_v17 = vadd.f32 %v2433_v52, %v2410_v61  ;;  %v1765_v14 = vpop.f32.mrb[7].mxu0  ;;  %v2451_v6 = vadd.f32 %v3300_v11, %v1259_v2 }
 0x179   : > { %v1829_v20 = vmax.f32 %v2432_v30, 0.0  ;;  %v2436_v56 = vadd.f32 %v2435_v47, %v1765_v14 }
 0x17a   : > { %v2166_v13 = vpack.c.bf16 %v1831_v31, %v1831_v31  ;;  %v1832_v45 = vmax.f32 %v2434_v17, 0.0 }
 0x17b   : > { %v2164_v12 = vpack.c.bf16 %v1829_v20, %v1829_v20  ;;  %v1830_v23 = vmax.f32 %v2436_v56, 0.0 }
 0x17c   : > { %1912 = vst.msk [vmem:[%s3309_s29 + $0x18] sm:$0xf] %vm1905_vm8, %v2166_v13  ;;  %v2167_v62 = vpack.c.bf16 %v1832_v45, %v1832_v45 }
 0x17d   : > { %1910 = vst.msk [vmem:[%s3309_s29 + $0x10] sm:$0xf] %vm1905_vm8, %v2164_v12  ;;  %v2165_v28 = vpack.c.bf16 %v1830_v23, %v1830_v23  ;;  %v2413_v55 = vpop.f32.mrb[8].mxu0 }
 0x17e   : > { %1913 = vst.msk [vmem:[%s3309_s29 + $0x1c] sm:$0xf] %vm1905_vm8, %v2167_v62  ;;  %v2438_v4 = vadd.f32 %v2437_v19, %v2413_v55  ;;  %v1778_v26 = vpop.f32.mrb[9].mxu0 }
 0x17f   : > { %1911 = vst.msk [vmem:[%s3309_s29 + $0x14] sm:$0xf] %vm1905_vm8, %v2165_v28  ;;  %v2440_v5 = vadd.f32 %v2439_v1, %v1778_v26  ;;  %v2414_v8 = vpop.f32.mrb[10].mxu0 }
 0x180   : > { %v1835_v44 = vmax.f32 %v2438_v4, 0.0  ;;  %v2442_v48 = vadd.f32 %v2441_v24, %v2414_v8  ;;  %v1781_v54 = vpop.f32.mrb[11].mxu0 }
 0x181   : > { %v1833_v21 = vmax.f32 %v2440_v5, 0.0  ;;  %v2444_v34 = vadd.f32 %v2443_v42, %v1781_v54 }
 0x182   : > { %v2170_v37 = vpack.c.bf16 %v1835_v44, %v1835_v44  ;;  %v1836_v22 = vmax.f32 %v2442_v48, 0.0 }
 0x183   : > { %v2168_v49 = vpack.c.bf16 %v1833_v21, %v1833_v21  ;;  %v1834_v41 = vmax.f32 %v2444_v34, 0.0 }
 0x184   : > { %1916 = vst.msk [vmem:[%s3309_s29 + $0x28] sm:$0xf] %vm1905_vm8, %v2170_v37  ;;  %v2171_v7 = vpack.c.bf16 %v1836_v22, %v1836_v22 }
 0x185   : > { %1914 = vst.msk [vmem:[%s3309_s29 + $0x20] sm:$0xf] %vm1905_vm8, %v2168_v49  ;;  %v2169_v57 = vpack.c.bf16 %v1834_v41, %v1834_v41  ;;  %v2417_v60 = vpop.f32.mrb[12].mxu0 }
 0x186   : > { %1917 = vst.msk [vmem:[%s3309_s29 + $0x2c] sm:$0xf] %vm1905_vm8, %v2171_v7  ;;  %v2446_v3 = vadd.f32 %v2445_v43, %v2417_v60  ;;  %v1794_v58 = vpop.f32.mrb[13].mxu0 }
 0x187   : > { %1915 = vst.msk [vmem:[%s3309_s29 + $0x24] sm:$0xf] %vm1905_vm8, %v2169_v57  ;;  %v2448_v59 = vadd.f32 %v2447_v51, %v1794_v58  ;;  %v2418_v36 = vpop.f32.mrb[14].mxu0 }
 0x188   : > { %v1839_v27 = vmax.f32 %v2446_v3, 0.0  ;;  %v2450_v10 = vadd.f32 %v2449_v32, %v2418_v36  ;;  %v1797_v0 = vpop.f32.mrb[15].mxu0 }
 0x189   : > { %v1837_v9 = vmax.f32 %v2448_v59, 0.0  ;;  %v2452_v18 = vadd.f32 %v2451_v6, %v1797_v0 }
 0x18a   : > { %v2174_v25 = vpack.c.bf16 %v1839_v27, %v1839_v27  ;;  %v1840_v29 = vmax.f32 %v2450_v10, 0.0 }
 0x18b   : > { %v2172_v53 = vpack.c.bf16 %v1837_v9, %v1837_v9  ;;  %v1838_v35 = vmax.f32 %v2452_v18, 0.0 }
 0x18c   : > { %1920 = vst.msk [vmem:[%s3309_s29 + $0x38] sm:$0xf] %vm1905_vm8, %v2174_v25  ;;  %v2175_v46 = vpack.c.bf16 %v1840_v29, %v1840_v29 }
 0x18d   : > { %1918 = vst.msk [vmem:[%s3309_s29 + $0x30] sm:$0xf] %vm1905_vm8, %v2172_v53  ;;  %v2173_v11 = vpack.c.bf16 %v1838_v35, %v1838_v35 }
 0x18e   : > { %1921 = vst.msk [vmem:[%s3309_s29 + $0x3c] sm:$0xf] %vm1905_vm8, %v2175_v46 }
 0x18f   : > { %1919 = vst.msk [vmem:[%s3309_s29 + $0x34] sm:$0xf] %vm1905_vm8, %v2173_v11 }
 0x190 PF: > { %s13_s16 = sadd.s32 1, %s2664_s16   ;;  %s3378_s12 = smov %s2656_s14 }
 0x191   : > { %p10_p7 = scmp.ge.s32.totalorder %s13_s16, 6   ;;  %s3379_s13 = smov %s2660_s15 }
 0x192   : > { %s3380_s14 = smov %s3383_s17  ;;  %s3381_s15 = smov %s3387_s18 }
 0x193   :  { %12 = sbr.rel (!%p10_p7) target bundleno = 3 (0x3), region = 71 }

// kernel: _lambda_.6
= control target key start
LH: loop header
LB: loop body
LE: loop exit
PB: predicated region body
PF: predicated region fallthrough
CT: control target
= control target key end

     0   :  { %s3706_s18 = smov 0   ;;  %s4704_s0 = inlined_call_operand.vmem [shape: bf16[2,4,9,9,8], index: 0, kind: input, shape index: {}]   ;;  %s4705_s1 = inlined_call_operand.vmem [shape: bf16[2,4,9,9,8], index: 1, kind: input, shape index: {}]   ;;  %s4706_s2 = inlined_call_operand.vmem [shape: bf16[3,3,8,8], index: 2, kind: input, shape index: {}]   ;;  %s4707_s3 = inlined_call_operand.vmem [shape: bf16[3,3,8,8], index: 3, kind: input, shape index: {}]   ;;  %s4708_s4 = inlined_call_operand.vmem [shape: f32[1,16], index: 4, kind: input, shape index: {}]   ;;  %s4709_s5 = inlined_call_operand.vmem [shape: f32[2,64,16], index: 5, kind: output, shape index: {}]  }
   0x1 LB: > { %s3076_s19 = sadd.s32 4294967295, %s3673_s18   ;;  %p3080_p0 = scmp.ge.s32.totalorder %s3673_s18, 1  ;;  %s3673_s18 = sphi %s3706_s18, %s15_s18  }
   0x2   : > { %p197_p1 = scmp.lt.s32.totalorder %s3673_s18, 3 }
   0x4   : > { %p198_p2 = pnand %p3080_p0, %p197_p1 }
   0x6   : > { %201 = sbr.rel (%p198_p2) target bundleno = 512 (0x200), region = 40 }
   0xd   : > { %vm389_vm0 = vcmask 1043456   ;;  %v466_v0 = vld [vmem:[%s4707_s3] sm:$0xf]  ;;  %p230_p3 = scmp.lt.s32.totalorder %s3076_s19, 1  ;;  %v3111_v4 = vld [vmem:[%s4707_s3 + $0x4] sm:$0xf] }
   0xe   : > { %v355_v1 = vld [vmem:[%s4706_s2] sm:$0xf]  ;;  %3592 = vmatprep.subr.msk.bf16.mxu1 %vm389_vm0, %v466_v0  ;;  %v500_v2 = vsel %vm389_vm0, %v466_v0, 0  ;;  %v3102_v5 = vld [vmem:[%s4706_s2 + $0x4] sm:$0xf]  ;;  %vm376_vm1 = vcmask 64512  }
   0xf   : > { %3591 = vmatprep.subr.msk.bf16.mxu0 %vm389_vm0, %v355_v1  ;;  %v391_v3 = vsel %vm389_vm0, %v355_v1, 0  ;;  %3350 = vmatpush3.bf16.msra.mxu1 %v500_v2  ;;  %s4828_s19 = smov (!%p230_p3, %s3076_s19), 1  ;;  %v3737_v6 = vld [vmem:[%s4707_s3 + $0x8] sm:$0xf]  ;;  %v3748_v8 = vld [vmem:[%s4707_s3 + $0xc] sm:$0xf] }
  0x10   : > { %3340 = vmatpush3.bf16.msra.mxu0 %v391_v3  ;;  %3594 = vmatprep.subr.msk.bf16.mxu1 %vm389_vm0, %v3111_v4  ;;  %v3742_v7 = vld [vmem:[%s4706_s2 + $0x8] sm:$0xf]  ;;  %s3609_s7 = smul.u32 288, %s4828_s19  ;;  %v3751_v9 = vsel %vm389_vm0, %v3111_v4, 0  ;;  %v642_v10 = vsel %vm389_vm0, %v3102_v5, 0  ;;  %v3771_v12 = vsel %vm389_vm0, %v3737_v6, 0 }
  0x11   : > { %3593 = vmatprep.subr.msk.bf16.mxu0 %vm389_vm0, %v3102_v5  ;;  %v3757_v11 = vld [vmem:[%s4706_s2 + $0xc] sm:$0xf]  ;;  %v3775_v13 = vsel %vm389_vm0, %v3742_v7, 0  ;;  %v3779_v14 = vsel %vm389_vm0, %v3748_v8, 0  ;;  %vm859_vm2 = vsmask.f32 3328 }
  0x12   : > { %s3762_s14 = scalar_lea.vmem %s4704_s0, %s3609_s7  ;;  %s3767_s17 = scalar_lea.vmem %s4705_s1, %s3609_s7  ;;  %v3783_v15 = vsel %vm389_vm0, %v3757_v11, 0  ;;  %vm860_vm3 = vsmask.f32 7440  ;;  %vm3000_vm5 = vcmask 130048  }
  0x13   : > { %v246_v16 = vld [vmem:[%s3762_s14] sm:$0xf]  ;;  %v3787_v17 = vld [vmem:[%s3762_s14 + $0x8] sm:$0xf]  ;;  %v3798_v28 = vld [vmem:[%s3762_s14 + $0x10] sm:$0xf] }
  0x14   : > { %v297_v18 = vld [vmem:[%s3767_s17] sm:$0xf]  ;;  %v3086_v19 = vcombine.low %v246_v16, %v3787_v17  ;;  %v863_v20 = vshrl.u32 %v246_v16, 16  ;;  %v866_v21 = vshll.u32 %v246_v16, 16  ;;  %v877_v22 = vshrl.u32 %v3787_v17, 16  ;;  %vm3976_vm4 = vmor %vm859_vm2, %vm860_vm3  ;;  %s3248_s20 = sshll.u32 %s4828_s19, 6 }
  0x15   : > { %v3793_v23 = vld [vmem:[%s3767_s17 + $0x8] sm:$0xf]  ;;  %v880_v24 = vshll.u32 %v3787_v17, 16  ;;  %v1077_v26 = vshrl.u32 %v297_v18, 16  ;;  %v1080_v27 = vshll.u32 %v297_v18, 16  ;;  %v891_v41 = vshrl.u32 %v3798_v28, 16  ;;  %s4654_s23 = scalar_lea.vmem %s4709_s5, %s3248_s20 }
  0x16   : > { %v3094_v25 = vcombine.low %v297_v18, %v3793_v23  ;;  %3341 = vmatprep.mubr.msk.bf16.mxu0 %vm376_vm1, %v3086_v19  ;;  %v865_v29 = vrot.slane %v863_v20, 4  ;;  %v868_v30 = vrot.slane %v866_v21, 5  ;;  %v879_v31 = vrot.slane %v877_v22, 4  ;;  %v3803_v33 = vld [vmem:[%s3762_s14 + $0x18] sm:$0xf] }
  0x17   : > { %v1091_v32 = vshrl.u32 %v3793_v23, 16  ;;  %v882_v34 = vrot.slane %v880_v24, 5  ;;  %v1079_v35 = vrot.slane %v1077_v26, 4  ;;  %v1082_v36 = vrot.slane %v1080_v27, 5  ;;  %v3812_v46 = vld [vmem:[%s3767_s17 + $0x10] sm:$0xf] }
  0x18   : > { %3351 = vmatprep.mubr.msk.bf16.mxu1 %vm376_vm1, %v3094_v25  ;;  %v1094_v37 = vshll.u32 %v3793_v23, 16  ;;  %v869_v38 = vor.u32 %v868_v30, %v865_v29  ;;  %v3087_v40 = vcombine.low %v3798_v28, %v3803_v33  ;;  %v894_v45 = vshll.u32 %v3798_v28, 16  ;;  %v3815_v47 = vld [vmem:[%s3767_s17 + $0x18] sm:$0xf]  ;;  %v3823_v52 = vld [vmem:[%s3762_s14 + $0x20] sm:$0xf] }
  0x19   : > { %v1093_v39 = vrot.slane %v1091_v32, 4  ;;  %v883_v42 = vor.u32 %v882_v34, %v879_v31  ;;  %v1083_v43 = vor.u32 %v1082_v36, %v1079_v35  ;;  %4739 = vst [vmem:[#allocation2_spill] sm:$0xff] %v3815_v47  ;;  %v893_v49 = vrot.slane %v891_v41, 4  ;;  %4740 = vst [vmem:[#allocation3_spill] sm:$0xff] %v3823_v52  ;;  %v3830_v57 = vld [vmem:[%s3762_s14 + $0x28] sm:$0xf] }
  0x1a   : > { %v1096_v44 = vrot.slane %v1094_v37, 5  ;;  %v3817_v48 = vrot.slane %v869_v38, 4  ;;  %3342 = vmatmul.mubr.msk.bf16.vlgmr.msra.gmra.mrb[0].mxu0 %vm376_vm1, %v3087_v40  ;;  %v905_v50 = vshrl.u32 %v3803_v33, 16  ;;  %v908_v51 = vshll.u32 %v3803_v33, 16  ;;  %4741 = vst [vmem:[#allocation4_spill] sm:$0xff] %v3830_v57 }
  0x1b   : > { %v3825_v53 = vrot.slane %v883_v42, 4  ;;  %v3827_v54 = vrot.slane %v1083_v43, 4  ;;  %v896_v56 = vrot.slane %v894_v45, 5  ;;  %3360 = vmatpush3.bf16.msra.mxu0 %v642_v10  ;;  %v3095_v60 = vcombine.low %v3812_v46, %v3815_v47  ;;  %v3842_v2 = vld [vmem:[%s3767_s17 + $0x20] sm:$0xf] }
  0x1c   : > { %v1097_v55 = vor.u32 %v1096_v44, %v1093_v39  ;;  %v907_v58 = vrot.slane %v905_v50, 4  ;;  %v910_v59 = vrot.slane %v908_v51, 5  ;;  %v1105_v61 = vshrl.u32 %v3812_v46, 16  ;;  %3595 = vmatprep.subr.msk.bf16.mxu0 %vm389_vm0, %v3742_v7  ;;  %4742 = vst [vmem:[#allocation5_spill] sm:$0xff] %v3842_v2  ;;  %v3849_v7 = vld [vmem:[%s3767_s17 + $0x28] sm:$0xf] }
  0x1d   : > { %v897_v63 = vor.u32 %v896_v56, %v893_v49  ;;  %v1108_v0 = vshll.u32 %v3812_v46, 16  ;;  %v1119_v1 = vshrl.u32 %v3815_v47, 16  ;;  %3352 = vmatmul.mubr.msk.bf16.vlgmr.msra.gmra.mrb[0].mxu1 %vm376_vm1, %v3095_v60  ;;  %v1122_v5 = vshll.u32 %v3815_v47, 16  ;;  %v3852_v16 = vld [vmem:[%s3762_s14 + $0x30] sm:$0xf] }
  0x1e   : > { %v3837_v62 = vrot.slane %v1097_v55, 4  ;;  %v911_v3 = vor.u32 %v910_v59, %v907_v58  ;;  %v1107_v4 = vrot.slane %v1105_v61, 4  ;;  %v3088_v10 = vcombine.low %v3823_v52, %v3830_v57  ;;  %4743 = vst [vmem:[#allocation6_spill] sm:$0xff] %v3852_v16  ;;  %3370 = vmatpush3.bf16.msra.mxu1 %v3751_v9  ;;  %v3859_v22 = vld [vmem:[%s3762_s14 + $0x38] sm:$0xf] }
  0x1f   : > { %v3854_v18 = vrot.slane %v897_v63, 4  ;;  %v1110_v19 = vrot.slane %v1108_v0, 5  ;;  %v1121_v20 = vrot.slane %v1119_v1, 4  ;;  %4744 = vst [vmem:[#allocation7_spill] sm:$0xff] %v3859_v22  ;;  %v1124_v25 = vrot.slane %v1122_v5, 5  ;;  %3596 = vmatprep.subr.msk.bf16.mxu1 %vm389_vm0, %v3737_v6 }
  0x20   : > { %v3861_v24 = vrot.slane %v911_v3, 4  ;;  %3345 = vmatprep.mubr.msk.bf16.mxu0 %vm376_vm1, %v3088_v10  ;;  %v3867_v9 = vld [vmem:[%s3767_s17 + $0x30] sm:$0xf]  ;;  %v3870_v29 = vld [vmem:[%s3767_s17 + $0x38] sm:$0xf]  ;;  %v3096_v34 = vcombine.low %v3842_v2, %v3849_v7  ;;  %v3089_v50 = vcombine.low %v3852_v16, %v3859_v22 }
  0x21   : > { %4745 = vst [vmem:[#allocation8_spill] sm:$0xff] %v3870_v29  ;;  %v1111_v30 = vor.u32 %v1110_v19, %v1107_v4  ;;  %v264_v35 = vld [vmem:[%s3762_s14 + $0x48] sm:$0xf]  ;;  %v3881_v36 = vld [vmem:[%s3762_s14 + $0x50] sm:$0xf]  ;;  %v1125_v39 = vor.u32 %v1124_v25, %v1121_v20  ;;  %v3097_v0 = vcombine.low %v3867_v9, %v3870_v29 }
  0x22   : > { %4746 = vst [vmem:[#allocation9_spill] sm:$0xff] %v3881_v36  ;;  %v315_v37 = vld [vmem:[%s3767_s17 + $0x48] sm:$0xf]  ;;  %v3885_v38 = vld [vmem:[%s3767_s17 + $0x50] sm:$0xf]  ;;  %3355 = vmatprep.mubr.msk.bf16.mxu1 %vm376_vm1, %v3096_v34  ;;  %3346 = vmatmul.mubr.msk.bf16.gmra.mrb[4].mxu0 %vm376_vm1, %v3089_v50  ;;  %v3103_v19 = vcombine.low %v264_v35, %v3881_v36 }
  0x23   : > { %4747 = vst [vmem:[#allocation10_spill] sm:$0xff] %v3885_v38  ;;  %v3891_v42 = vld [vmem:[%s3762_s14 + $0x58] sm:$0xf]  ;;  %v3894_v43 = vld [vmem:[%s3762_s14 + $0x60] sm:$0xf]  ;;  %v3896_v44 = vrot.slane %v1111_v30, 4  ;;  %v3112_v20 = vcombine.low %v315_v37, %v3885_v38 }
  0x24   : > { %4748 = vst [vmem:[#allocation11_spill] sm:$0xff] %v3891_v42  ;;  %4749 = vst [vmem:[#allocation12_spill] sm:$0xff] %v3894_v43  ;;  %v3905_v51 = vld [vmem:[%s3767_s17 + $0x58] sm:$0xf]  ;;  %v3908_v55 = vld [vmem:[%s3767_s17 + $0x60] sm:$0xf]  ;;  %v3104_v34 = vcombine.low %v3891_v42, %v3894_v43  ;;  %3361 = vmatprep.mubr.msk.bf16.mxu0 %vm376_vm1, %v3103_v19 }
  0x25   : > { %4750 = vst [vmem:[#allocation13_spill] sm:$0xff] %v3905_v51  ;;  %4751 = vst [vmem:[#allocation14_spill] sm:$0xff] %v3908_v55  ;;  %v3910_v56 = vrot.slane %v1125_v39, 4  ;;  %v3916_v61 = vld [vmem:[%s3762_s14 + $0x68] sm:$0xf]  ;;  %3356 = vmatmul.mubr.msk.bf16.gmra.mrb[4].mxu1 %vm376_vm1, %v3097_v0  ;;  %v3113_v39 = vcombine.low %v3905_v51, %v3908_v55 }
  0x26   : > { %4752 = vst [vmem:[#allocation15_spill] sm:$0xff] %v3916_v61  ;;  %v3925_v4 = vld [vmem:[%s3762_s14 + $0x70] sm:$0xf]  ;;  %v3932_v25 = vld [vmem:[%s3767_s17 + $0x68] sm:$0xf]  ;;  %3371 = vmatprep.mubr.msk.bf16.mxu1 %vm376_vm1, %v3112_v20 }
  0x27   : > { %4753 = vst [vmem:[#allocation16_spill] sm:$0xff] %v3925_v4  ;;  %4754 = vst [vmem:[#allocation17_spill] sm:$0xff] %v3932_v25  ;;  %v3935_v30 = vld [vmem:[%s3767_s17 + $0x70] sm:$0xf]  ;;  %v3105_v35 = vcombine.low %v3916_v61, %v3925_v4  ;;  %v3947_v50 = vld [vmem:[%s3762_s14 + $0x78] sm:$0xf] }
  0x28   : > { %4755 = vst [vmem:[#allocation18_spill] sm:$0xff] %v3935_v30  ;;  %4756 = vst [vmem:[#allocation19_spill] sm:$0xff] %v3947_v50  ;;  %v3950_v49 = vld [vmem:[%s3762_s14 + $0x80] sm:$0xf]  ;;  %v3953_v32 = vld [vmem:[%s3767_s17 + $0x78] sm:$0xf]  ;;  %v3114_v0 = vcombine.low %v3932_v25, %v3935_v30 }
  0x29   : > { %4757 = vst [vmem:[#allocation20_spill] sm:$0xff] %v3950_v49  ;;  %4758 = vst [vmem:[#allocation21_spill] sm:$0xff] %v3953_v32  ;;  %v3964_v5 = vld [vmem:[%s3767_s17 + $0x80] sm:$0xf]  ;;  %v247_v3 = vld [vmem:[%s3762_s14 + $0x4] sm:$0x1] }
  0x2a   : > { %4759 = vst [vmem:[#allocation22_spill] sm:$0xff] %v3964_v5  ;;  %v249_v1 = vld [vmem:[%s3762_s14 + $0xc] sm:$0x1]  ;;  %v872_v63 = vshll.u32 %v247_v3, 16  ;;  %v298_v60 = vld [vmem:[%s3767_s17 + $0x4] sm:$0x1]  ;;  %3362 = vmatmul.mubr.msk.bf16.vlgmr.msra.gmra.mrb[0].mxu0 %vm376_vm1, %v3104_v34 }
  0x2b   : > { %v886_v20 = vshll.u32 %v249_v1, 16  ;;  %v300_v59 = vld [vmem:[%s3767_s17 + $0xc] sm:$0x1]  ;;  %v1086_v45 = vshll.u32 %v298_v60, 16  ;;  %v251_v41 = vld [vmem:[%s3762_s14 + $0x14] sm:$0x1]  ;;  %3365 = vmatprep.mubr.msk.bf16.mxu0 %vm376_vm1, %v3105_v35  ;;  %3380 = vmatpush3.bf16.msra.mxu0 %v3775_v13 }
  0x2c   : > { %v1100_v37 = vshll.u32 %v300_v59, 16  ;;  %v253_v40 = vld [vmem:[%s3762_s14 + $0x1c] sm:$0x1]  ;;  %v874_v19 = vrot.slane %v872_v63, 5  ;;  %v900_v58 = vshll.u32 %v251_v41, 16  ;;  %v4762_v59 = vshrl.u32 %v3823_v52, 16  ;;  %3597 = vmatprep.subr.msk.bf16.mxu0 %vm389_vm0, %v3757_v11 }
  0x2d   : > { %v888_v6 = vrot.slane %v886_v20, 5  ;;  %v914_v31 = vshll.u32 %v253_v40, 16  ;;  %v302_v27 = vld [vmem:[%s3767_s17 + $0x14] sm:$0x1]  ;;  %v1088_v26 = vrot.slane %v1086_v45, 5  ;;  %3372 = vmatmul.mubr.msk.bf16.vlgmr.msra.gmra.mrb[8].mxu1 %vm376_vm1, %v3113_v39  ;;  %v4768_v35 = vshll.u32 %v3830_v57, 16 }
  0x2e   : > { %v1102_v21 = vrot.slane %v1100_v37, 5  ;;  %v304_v25 = vld [vmem:[%s3767_s17 + $0x1c] sm:$0x1]  ;;  %v1114_v60 = vshll.u32 %v302_v27, 16  ;;  %v921_v55 = vrot.slane %v4762_v59, 4  ;;  %v875_v1 = vsel %vm3976_vm4, %v3817_v48, %v874_v19  ;;  %3390 = vmatpush3.bf16.msra.mxu1 %v3771_v12  ;;  %3375 = vmatprep.mubr.msk.bf16.mxu1 %vm376_vm1, %v3114_v0 }
  0x2f   : > { %v3997_v41 = vsel %vm3976_vm4, %v3825_v53, %v888_v6  ;;  %v902_v40 = vrot.slane %v900_v58, 5  ;;  %v916_v45 = vrot.slane %v914_v31, 5  ;;  %v255_v63 = vld [vmem:[%s3762_s14 + $0x24] sm:$0x1]  ;;  %v1089_v34 = vsel %vm3976_vm4, %v3827_v54, %v1088_v26  ;;  %v257_v6 = vld [vmem:[%s3762_s14 + $0x2c] sm:$0x1]  ;;  %3598 = vmatprep.subr.msk.bf16.mxu1 %vm389_vm0, %v3748_v8 }
  0x30   : > { %4763 = vst [vmem:[#allocation23_spill] sm:$0xff] %v3997_v41  ;;  %v3121_v27 = vcombine.low %v875_v1, %v3997_v41  ;;  %v4009_v48 = vsel %vm3976_vm4, %v3837_v62, %v1102_v21  ;;  %v1116_v53 = vrot.slane %v1114_v60, 5  ;;  %v1128_v26 = vshll.u32 %v304_v25, 16  ;;  %v306_v25 = vld [vmem:[%s3767_s17 + $0x24] sm:$0x1] }
  0x31   : > { %v3130_v31 = vcombine.low %v1089_v34, %v4009_v48  ;;  %v4017_v13 = vsel %vm3976_vm4, %v3854_v18, %v902_v40  ;;  %v4022_v54 = vsel %vm3976_vm4, %v3861_v24, %v916_v45  ;;  %v4766_v21 = vshll.u32 %v3823_v52, 16  ;;  %v281_v3 = vld [vmem:[%s3762_s14 + $0xb0] sm:$0xf]  ;;  %v285_v30 = vld [vmem:[%s3762_s14 + $0xc0] sm:$0xf] }
  0x32   : > { %4764 = vst [vmem:[#allocation24_spill] sm:$0xff] %v4017_v13  ;;  %4765 = vst [vmem:[#allocation25_spill] sm:$0xff] %v4022_v54  ;;  %v3122_v62 = vcombine.low %v4017_v13, %v4022_v54  ;;  %v4033_v18 = vsel %vm3976_vm4, %v3896_v44, %v1116_v53  ;;  %v928_v58 = vshll.u32 %v255_v63, 16  ;;  %v1130_v11 = vrot.slane %v1128_v26, 5  ;;  %v308_v44 = vld [vmem:[%s3767_s17 + $0x2c] sm:$0x1] }
  0x33   : > { %v924_v24 = vrot.slane %v4766_v21, 5  ;;  %v4767_v12 = vshrl.u32 %v3830_v57, 16  ;;  %v938_v37 = vrot.slane %v4768_v35, 5  ;;  %v942_v0 = vshll.u32 %v257_v6, 16  ;;  %v4212_v4 = vld [vmem:[%s3767_s17 + $0xc8] sm:$0xf] }
  0x34   : > { %v930_v20 = vrot.slane %v928_v58, 5  ;;  %v4769_v1 = vshrl.u32 %v3842_v2, 16  ;;  %v4770_v59 = vshll.u32 %v3842_v2, 16  ;;  %v4052_v8 = vsel %vm3976_vm4, %v3910_v56, %v1130_v11  ;;  %v325_v42 = vld [vmem:[%s3767_s17 + $0x94] sm:$0x1] }
  0x35   : > { %v935_v39 = vrot.slane %v4767_v12, 4  ;;  %v925_v19 = vor.u32 %v924_v24, %v921_v55  ;;  %4771 = vst [vmem:[#allocation26_spill] sm:$0xff] %v4052_v8  ;;  %v944_v63 = vrot.slane %v942_v0, 5  ;;  %v1142_v34 = vshll.u32 %v306_v25, 16  ;;  %v327_v2 = vld [vmem:[%s3767_s17 + $0x9c] sm:$0x1] }
  0x36   : > { %v1135_v60 = vrot.slane %v4769_v1, 4  ;;  %v1138_v40 = vrot.slane %v4770_v59, 5  ;;  %v3131_v55 = vcombine.low %v4033_v18, %v4052_v8  ;;  %v4772_v26 = vshrl.u32 %v3849_v7, 16  ;;  %v332_v8 = vld [vmem:[%s3767_s17 + $0xb0] sm:$0xf] }
  0x37   : > { %v939_v45 = vor.u32 %v938_v37, %v935_v39  ;;  %v926_v53 = vrot.slane %v925_v19, 4  ;;  %v4773_v24 = vcombine.low %v3947_v50, %v3950_v49  ;;  %v1144_v56 = vrot.slane %v1142_v34, 5  ;;  %v259_v39 = vld [vmem:[%s3762_s14 + $0x34] sm:$0x1] }
  0x38   : > { %v1139_v6 = vor.u32 %v1138_v40, %v1135_v60  ;;  %v1149_v21 = vrot.slane %v4772_v26, 4  ;;  %v4774_v11 = vshll.u32 %v3849_v7, 16  ;;  %v1156_v25 = vshll.u32 %v308_v44, 16 }
  0x39   : > { %3366 = vmatmul.mubr.msk.bf16.gmra.mrb[4].mxu0 %vm376_vm1, %v4773_v24  ;;  %v940_v58 = vrot.slane %v939_v45, 4  ;;  %v4068_v35 = vsel %vm3976_vm4, %v926_v53, %v930_v20  ;;  %v4776_v0 = vshrl.u32 %v3852_v16, 16  ;;  %v4777_v1 = vshll.u32 %v3852_v16, 16  ;;  %v261_v45 = vld [vmem:[%s3762_s14 + $0x3c] sm:$0x1] }
  0x3a   : > { %v1152_v12 = vrot.slane %v4774_v11, 5  ;;  %3381 = vmatprep.mubr.msk.bf16.mxu0 %vm376_vm1, %v3121_v27  ;;  %4775 = vst [vmem:[#allocation27_spill] sm:$0xff] %v4068_v35  ;;  %v1140_v37 = vrot.slane %v1139_v6, 4  ;;  %v4778_v59 = vcombine.low %v3953_v32, %v3964_v5  ;;  %v1158_v40 = vrot.slane %v1156_v25, 5  ;;  %v275_v20 = vld [vmem:[%s3762_s14 + $0x98] sm:$0xf] }
  0x3b   : > { %v949_v19 = vrot.slane %v4776_v0, 4  ;;  %v952_v60 = vrot.slane %v4777_v1, 5  ;;  %v4080_v27 = vsel %vm3976_vm4, %v940_v58, %v944_v63  ;;  %v956_v26 = vshll.u32 %v259_v39, 16  ;;  %v310_v63 = vld [vmem:[%s3767_s17 + $0x34] sm:$0x1] }
  0x3c   : > { %3376 = vmatmul.mubr.msk.bf16.gmra.mrb[12].mxu1 %vm376_vm1, %v4778_v59  ;;  %v1153_v44 = vor.u32 %v1152_v12, %v1149_v21  ;;  %v3123_v34 = vcombine.low %v4068_v35, %v4080_v27  ;;  %v4090_v53 = vsel %vm3976_vm4, %v1140_v37, %v1144_v56  ;;  %v4780_v21 = vshrl.u32 %v3859_v22, 16  ;;  %v4180_v35 = vld [vmem:[%s3767_s17 + $0xb8] sm:$0xf]  ;;  %v4194_v32 = vld [vmem:[%s3762_s14 + $0xc8] sm:$0xf] }
  0x3d   : > { %3391 = vmatprep.mubr.msk.bf16.mxu1 %vm376_vm1, %v3130_v31  ;;  %4779 = vst [vmem:[#allocation28_spill] sm:$0xff] %v4090_v53  ;;  %v953_v6 = vor.u32 %v952_v60, %v949_v19  ;;  %v4781_v31 = vshll.u32 %v3859_v22, 16  ;;  %v958_v0 = vrot.slane %v956_v26, 5  ;;  %v970_v1 = vshll.u32 %v261_v45, 16  ;;  %v312_v19 = vld [vmem:[%s3767_s17 + $0x3c] sm:$0x1] }
  0x3e   : > { %v1154_v24 = vrot.slane %v1153_v44, 4  ;;  %v963_v11 = vrot.slane %v4780_v21, 4  ;;  %v4782_v59 = vshrl.u32 %v3867_v9, 16  ;;  %v4783_v60 = vshll.u32 %v3867_v9, 16  ;;  %v3648_v22 = vld [vmem:[%s3767_s17 + $0xd8] ss:$8 sps:$4 sm:$0xff]  }
  0x3f   : > { %v966_v12 = vrot.slane %v4781_v31, 5  ;;  %v954_v25 = vrot.slane %v953_v6, 4  ;;  %v1170_v21 = vshll.u32 %v310_v63, 16  ;;  %v4111_v6 = vld [vmem:[%s4706_s2 + $0x10] sm:$0xf]  ;;  %v972_v26 = vrot.slane %v970_v1, 5 }
  0x40   : > { %v1163_v56 = vrot.slane %v4782_v59, 4  ;;  %v4103_v39 = vsel %vm3976_vm4, %v1154_v24, %v1158_v40  ;;  %v1166_v44 = vrot.slane %v4783_v60, 5  ;;  %v4784_v31 = vshrl.u32 %v3870_v29, 16  ;;  %v3165_v24 = vld [vmem:[%s4707_s3 + $0x10] sm:$0xf] }
  0x41   : > { %v967_v37 = vor.u32 %v966_v12, %v963_v11  ;;  %v3132_v45 = vcombine.low %v4090_v53, %v4103_v39  ;;  %3382 = vmatmul.mubr.msk.bf16.vlgmr.msra.gmra.mrb[0].mxu0 %vm376_vm1, %v3122_v62  ;;  %v1172_v12 = vrot.slane %v1170_v21, 5  ;;  %v4785_v59 = vshll.u32 %v3870_v29, 16  ;;  %v273_v1 = vld [vmem:[%s3762_s14 + $0x90] sm:$0xf] }
  0x42   : > { %v1177_v40 = vrot.slane %v4784_v31, 4  ;;  %v1167_v11 = vor.u32 %v1166_v44, %v1163_v56  ;;  %3385 = vmatprep.mubr.msk.bf16.mxu0 %vm376_vm1, %v3123_v34  ;;  %v4130_v31 = vsel %vm3976_vm4, %v954_v25, %v958_v0  ;;  %v1184_v58 = vshll.u32 %v312_v19, 16  ;;  %3400 = vmatpush3.bf16.msra.mxu0 %v3783_v15  ;;  %v324_v44 = vld [vmem:[%s3767_s17 + $0x90] sm:$0xf]  ;;  %v326_v34 = vld [vmem:[%s3767_s17 + $0x98] sm:$0xf] }
  0x43   : > { %v968_v63 = vrot.slane %v967_v37, 4  ;;  %v1180_v60 = vrot.slane %v4785_v59, 5  ;;  %3599 = vmatprep.subr.msk.bf16.mxu0 %vm389_vm0, %v4111_v6  ;;  %v4153_v19 = vsel %vm389_vm0, %v3165_v24, 0  ;;  %v1827_v21 = vshrl.u32 %v273_v1, 16 }
  0x44   : > { %3392 = vmatmul.mubr.msk.bf16.vlgmr.msra.gmra.mrb[16].mxu1 %vm376_vm1, %v3131_v55  ;;  %v1168_v56 = vrot.slane %v1167_v11, 4  ;;  %v1186_v15 = vrot.slane %v1184_v58, 5  ;;  %v1830_v58 = vshll.u32 %v273_v1, 16  ;;  %v1844_v11 = vshll.u32 %v275_v20, 16 }
  0x45   : > { %v4137_v62 = vsel %vm3976_vm4, %v968_v63, %v972_v26  ;;  %v1181_v37 = vor.u32 %v1180_v60, %v1177_v40  ;;  %3410 = vmatpush3.bf16.msra.mxu1 %v3779_v14  ;;  %3395 = vmatprep.mubr.msk.bf16.mxu1 %vm376_vm1, %v3132_v45  ;;  %v3139_v14 = vcombine.low %v273_v1, %v275_v20  ;;  %v277_v45 = vld [vmem:[%s3762_s14 + $0xa0] sm:$0xf]  ;;  %v279_v26 = vld [vmem:[%s3762_s14 + $0xa8] sm:$0xf]  ;;  %v1841_v63 = vshrl.u32 %v275_v20, 16 }
  0x46   : > { %4786 = vst [vmem:[#allocation29_spill] sm:$0xff] %v4137_v62  ;;  %v3124_v55 = vcombine.low %v4130_v31, %v4137_v62  ;;  %v4149_v25 = vsel %vm3976_vm4, %v1168_v56, %v1172_v12  ;;  %3600 = vmatprep.subr.msk.bf16.mxu1 %vm389_vm0, %v3165_v24  ;;  %v3148_v12 = vcombine.low %v324_v44, %v326_v34  ;;  %v2041_v24 = vshrl.u32 %v324_v44, 16  ;;  %v330_v1 = vld [vmem:[%s3767_s17 + $0xa8] sm:$0xf]  ;;  %v283_v20 = vld [vmem:[%s3762_s14 + $0xb8] sm:$0xf] }
  0x47   : > { %v1182_v0 = vrot.slane %v1181_v37, 4  ;;  %v2044_v60 = vshll.u32 %v324_v44, 16  ;;  %v2055_v56 = vshrl.u32 %v326_v34, 16  ;;  %v328_v37 = vld [vmem:[%s3767_s17 + $0xa0] sm:$0xf]  ;;  %v4176_v62 = vrot.slane %v1844_v11, 5 }
  0x48   : > { %v2058_v44 = vshll.u32 %v326_v34, 16  ;;  %v3140_v53 = vcombine.low %v277_v45, %v279_v26  ;;  %v1858_v54 = vshll.u32 %v277_v45, 16  ;;  %v1872_v11 = vshll.u32 %v279_v26, 16 }
  0x49   : > { %v4159_v40 = vsel %vm3976_vm4, %v1182_v0, %v1186_v15  ;;  %3386 = vmatmul.mubr.msk.bf16.gmra.mrb[4].mxu0 %vm376_vm1, %v3124_v55  ;;  %v4168_v15 = vrot.slane %v1827_v21, 4  ;;  %v4170_v0 = vrot.slane %v1830_v58, 5  ;;  %v4183_v55 = vrot.slane %v2041_v24, 4 }
  0x4a   : > { %4787 = vst [vmem:[#allocation30_spill] sm:$0xff] %v4159_v40  ;;  %v3133_v59 = vcombine.low %v4149_v25, %v4159_v40  ;;  %3401 = vmatprep.mubr.msk.bf16.mxu0 %vm376_vm1, %v3139_v14  ;;  %v4174_v40 = vrot.slane %v1841_v63, 4  ;;  %v4185_v14 = vrot.slane %v2044_v60, 5  ;;  %v4187_v21 = vrot.slane %v2055_v56, 4 }
  0x4b   : > { %v1855_v58 = vshrl.u32 %v277_v45, 16  ;;  %v1869_v63 = vshrl.u32 %v279_v26, 16  ;;  %v2069_v34 = vshrl.u32 %v328_v37, 16  ;;  %v2072_v5 = vshll.u32 %v328_v37, 16  ;;  %v4199_v26 = vld [vmem:[%s4707_s3 + $0x14] sm:$0xf] }
  0x4c   : > { %3396 = vmatmul.mubr.msk.bf16.gmra.mrb[20].mxu1 %vm376_vm1, %v3133_v59  ;;  %v3149_v59 = vcombine.low %v328_v37, %v330_v1  ;;  %v2083_v41 = vshrl.u32 %v330_v1, 16  ;;  %v3141_v13 = vcombine.low %v281_v3, %v283_v20  ;;  %v2086_v49 = vshll.u32 %v330_v1, 16 }
  0x4d   : > { %3411 = vmatprep.mubr.msk.bf16.mxu1 %vm376_vm1, %v3148_v12  ;;  %v1883_v12 = vshrl.u32 %v281_v3, 16  ;;  %v1886_v24 = vshll.u32 %v281_v3, 16  ;;  %v1897_v60 = vshrl.u32 %v283_v20, 16  ;;  %v4189_v61 = vrot.slane %v2058_v44, 5  ;;  %v4209_v44 = vld [vmem:[%s3767_s17 + $0xc0] sm:$0xf] }
  0x4e   : > { %v1900_v56 = vshll.u32 %v283_v20, 16  ;;  %v3150_v45 = vcombine.low %v332_v8, %v4180_v35  ;;  %v2097_v43 = vshrl.u32 %v332_v8, 16  ;;  %v4202_v37 = vrot.slane %v1855_v58, 4 }
  0x4f   : > { %v4204_v3 = vrot.slane %v1858_v54, 5  ;;  %v4206_v1 = vrot.slane %v1869_v63, 4  ;;  %v2100_v20 = vshll.u32 %v332_v8, 16  ;;  %v4214_v50 = vrot.slane %v1872_v11, 5 }
  0x50   : > { %v4216_v38 = vrot.slane %v2069_v34, 4  ;;  %v4218_v51 = vrot.slane %v2072_v5, 5  ;;  %v4220_v29 = vrot.slane %v2083_v41, 4  ;;  %v4224_v54 = vrot.slane %v2086_v49, 5 }
  0x51   : > { %3402 = vmatmul.mubr.msk.bf16.vlgmr.msra.gmra.mrb[0].mxu0 %vm376_vm1, %v3140_v53  ;;  %v4226_v8 = vrot.slane %v1883_v12, 4  ;;  %v4228_v53 = vrot.slane %v1886_v24, 5  ;;  %v4230_v58 = vrot.slane %v1897_v60, 4  ;;  %v4233_v63 = vrot.slane %v1900_v56, 5  ;;  %v274_v56 = vld [vmem:[%s3762_s14 + $0x94] sm:$0x1] }
  0x52   : > { %3405 = vmatprep.mubr.msk.bf16.mxu0 %vm376_vm1, %v3141_v13  ;;  %v4236_v5 = vrot.slane %v2097_v43, 4  ;;  %v2111_v41 = vshrl.u32 %v4180_v35, 16  ;;  %v2114_v49 = vshll.u32 %v4180_v35, 16  ;;  %v3647_v13 = vld [vmem:[%s3762_s14 + $0xd8] ss:$8 sps:$4 sm:$0xff]   ;;  %v4241_v11 = vrot.slane %v2100_v20, 5 }
  0x53   : > { %v1911_v34 = vshrl.u32 %v285_v30, 16  ;;  %v3174_v43 = vld [vmem:[%s4706_s2 + $0x14] sm:$0xf]  ;;  %v1914_v35 = vshll.u32 %v285_v30, 16  ;;  %v1925_v12 = vshrl.u32 %v4194_v32, 16  ;;  %v1928_v24 = vshll.u32 %v4194_v32, 16 }
  0x54   : > { %3412 = vmatmul.mubr.msk.bf16.vlgmr.msra.gmra.mrb[24].mxu1 %vm376_vm1, %v3149_v59  ;;  %v3142_v59 = vcombine.low %v285_v30, %v4194_v32  ;;  %v3151_v60 = vcombine.low %v4209_v44, %v4212_v4  ;;  %v1833_v20 = vor.u32 %v4170_v0, %v4168_v15  ;;  %v1836_v36 = vshll.u32 %v274_v56, 16 }
  0x55   : > { %3430 = vmatpush3.bf16.msra.mxu1 %v4153_v19  ;;  %3415 = vmatprep.mubr.msk.bf16.mxu1 %vm376_vm1, %v3150_v45  ;;  %v1609_v19 = vsel %vm389_vm0, %v4111_v6, 0  ;;  %v2125_v6 = vshrl.u32 %v4209_v44, 16  ;;  %v276_v45 = vld [vmem:[%s3762_s14 + $0x9c] sm:$0x1]  ;;  %v1847_v30 = vor.u32 %v4176_v62, %v4174_v40  ;;  %v2050_v47 = vshll.u32 %v325_v42, 16 }
  0x56   : > { %3602 = vmatprep.subr.msk.bf16.mxu1 %vm389_vm0, %v4199_v26  ;;  %3420 = vmatpush3.bf16.msra.mxu0 %v1609_v19  ;;  %v1850_v32 = vshll.u32 %v276_v45, 16  ;;  %v2047_v19 = vor.u32 %v4185_v14, %v4183_v55  ;;  %v2061_v16 = vor.u32 %v4189_v61, %v4187_v21  ;;  %v1834_v57 = vrot.slane %v1833_v20, 4  ;;  %v278_v14 = vld [vmem:[%s3762_s14 + $0xa4] sm:$0x1]  ;;  %v3652_v20 = vld [vmem:[%s3767_s17 + $0xf8] ss:$8 sps:$4 sm:$0xff]  }
  0x57   : > { %3601 = vmatprep.subr.msk.bf16.mxu0 %vm389_vm0, %v3174_v43  ;;  %v1838_v15 = vrot.slane %v1836_v36, 5  ;;  %v1848_v0 = vrot.slane %v1847_v30, 4  ;;  %v2064_v56 = vshll.u32 %v327_v2, 16  ;;  %v4271_v52 = vrot.slane %v2111_v41, 4 }
  0x58   : > { %v4273_v62 = vrot.slane %v2114_v49, 5  ;;  %v4275_v40 = vrot.slane %v1911_v34, 4  ;;  %v1852_v42 = vrot.slane %v1850_v32, 5  ;;  %v4278_v61 = vrot.slane %v1914_v35, 5  ;;  %v3650_v34 = vld [vmem:[%s3767_s17 + $0xe8] ss:$8 sps:$4 sm:$0xff]  }
  0x59   : > { %3406 = vmatmul.mubr.msk.bf16.gmra.mrb[4].mxu0 %vm376_vm1, %v3142_v59  ;;  %v4280_v55 = vrot.slane %v1925_v12, 4  ;;  %v4283_v2 = vrot.slane %v2047_v19, 4  ;;  %v4285_v36 = vrot.slane %v2050_v47, 5  ;;  %v4288_v21 = vrot.slane %v1928_v24, 5  ;;  %v3649_v59 = vld [vmem:[%s3762_s14 + $0xe8] ss:$8 sps:$4 sm:$0xff]  }
  0x5a   : > { %3421 = vmatprep.mubr.msk.bf16.mxu0 %vm376_vm1, %v3647_v13  ;;  %v4290_v41 = vrot.slane %v2125_v6, 4  ;;  %v2128_v49 = vshll.u32 %v4209_v44, 16  ;;  %v3651_v35 = vld [vmem:[%s3762_s14 + $0xf8] ss:$8 sps:$4 sm:$0xff]   ;;  %v1839_v47 = vsel %vm3976_vm4, %v1834_v57, %v1838_v15  ;;  %v1853_v12 = vsel %vm3976_vm4, %v1848_v0, %v1852_v42  ;;  %v280_v6 = vld [vmem:[%s3762_s14 + $0xac] sm:$0x1] }
  0x5b   : > { %v4302_v24 = vrot.slane %v2061_v16, 4  ;;  %v2179_v45 = vsel %vm389_vm0, %v4199_v26, 0  ;;  %v1965_v30 = vsel %vm389_vm0, %v3174_v43, 0  ;;  %v1864_v32 = vshll.u32 %v278_v14, 16  ;;  %v329_v19 = vld [vmem:[%s3767_s17 + $0xa4] sm:$0x1] }
  0x5c   : > { %3416 = vmatmul.mubr.msk.bf16.gmra.mrb[28].mxu1 %vm376_vm1, %v3151_v60  ;;  %v4304_v60 = vrot.slane %v2064_v56, 5  ;;  %v2053_v57 = vsel %vm3976_vm4, %v4283_v2, %v4285_v36  ;;  %v1861_v16 = vor.u32 %v4204_v3, %v4202_v37  ;;  %v331_v15 = vld [vmem:[%s3767_s17 + $0xac] sm:$0x1]  ;;  %v282_v0 = vld [vmem:[%s3762_s14 + $0xb4] sm:$0x1]  ;;  %v3175_v42 = vcombine.low %v1839_v47, %v1853_v12 }
  0x5d   : > { %3431 = vmatprep.mubr.msk.bf16.mxu1 %vm376_vm1, %v3648_v22  ;;  %v2142_v22 = vshll.u32 %v4212_v4, 16  ;;  %v284_v56 = vld [vmem:[%s3762_s14 + $0xbc] sm:$0x1]  ;;  %v1875_v26 = vor.u32 %v4214_v50, %v4206_v1  ;;  %v1878_v13 = vshll.u32 %v280_v6, 16  ;;  %v1889_v43 = vor.u32 %v4228_v53, %v4226_v8  ;;  %v333_v14 = vld [vmem:[%s3767_s17 + $0xb4] sm:$0x1] }
  0x5e   : > { %v4330_v2 = vld [vmem:[%s4706_s2 + $0x18] sm:$0xf]  ;;  %v2067_v37 = vsel %vm3976_vm4, %v4302_v24, %v4304_v60  ;;  %v2075_v3 = vor.u32 %v4218_v51, %v4216_v38  ;;  %v2078_v1 = vshll.u32 %v329_v19, 16  ;;  %v2089_v8 = vor.u32 %v4224_v54, %v4220_v29  ;;  %v335_v12 = vld [vmem:[%s3767_s17 + $0xbc] sm:$0x1] }
  0x5f   : > { %v4340_v50 = vld [vmem:[%s4707_s3 + $0x18] sm:$0xf]  ;;  %v2092_v53 = vshll.u32 %v331_v15, 16  ;;  %v1892_v36 = vshll.u32 %v282_v0, 16  ;;  %v1906_v47 = vshll.u32 %v284_v56, 16  ;;  %v1862_v24 = vrot.slane %v1861_v16, 4 }
  0x60   : > { %v1866_v38 = vrot.slane %v1864_v32, 5  ;;  %v2103_v51 = vor.u32 %v4241_v11, %v4236_v5  ;;  %v2106_v29 = vshll.u32 %v333_v14, 16  ;;  %v3653_v54 = vld [vmem:[%s3762_s14 + $0x108] ss:$8 sps:$4 sm:$0xff]   ;;  %v2117_v11 = vor.u32 %v4273_v62, %v4271_v52  ;;  %v286_v16 = vld [vmem:[%s3762_s14 + $0xc4] sm:$0x1] }
  0x61   : > { %3422 = vmatmul.mubr.msk.bf16.vlgmr.msra.gmra.mrb[0].mxu0 %vm376_vm1, %v3649_v59  ;;  %v1903_v59 = vor.u32 %v4233_v63, %v4230_v58  ;;  %v1876_v58 = vrot.slane %v1875_v26, 4  ;;  %v1880_v63 = vrot.slane %v1878_v13, 5  ;;  %v1894_v60 = vrot.slane %v1892_v36, 5  ;;  %v288_v26 = vld [vmem:[%s3762_s14 + $0xcc] sm:$0x1] }
  0x62   : > { %3425 = vmatprep.mubr.msk.bf16.mxu0 %vm376_vm1, %v3651_v35  ;;  %3440 = vmatpush3.bf16.msra.mxu0 %v1965_v30  ;;  %v1890_v35 = vrot.slane %v1889_v43, 4  ;;  %v1908_v5 = vrot.slane %v1906_v47, 5  ;;  %v2120_v30 = vshll.u32 %v335_v12, 16  ;;  %v2080_v32 = vrot.slane %v2078_v1, 5 }
  0x63   : > { %3603 = vmatprep.subr.msk.bf16.mxu0 %vm389_vm0, %v4330_v2  ;;  %v1904_v6 = vrot.slane %v1903_v59, 4  ;;  %v2094_v19 = vrot.slane %v2092_v53, 5  ;;  %v2104_v13 = vrot.slane %v2103_v51, 4  ;;  %v2108_v15 = vrot.slane %v2106_v29, 5  ;;  %v339_v53 = vld [vmem:[%s3767_s17 + $0xcc] sm:$0x1] }
  0x64   : > { %3432 = vmatmul.mubr.msk.bf16.vlgmr.msra.gmra.mrb[32].mxu1 %vm376_vm1, %v3650_v34  ;;  %v3654_v34 = vld [vmem:[%s3767_s17 + $0x108] ss:$8 sps:$4 sm:$0xff]   ;;  %v2118_v0 = vrot.slane %v2117_v11, 4  ;;  %v2122_v56 = vrot.slane %v2120_v30, 5  ;;  %v2130_v43 = vrot.slane %v2128_v49, 5  ;;  %v4788_v14 = vshrl.u32 %v4212_v4, 16 }
  0x65   : > { %3450 = vmatpush3.bf16.msra.mxu1 %v2179_v45  ;;  %3435 = vmatprep.mubr.msk.bf16.mxu1 %vm376_vm1, %v3652_v20  ;;  %v2076_v45 = vrot.slane %v2075_v3, 4  ;;  %v2090_v20 = vrot.slane %v2089_v8, 4  ;;  %v2144_v52 = vrot.slane %v2142_v22, 5  ;;  %v3184_v62 = vcombine.low %v2053_v57, %v2067_v37  ;;  %v337_v49 = vld [vmem:[%s3767_s17 + $0xc4] sm:$0x1] }
  0x66   : > { %3604 = vmatprep.subr.msk.bf16.mxu1 %vm389_vm0, %v4340_v50  ;;  %v2141_v36 = vrot.slane %v4788_v14, 4  ;;  %v1867_v3 = vsel %vm3976_vm4, %v1862_v24, %v1866_v38  ;;  %v1881_v1 = vsel %vm3976_vm4, %v1876_v58, %v1880_v63  ;;  %v1895_v8 = vsel %vm3976_vm4, %v1890_v35, %v1894_v60 }
  0x67   : > { %v1909_v44 = vsel %vm3976_vm4, %v1904_v6, %v1908_v5  ;;  %v1917_v4 = vor.u32 %v4278_v61, %v4275_v40  ;;  %v1920_v22 = vshll.u32 %v286_v16, 16  ;;  %v1931_v57 = vor.u32 %v4288_v21, %v4280_v55 }
  0x68   : > { %v1934_v37 = vshll.u32 %v288_v26, 16  ;;  %v2081_v59 = vsel %vm3976_vm4, %v2076_v45, %v2080_v32  ;;  %v2095_v47 = vsel %vm3976_vm4, %v2090_v20, %v2094_v19  ;;  %v2109_v12 = vsel %vm3976_vm4, %v2104_v13, %v2108_v15  ;;  %v3219_v32 = vld [vmem:[%s4707_s3 + $0x1c] sm:$0xf] }
  0x69   : > { %3426 = vmatmul.mubr.msk.bf16.gmra.mrb[4].mxu0 %vm376_vm1, %v3653_v54  ;;  %v2131_v40 = vor.u32 %v2130_v43, %v4290_v41  ;;  %v2134_v61 = vshll.u32 %v337_v49, 16  ;;  %v2145_v55 = vor.u32 %v2144_v52, %v2141_v36  ;;  %v2148_v21 = vshll.u32 %v339_v53, 16  ;;  %v3210_v41 = vld [vmem:[%s4706_s2 + $0x1c] sm:$0xf]  ;;  %v3228_v36 = vld [vmem:[%s4706_s2 + $0x20] sm:$0xf] }
  0x6a   : > { %3441 = vmatprep.mubr.msk.bf16.mxu0 %vm376_vm1, %v3175_v42  ;;  %v2123_v42 = vsel %vm3976_vm4, %v2118_v0, %v2122_v56  ;;  %v3176_v24 = vcombine.low %v1867_v3, %v1881_v1  ;;  %v3177_v38 = vcombine.low %v1895_v8, %v1909_v44  ;;  %v1918_v51 = vrot.slane %v1917_v4, 4  ;;  %v262_v3 = vld [vmem:[%s3762_s14 + $0x40] sm:$0xf]  ;;  %v4797_v1 = vld [vmem:[#allocation5_spill] sm:$0xff]  ;;  %v4799_v44 = vld [vmem:[#allocation7_spill] sm:$0xff] }
  0x6b   : > { %v1922_v29 = vrot.slane %v1920_v22, 5  ;;  %v1932_v54 = vrot.slane %v1931_v57, 4  ;;  %v1936_v58 = vrot.slane %v1934_v37, 5  ;;  %v3185_v63 = vcombine.low %v2081_v59, %v2095_v47  ;;  %v4800_v53 = vld [vmem:[#allocation11_spill] sm:$0xff]  ;;  %v4801_v4 = vld [vmem:[#allocation9_spill] sm:$0xff]  ;;  %v4802_v57 = vld [vmem:[#allocation8_spill] sm:$0xff] }
  0x6c   : > { %3436 = vmatmul.mubr.msk.bf16.gmra.mrb[36].mxu1 %vm376_vm1, %v3654_v34  ;;  %v3186_v35 = vcombine.low %v2109_v12, %v2123_v42  ;;  %v2307_v60 = vsel %vm389_vm0, %v4330_v2, 0  ;;  %v2132_v34 = vrot.slane %v2131_v40, 4  ;;  %v2136_v6 = vrot.slane %v2134_v61, 5  ;;  %v4803_v59 = vld [vmem:[#allocation13_spill] sm:$0xff]  ;;  %v4804_v47 = vld [vmem:[#allocation10_spill] sm:$0xff]  ;;  %v4805_v42 = vld [vmem:[#allocation19_spill] sm:$0xff] }
  0x6d   : > { %3451 = vmatprep.mubr.msk.bf16.mxu1 %vm376_vm1, %v3184_v62  ;;  %v2146_v5 = vrot.slane %v2145_v55, 4  ;;  %v2150_v11 = vrot.slane %v2148_v21, 5  ;;  %v2403_v30 = vsel %vm389_vm0, %v4340_v50, 0  ;;  %v1923_v45 = vsel %vm3976_vm4, %v1918_v51, %v1922_v29  ;;  %v4793_v62 = vld [vmem:[#allocation4_spill] sm:$0xff]  ;;  %v4807_v21 = vld [vmem:[#allocation21_spill] sm:$0xff]  ;;  %v4810_v29 = vld [vmem:[#allocation15_spill] sm:$0xff] }
  0x6e   : > { %v1937_v2 = vsel %vm3976_vm4, %v1932_v54, %v1936_v58  ;;  %v3238_v50 = vcombine.low %v4009_v48, %v4033_v18  ;;  %v3231_v20 = vcombine.low %v4080_v27, %v4130_v31  ;;  %v2137_v19 = vsel %vm3976_vm4, %v2132_v34, %v2136_v6  ;;  %v4806_v40 = vld [vmem:[#allocation16_spill] sm:$0xff]  ;;  %v4812_v34 = vld [vmem:[#allocation14_spill] sm:$0xff]  ;;  %v4813_v6 = vld [vmem:[#allocation17_spill] sm:$0xff] }
  0x6f   : > { %v2151_v16 = vsel %vm3976_vm4, %v2146_v5, %v2150_v11  ;;  %v3240_v13 = vcombine.low %v4103_v39, %v4149_v25  ;;  %v3178_v15 = vcombine.low %v1923_v45, %v1937_v2  ;;  %v4789_v56 = vcombine.low %v3787_v17, %v3798_v28  ;;  %v4791_v17 = vld [vmem:[#allocation3_spill] sm:$0xff]  ;;  %v4809_v51 = vld [vmem:[#allocation12_spill] sm:$0xff]  ;;  %v4822_v18 = vld [vmem:[#allocation26_spill] sm:$0xff] }
  0x70   : > { %v3187_v0 = vcombine.low %v2137_v19, %v2151_v16  ;;  %v4790_v26 = vcombine.low %v3793_v23, %v3812_v46  ;;  %v2531_v43 = vsel %vm389_vm0, %v3210_v41, 0  ;;  %v3204_v14 = vcombine.low %v3849_v7, %v3867_v9  ;;  %v4794_v23 = vld [vmem:[#allocation6_spill] sm:$0xff]  ;;  %v4815_v45 = vld [vmem:[#allocation20_spill] sm:$0xff] }
  0x71   : > { %3442 = vmatmul.mubr.msk.bf16.vlgmr.msra.gmra.mrb[0].mxu0 %vm376_vm1, %v3176_v24  ;;  %v4792_v28 = vcombine.low %v3803_v33, %v4791_v17  ;;  %v2627_v52 = vsel %vm389_vm0, %v3219_v32, 0  ;;  %v4795_v46 = vcombine.low %v4793_v62, %v4794_v23  ;;  %v3237_v7 = vld [vmem:[%s4707_s3 + $0x20] sm:$0xf]  ;;  %v3196_v49 = vcombine.low %v4799_v44, %v262_v3  ;;  %v4816_v16 = vld [vmem:[#allocation24_spill] sm:$0xff]  ;;  %v314_v17 = vld [vmem:[%s3767_s17 + $0x44] sm:$0x1] }
  0x72   : > { %3445 = vmatprep.mubr.msk.bf16.mxu0 %vm376_vm1, %v3177_v38  ;;  %3460 = vmatpush3.bf16.msra.mxu0 %v2307_v60  ;;  %v4796_v9 = vld [vmem:[#allocation2_spill] sm:$0xff]  ;;  %v3211_v22 = vcombine.low %v4801_v4, %v4800_v53  ;;  %v3220_v12 = vcombine.low %v4804_v47, %v4803_v59  ;;  %v3213_v61 = vcombine.low %v4806_v40, %v4805_v42  ;;  %v2768_v55 = vsel %vm389_vm0, %v3228_v36, 0  ;;  %v272_v60 = vld [vmem:[%s3762_s14 + $0x88] sm:$0xf]  ;;  %v4825_v53 = vld [vmem:[#allocation29_spill] sm:$0xff] }
  0x73   : > { %3605 = vmatprep.subr.msk.bf16.mxu0 %vm389_vm0, %v3210_v41  ;;  %v4798_v8 = vcombine.low %v4796_v9, %v4797_v1  ;;  %v313_v33 = vld [vmem:[%s3767_s17 + $0x40] sm:$0xf]  ;;  %v4811_v54 = vcombine.low %v4809_v51, %v4810_v29  ;;  %v2877_v58 = vsel %vm389_vm0, %v3237_v7, 0  ;;  %v4814_v5 = vcombine.low %v4812_v34, %v4813_v6  ;;  %v4819_v1 = vld [vmem:[#allocation25_spill] sm:$0xff] }
  0x74   : > { %3452 = vmatmul.mubr.msk.bf16.vlgmr.msra.gmra.mrb[40].mxu1 %vm376_vm1, %v3185_v63  ;;  %v3205_v37 = vcombine.low %v4802_v57, %v313_v33  ;;  %v4808_v24 = vld [vmem:[#allocation18_spill] sm:$0xff]  ;;  %v2735_v63 = vshrl.u32 %v262_v3, 16  ;;  %v2844_v11 = vshrl.u32 %v313_v33, 16  ;;  %v2847_v41 = vshll.u32 %v313_v33, 16 }
  0x75   : > { %3470 = vmatpush3.bf16.msra.mxu1 %v2403_v30  ;;  %3455 = vmatprep.mubr.msk.bf16.mxu1 %vm376_vm1, %v3186_v35  ;;  %v3222_v38 = vcombine.low %v4808_v24, %v4807_v21  ;;  %v2738_v35 = vshll.u32 %v262_v3, 16  ;;  %v323_v30 = vld [vmem:[%s3767_s17 + $0x88] sm:$0xf]  ;;  %v3214_v2 = vcombine.low %v4815_v45, %v272_v60  ;;  %v2853_v23 = vshll.u32 %v314_v17, 16  ;;  %v4826_v31 = vld [vmem:[#allocation30_spill] sm:$0xff] }
  0x76   : > { %3606 = vmatprep.subr.msk.bf16.mxu1 %vm389_vm0, %v3219_v32  ;;  %v2737_v32 = vrot.slane %v2735_v63, 4 }
  0x77   : > { %v2740_v19 = vrot.slane %v2738_v35, 5  ;;  %v2855_v9 = vrot.slane %v2853_v23, 5 }
  0x79   : > { %3446 = vmatmul.mubr.msk.bf16.gmra.mrb[4].mxu0 %vm376_vm1, %v3178_v15  ;;  %v4817_v15 = vld [vmem:[#allocation23_spill] sm:$0xff] }
  0x7a   : > { %3461 = vmatprep.mubr.msk.bf16.mxu0 %vm376_vm1, %v4789_v56  ;;  %v4818_v56 = vld [vmem:[#allocation22_spill] sm:$0xff] }
  0x7c   : > { %3456 = vmatmul.mubr.msk.bf16.gmra.mrb[44].mxu1 %vm376_vm1, %v3187_v0  ;;  %v3229_v0 = vcombine.low %v4817_v15, %v4816_v16 }
  0x7d   : > { %3471 = vmatprep.mubr.msk.bf16.mxu1 %vm376_vm1, %v4790_v26  ;;  %v3223_v26 = vcombine.low %v4818_v56, %v323_v30 }
  0x81   : > { %3462 = vmatmul.mubr.msk.bf16.vlgmr.msra.gmra.mrb[0].mxu0 %vm376_vm1, %v4792_v28  ;;  %v2741_v28 = vor.u32 %v2740_v19, %v2737_v32 }
  0x82   : > { %3465 = vmatprep.mubr.msk.bf16.mxu0 %vm376_vm1, %v4795_v46  ;;  %3480 = vmatpush3.bf16.msra.mxu0 %v2531_v43  ;;  %v263_v43 = vld [vmem:[%s3762_s14 + $0x44] sm:$0x1]  ;;  %s3675_s14 = smov 8  }
  0x83   : > { %3607 = vmatprep.subr.msk.bf16.mxu0 %vm389_vm0, %v3228_v36  ;;  %v2849_v36 = vrot.slane %v2847_v41, 5  ;;  %v2742_v46 = vrot.slane %v2741_v28, 4 }
  0x84   : > { %3472 = vmatmul.mubr.msk.bf16.vlgmr.msra.gmra.mrb[48].mxu1 %vm376_vm1, %v4798_v8  ;;  %v4820_v8 = vld [vmem:[#allocation27_spill] sm:$0xff] }
  0x85   : > { %3490 = vmatpush3.bf16.msra.mxu1 %v2627_v52  ;;  %3475 = vmatprep.mubr.msk.bf16.mxu1 %vm376_vm1, %v3204_v14  ;;  %v2846_v14 = vrot.slane %v2844_v11, 4  ;;  %v2744_v52 = vshll.u32 %v263_v43, 16  ;;  %v4821_v33 = vcombine.low %v4819_v1, %v4820_v8 }
  0x86   : > { %3608 = vmatprep.subr.msk.bf16.mxu1 %vm389_vm0, %v3237_v7 }
  0x87   : > { %v2850_v62 = vor.u32 %v2849_v36, %v2846_v14  ;;  %v2746_v3 = vrot.slane %v2744_v52, 5 }
  0x89   : > { %3466 = vmatmul.mubr.msk.bf16.gmra.mrb[4].mxu0 %vm376_vm1, %v3196_v49  ;;  %v2851_v7 = vrot.slane %v2850_v62, 4  ;;  %v2747_v48 = vsel %vm3976_vm4, %v2742_v46, %v2746_v3 }
  0x8a   : > { %3481 = vmatprep.mubr.msk.bf16.mxu0 %vm376_vm1, %v3211_v22  ;;  %v3232_v27 = vcombine.low %v4825_v53, %v2747_v48 }
  0x8b   : > { %v2856_v49 = vsel %vm3976_vm4, %v2851_v7, %v2855_v9 }
  0x8c   : > { %3476 = vmatmul.mubr.msk.bf16.gmra.mrb[52].mxu1 %vm376_vm1, %v3205_v37 }
  0x8d   : > { %3491 = vmatprep.mubr.msk.bf16.mxu1 %vm376_vm1, %v3220_v12 }
  0x91   : > { %3482 = vmatmul.mubr.msk.bf16.vlgmr.msra.gmra.mrb[0].mxu0 %vm376_vm1, %v4811_v54 }
  0x92   : > { %3485 = vmatprep.mubr.msk.bf16.mxu0 %vm376_vm1, %v3213_v61  ;;  %3500 = vmatpush3.bf16.msra.mxu0 %v2768_v55 }
  0x94   : > { %3492 = vmatmul.mubr.msk.bf16.vlgmr.msra.gmra.mrb[56].mxu1 %vm376_vm1, %v4814_v5 }
  0x95   : > { %3510 = vmatpush3.bf16.msra.mxu1 %v2877_v58  ;;  %3495 = vmatprep.mubr.msk.bf16.mxu1 %vm376_vm1, %v3222_v38 }
  0x99   : > { %3486 = vmatmul.mubr.msk.bf16.gmra.mrb[4].mxu0 %vm376_vm1, %v3214_v2 }
  0x9a   : > { %3501 = vmatprep.mubr.msk.bf16.mxu0 %vm376_vm1, %v3229_v0 }
  0x9c   : > { %3496 = vmatmul.mubr.msk.bf16.gmra.mrb[60].mxu1 %vm376_vm1, %v3223_v26 }
  0x9d   : > { %3511 = vmatprep.mubr.msk.bf16.mxu1 %vm376_vm1, %v3238_v50  ;;  %v4823_v50 = vld [vmem:[#allocation28_spill] sm:$0xff] }
  0x9e   : > { %v4824_v44 = vcombine.low %v4822_v18, %v4823_v50 }
  0xa1   : > { %3502 = vmatmul.mubr.msk.bf16.vlgmr.msra.gmra.mrb[0].mxu0 %vm376_vm1, %v4821_v33 }
  0xa2   : > { %3505 = vmatprep.mubr.msk.bf16.mxu0 %vm376_vm1, %v3231_v20  ;;  %v3241_v20 = vcombine.low %v4826_v31, %v2856_v49 }
  0xa4   : > { %3512 = vmatmul.mubr.msk.bf16.vlgmr.msra.gmra.mrb[64].mxu1 %vm376_vm1, %v4824_v44 }
  0xa5   : > { %3515 = vmatprep.mubr.msk.bf16.mxu1 %vm376_vm1, %v3240_v13 }
  0xa9   : > { %3506 = vmatmul.mubr.msk.bf16.gmra.mrb[4].mxu0 %vm376_vm1, %v3232_v27 }
  0xac   : > { %3516 = vmatmul.mubr.msk.bf16.gmra.mrb[68].mxu1 %vm376_vm1, %v3241_v20 }
  0xf0   : > { %v3353_v4 = vpop.f32.mrb[0].mxu1 }
  0xf1   : > { %579 = vrot.lane.b32.xlu1 %v3353_v4, %s3675_s14  ;;  %v536_v22 = vpop.f32.mrb[1].mxu1 }
  0xf2   : > { %575 = vrot.lane.b32.xlu0 %v536_v22, %s3675_s14  ;;  %v3354_v39 = vpop.f32.mrb[2].mxu1 }
  0xf3   : > { %v539_v25 = vpop.f32.mrb[3].mxu1 }
  0xf5   : > { %581 = vrot.lane.b32.xlu1 %v3354_v39, %s3675_s14 }
  0xf6   : > { %577 = vrot.lane.b32.xlu0 %v539_v25, %s3675_s14 }
  0xf8   : > { %v3357_v10 = vpop.f32.mrb[4].mxu1 }
  0xf9   : > { %v552_v13 = vpop.f32.mrb[5].mxu1 }
  0xfa   : > { %587 = vrot.lane.b32.xlu0 %v3357_v10, %s3675_s14  ;;  %v3358_v57 = vpop.f32.mrb[6].mxu1 }
  0xfb   : > { %589 = vrot.lane.b32.xlu1 %v3358_v57, %s3675_s14  ;;  %v555_v37 = vpop.f32.mrb[7].mxu1 }
  0xfe   : > { %583 = vrot.lane.b32.xlu0 %v552_v13, %s3675_s14 }
  0xff   : > { %585 = vrot.lane.b32.xlu1 %v555_v37, %s3675_s14  ;;  %v4595_v37 = vld [vmem:[%s4708_s4] ss:$0 sm:$0xff] }
 0x100   : > { %v3373_v59 = vpop.f32.mrb[8].mxu1 }
 0x101   : > { %v788_v47 = vpop.f32.mrb[9].mxu1 }
 0x102   : > { %831 = vrot.lane.b32.xlu0 %v3373_v59, %s3675_s14  ;;  %v3374_v12 = vpop.f32.mrb[10].mxu1 }
 0x103   : > { %833 = vrot.lane.b32.xlu1 %v3374_v12, %s3675_s14  ;;  %v791_v42 = vpop.f32.mrb[11].mxu1 }
 0x106   : > { %827 = vrot.lane.b32.xlu0 %v788_v47, %s3675_s14 }
 0x107   : > { %829 = vrot.lane.b32.xlu1 %v791_v42, %s3675_s14 }
 0x10f   : > { %v3377_v40 = vpop.f32.mrb[12].mxu1 }
 0x110   : > { %v804_v61 = vpop.f32.mrb[13].mxu1  ;;  %839 = vrot.lane.b32.xlu0 %v3377_v40, %s3675_s14 }
 0x111   : > { %v3378_v55 = vpop.f32.mrb[14].mxu1 }
 0x112   : > { %841 = vrot.lane.b32.xlu1 %v3378_v55, %s3675_s14  ;;  %v807_v21 = vpop.f32.mrb[15].mxu1 }
 0x114   : > { %835 = vrot.lane.b32.xlu0 %v804_v61, %s3675_s14 }
 0x116   : > { %837 = vrot.lane.b32.xlu1 %v807_v21, %s3675_s14 }
 0x117   : > { %v3393_v24 = vpop.f32.mrb[16].mxu1 }
 0x118   : > { %v1251_v38 = vpop.f32.mrb[17].mxu1  ;;  %1294 = vrot.lane.b32.xlu0 %v3393_v24, %s3675_s14 }
 0x119   : > { %v3394_v51 = vpop.f32.mrb[18].mxu1 }
 0x11a   : > { %1296 = vrot.lane.b32.xlu1 %v3394_v51, %s3675_s14  ;;  %v1254_v29 = vpop.f32.mrb[19].mxu1 }
 0x11c   : > { %1290 = vrot.lane.b32.xlu0 %v1251_v38, %s3675_s14 }
 0x11e   : > { %1292 = vrot.lane.b32.xlu1 %v1254_v29, %s3675_s14 }
 0x11f   : > { %v3397_v54 = vpop.f32.mrb[20].mxu1 }
 0x120   : > { %v1267_v58 = vpop.f32.mrb[21].mxu1  ;;  %1302 = vrot.lane.b32.xlu0 %v3397_v54, %s3675_s14 }
 0x121   : > { %v3398_v63 = vpop.f32.mrb[22].mxu1 }
 0x122   : > { %1304 = vrot.lane.b32.xlu1 %v3398_v63, %s3675_s14  ;;  %v1270_v35 = vpop.f32.mrb[23].mxu1 }
 0x124   : > { %1298 = vrot.lane.b32.xlu0 %v1267_v58, %s3675_s14 }
 0x126   : > { %1300 = vrot.lane.b32.xlu1 %v1270_v35, %s3675_s14 }
 0x127   : > { %v3413_v60 = vpop.f32.mrb[24].mxu1 }
 0x128   : > { %v1503_v34 = vpop.f32.mrb[25].mxu1  ;;  %1546 = vrot.lane.b32.xlu0 %v3413_v60, %s3675_s14 }
 0x129   : > { %v3414_v6 = vpop.f32.mrb[26].mxu1 }
 0x12a   : > { %1548 = vrot.lane.b32.xlu1 %v3414_v6, %s3675_s14  ;;  %v1506_v5 = vpop.f32.mrb[27].mxu1 }
 0x12c   : > { %1542 = vrot.lane.b32.xlu0 %v1503_v34, %s3675_s14 }
 0x12e   : > { %1544 = vrot.lane.b32.xlu1 %v1506_v5, %s3675_s14 }
 0x12f   : > { %v3417_v11 = vpop.f32.mrb[28].mxu1 }
 0x130   : > { %v1519_v41 = vpop.f32.mrb[29].mxu1  ;;  %1554 = vrot.lane.b32.xlu0 %v3417_v11, %s3675_s14 }
 0x131   : > { %v3418_v30 = vpop.f32.mrb[30].mxu1 }
 0x132   : > { %1556 = vrot.lane.b32.xlu1 %v3418_v30, %s3675_s14  ;;  %v1522_v45 = vpop.f32.mrb[31].mxu1 }
 0x134   : > { %1550 = vrot.lane.b32.xlu0 %v1519_v41, %s3675_s14 }
 0x136   : > { %1552 = vrot.lane.b32.xlu1 %v1522_v45, %s3675_s14 }
 0x137   : > { %v3433_v2 = vpop.f32.mrb[32].mxu1 }
 0x138   : > { %v1755_v32 = vpop.f32.mrb[33].mxu1  ;;  %1798 = vrot.lane.b32.xlu0 %v3433_v2, %s3675_s14 }
 0x139   : > { %v3434_v19 = vpop.f32.mrb[34].mxu1 }
 0x13a   : > { %1800 = vrot.lane.b32.xlu1 %v3434_v19, %s3675_s14  ;;  %v1758_v16 = vpop.f32.mrb[35].mxu1 }
 0x13c   : > { %1794 = vrot.lane.b32.xlu0 %v1755_v32, %s3675_s14 }
 0x13e   : > { %1796 = vrot.lane.b32.xlu1 %v1758_v16, %s3675_s14 }
 0x13f   : > { %v3437_v15 = vpop.f32.mrb[36].mxu1 }
 0x140   : > { %v1771_v0 = vpop.f32.mrb[37].mxu1  ;;  %1806 = vrot.lane.b32.xlu0 %v3437_v15, %s3675_s14 }
 0x141   : > { %v3438_v56 = vpop.f32.mrb[38].mxu1 }
 0x142   : > { %1808 = vrot.lane.b32.xlu1 %v3438_v56, %s3675_s14  ;;  %v1774_v26 = vpop.f32.mrb[39].mxu1 }
 0x144   : > { %1802 = vrot.lane.b32.xlu0 %v1771_v0, %s3675_s14 }
 0x146   : > { %1804 = vrot.lane.b32.xlu1 %v1774_v26, %s3675_s14 }
 0x147   : > { %v3453_v43 = vpop.f32.mrb[40].mxu1 }
 0x148   : > { %v2215_v14 = vpop.f32.mrb[41].mxu1  ;;  %2258 = vrot.lane.b32.xlu0 %v3453_v43, %s3675_s14 }
 0x149   : > { %v3454_v36 = vpop.f32.mrb[42].mxu1 }
 0x14a   : > { %2260 = vrot.lane.b32.xlu1 %v3454_v36, %s3675_s14  ;;  %v2218_v17 = vpop.f32.mrb[43].mxu1 }
 0x14c   : > { %2254 = vrot.lane.b32.xlu0 %v2215_v14, %s3675_s14 }
 0x14e   : > { %2256 = vrot.lane.b32.xlu1 %v2218_v17, %s3675_s14 }
 0x14f   : > { %v3457_v28 = vpop.f32.mrb[44].mxu1 }
 0x150   : > { %v2231_v52 = vpop.f32.mrb[45].mxu1  ;;  %2266 = vrot.lane.b32.xlu0 %v3457_v28, %s3675_s14 }
 0x151   : > { %v3458_v62 = vpop.f32.mrb[46].mxu1 }
 0x152   : > { %2268 = vrot.lane.b32.xlu1 %v3458_v62, %s3675_s14  ;;  %v2234_v23 = vpop.f32.mrb[47].mxu1 }
 0x154   : > { %2262 = vrot.lane.b32.xlu0 %v2231_v52, %s3675_s14 }
 0x156   : > { %2264 = vrot.lane.b32.xlu1 %v2234_v23, %s3675_s14 }
 0x157   : > { %v3473_v46 = vpop.f32.mrb[48].mxu1 }
 0x158   : > { %v2439_v3 = vpop.f32.mrb[49].mxu1  ;;  %2482 = vrot.lane.b32.xlu0 %v3473_v46, %s3675_s14 }
 0x159   : > { %v3474_v7 = vpop.f32.mrb[50].mxu1 }
 0x15a   : > { %2484 = vrot.lane.b32.xlu1 %v3474_v7, %s3675_s14  ;;  %v2442_v9 = vpop.f32.mrb[51].mxu1 }
 0x15c   : > { %2478 = vrot.lane.b32.xlu0 %v2439_v3, %s3675_s14 }
 0x15e   : > { %2480 = vrot.lane.b32.xlu1 %v2442_v9, %s3675_s14 }
 0x15f   : > { %v3477_v1 = vpop.f32.mrb[52].mxu1 }
 0x160   : > { %v2455_v8 = vpop.f32.mrb[53].mxu1  ;;  %2490 = vrot.lane.b32.xlu0 %v3477_v1, %s3675_s14 }
 0x161   : > { %v3478_v33 = vpop.f32.mrb[54].mxu1 }
 0x162   : > { %2492 = vrot.lane.b32.xlu1 %v3478_v33, %s3675_s14  ;;  %v2458_v48 = vpop.f32.mrb[55].mxu1 }
 0x163   : > { %v580_v49 = vpop.permute.xlu1 %579 }
 0x164   : > { %2486 = vrot.lane.b32.xlu0 %v2455_v8, %s3675_s14  ;;  %v576_v27 = vpop.permute.xlu0 %575  ;;  %v601_v55 = vadd.f32 %v4595_v37, %v580_v49 }
 0x165   : > { %v599_v63 = vadd.f32 %v4595_v37, %v576_v27 }
 0x166   : > { %2488 = vrot.lane.b32.xlu1 %v2458_v48, %s3675_s14 }
 0x167   : > { %v3493_v18 = vpop.f32.mrb[56].mxu1  ;;  %v582_v4 = vpop.permute.xlu1 %581 }
 0x168   : > { %v2663_v50 = vpop.f32.mrb[57].mxu1  ;;  %2706 = vrot.lane.b32.xlu0 %v3493_v18, %s3675_s14  ;;  %v578_v31 = vpop.permute.xlu0 %577  ;;  %v602_v29 = vadd.f32 %v4595_v37, %v582_v4 }
 0x169   : > { %v3494_v44 = vpop.f32.mrb[58].mxu1  ;;  %v600_v5 = vadd.f32 %v4595_v37, %v578_v31 }
 0x16a   : > { %2708 = vrot.lane.b32.xlu1 %v3494_v44, %s3675_s14  ;;  %v2666_v53 = vpop.f32.mrb[59].mxu1 }
 0x16c   : > { %2702 = vrot.lane.b32.xlu0 %v2663_v50, %s3675_s14  ;;  %v588_v10 = vpop.permute.xlu0 %587 }
 0x16d   : > { %v590_v13 = vpop.permute.xlu1 %589  ;;  %v605_v32 = vadd.f32 %v4595_v37, %v588_v10 }
 0x16e   : > { %2704 = vrot.lane.b32.xlu1 %v2666_v53, %s3675_s14  ;;  %v606_v26 = vadd.f32 %v4595_v37, %v590_v13 }
 0x16f   : > { %v3497_v20 = vpop.f32.mrb[60].mxu1 }
 0x170   : > { %v2679_v22 = vpop.f32.mrb[61].mxu1  ;;  %2714 = vrot.lane.b32.xlu0 %v3497_v20, %s3675_s14  ;;  %v584_v59 = vpop.permute.xlu0 %583 }
 0x171   : > { %v3498_v39 = vpop.f32.mrb[62].mxu1  ;;  %v586_v40 = vpop.permute.xlu1 %585  ;;  %v603_v36 = vadd.f32 %v4595_v37, %v584_v59 }
 0x172   : > { %2716 = vrot.lane.b32.xlu1 %v3498_v39, %s3675_s14  ;;  %v2682_v25 = vpop.f32.mrb[63].mxu1  ;;  %v604_v52 = vadd.f32 %v4595_v37, %v586_v40 }
 0x174   : > { %2710 = vrot.lane.b32.xlu0 %v2679_v22, %s3675_s14  ;;  %v4590_v57 = vpop.f32.mrb[0].mxu0  ;;  %v832_v51 = vpop.permute.xlu0 %831 }
 0x175   : > { %v4598_v47 = vpop.f32.mrb[1].mxu0  ;;  %v853_v54 = vadd.f32 %v832_v51, %v601_v55  ;;  %v834_v58 = vpop.permute.xlu1 %833 }
 0x176   : > { %2712 = vrot.lane.b32.xlu1 %v2682_v25, %s3675_s14  ;;  %v4600_v42 = vpop.f32.mrb[2].mxu0  ;;  %v854_v35 = vadd.f32 %v834_v58, %v602_v29 }
 0x177   : > { %v3513_v12 = vpop.f32.mrb[64].mxu1  ;;  %v4604_v24 = vpop.f32.mrb[3].mxu0 }
 0x178   : > { %v2913_v61 = vpop.f32.mrb[65].mxu1  ;;  %2956 = vrot.lane.b32.xlu0 %v3513_v12, %s3675_s14  ;;  %v828_v34 = vpop.permute.xlu0 %827 }
 0x179   : > { %v3514_v21 = vpop.f32.mrb[66].mxu1  ;;  %v851_v11 = vadd.f32 %v828_v34, %v599_v63  ;;  %v830_v45 = vpop.permute.xlu1 %829 }
 0x17a   : > { %2958 = vrot.lane.b32.xlu1 %v3514_v21, %s3675_s14  ;;  %v2916_v38 = vpop.f32.mrb[67].mxu1  ;;  %v852_v19 = vadd.f32 %v830_v45, %v600_v5 }
 0x17c   : > { %2952 = vrot.lane.b32.xlu0 %v2913_v61, %s3675_s14  ;;  %v4610_v60 = vpop.f32.mrb[4].mxu0 }
 0x17d   : > { %v4613_v6 = vpop.f32.mrb[5].mxu0 }
 0x17e   : > { %2954 = vrot.lane.b32.xlu1 %v2916_v38, %s3675_s14  ;;  %v4616_v30 = vpop.f32.mrb[6].mxu0 }
 0x17f   : > { %v3517_v41 = vpop.f32.mrb[68].mxu1  ;;  %v4620_v15 = vpop.f32.mrb[7].mxu0 }
 0x180   : > { %v2929_v2 = vpop.f32.mrb[69].mxu1 }
 0x181   : > { %2960 = vrot.lane.b32.xlu0 %v2929_v2, %s3675_s14  ;;  %v3518_v16 = vpop.f32.mrb[70].mxu1 }
 0x182   : > { %v2932_v0 = vpop.f32.mrb[71].mxu1  ;;  %v840_v56 = vpop.permute.xlu0 %839 }
 0x183   : > { %v857_v43 = vadd.f32 %v840_v56, %v605_v32  ;;  %2962 = vrot.lane.b32.xlu1 %v2932_v0, %s3675_s14 }
 0x184   : > { %v842_v14 = vpop.permute.xlu1 %841 }
 0x185   : > { %v858_v17 = vadd.f32 %v842_v14, %v606_v26  ;;  %2964 = vrot.lane.b32.xlu0 %v3517_v41, %s3675_s14 }
 0x186   : > { %v836_v28 = vpop.permute.xlu0 %835 }
 0x187   : > { %v855_v62 = vadd.f32 %v836_v28, %v603_v36  ;;  %2966 = vrot.lane.b32.xlu1 %v3518_v16, %s3675_s14 }
 0x188   : > { %v838_v23 = vpop.permute.xlu1 %837 }
 0x189   : > { %v856_v46 = vadd.f32 %v838_v23, %v604_v52 }
 0x18a   : > { %v1295_v3 = vpop.permute.xlu0 %1294 }
 0x18b   : > { %v1316_v7 = vadd.f32 %v1295_v3, %v853_v54 }
 0x18c   : > { %v1297_v9 = vpop.permute.xlu1 %1296 }
 0x18d   : > { %v1317_v1 = vadd.f32 %v1297_v9, %v854_v35 }
 0x18e   : > { %v1291_v8 = vpop.permute.xlu0 %1290 }
 0x18f   : > { %v1314_v33 = vadd.f32 %v1291_v8, %v851_v11 }
 0x190   : > { %v1293_v48 = vpop.permute.xlu1 %1292 }
 0x191   : > { %v1315_v18 = vadd.f32 %v1293_v48, %v852_v19 }
 0x192   : > { %v1303_v50 = vpop.permute.xlu0 %1302 }
 0x193   : > { %v1320_v44 = vadd.f32 %v1303_v50, %v857_v43 }
 0x194   : > { %v1305_v49 = vpop.permute.xlu1 %1304 }
 0x195   : > { %v1321_v53 = vadd.f32 %v1305_v49, %v858_v17 }
 0x196   : > { %v1299_v27 = vpop.permute.xlu0 %1298 }
 0x197   : > { %v1318_v31 = vadd.f32 %v1299_v27, %v855_v62 }
 0x198   : > { %v1301_v20 = vpop.permute.xlu1 %1300 }
 0x199   : > { %v1319_v4 = vadd.f32 %v1301_v20, %v856_v46 }
 0x19a   : > { %v1547_v22 = vpop.permute.xlu0 %1546 }
 0x19b   : > { %v1568_v39 = vadd.f32 %v1547_v22, %v1316_v7 }
 0x19c   : > { %v1549_v25 = vpop.permute.xlu1 %1548 }
 0x19d   : > { %v1569_v10 = vadd.f32 %v1549_v25, %v1317_v1 }
 0x19e   : > { %v1543_v13 = vpop.permute.xlu0 %1542 }
 0x19f   : > { %v1566_v59 = vadd.f32 %v1543_v13, %v1314_v33 }
 0x1a0   : > { %v1545_v12 = vpop.permute.xlu1 %1544 }
 0x1a1   : > { %v1567_v40 = vadd.f32 %v1545_v12, %v1315_v18  ;;  %v3519_v12 = vadd.f32 %v4590_v57, %v4595_v37 }
 0x1a2   : > { %v1555_v61 = vpop.permute.xlu0 %1554 }
 0x1a3   : > { %v4628_v55 = vadd.f32 %v1555_v61, %v1320_v44 }
 0x1a4   : > { %v1557_v21 = vpop.permute.xlu1 %1556 }
 0x1a5   : > { %v4630_v38 = vadd.f32 %v1557_v21, %v1321_v53 }
 0x1a6   : > { %v1551_v51 = vpop.permute.xlu0 %1550 }
 0x1a7   : > { %v1570_v29 = vadd.f32 %v1551_v51, %v1318_v31 }
 0x1a8   : > { %v1553_v54 = vpop.permute.xlu1 %1552 }
 0x1a9   : > { %v1571_v58 = vadd.f32 %v1553_v54, %v1319_v4 }
 0x1aa   : > { %v1799_v63 = vpop.permute.xlu0 %1798 }
 0x1ab   : > { %v1820_v48 = vadd.f32 %v1799_v63, %v1568_v39 }
 0x1ac   : > { %v1801_v35 = vpop.permute.xlu1 %1800 }
 0x1ad   : > { %v1821_v50 = vadd.f32 %v1801_v35, %v1569_v10  ;;  %v3521_v10 = vadd.f32 %v4600_v42, %v4595_v37  ;;  %v3520_v42 = vadd.f32 %v4595_v37, %v4598_v47 }
 0x1ae   : > { %v1795_v34 = vpop.permute.xlu0 %1794 }
 0x1af   : > { %v1818_v53 = vadd.f32 %v1795_v34, %v1566_v59 }
 0x1b0   : > { %v1797_v5 = vpop.permute.xlu1 %1796 }
 0x1b1   : > { %v1819_v4 = vadd.f32 %v1797_v5, %v1567_v40 }
 0x1b2   : > { %v1807_v11 = vpop.permute.xlu0 %1806 }
 0x1b4   : > { %v4632_v41 = vpop.permute.xlu1 %1808 }
 0x1b5   : > { %v1825_v47 = vadd.f32 %v4632_v41, %v4630_v38 }
 0x1b6   : > { %v1803_v45 = vpop.permute.xlu0 %1802 }
 0x1b7   : > { %v1822_v59 = vadd.f32 %v1803_v45, %v1570_v29 }
 0x1b8   : > { %v1805_v2 = vpop.permute.xlu1 %1804 }
 0x1b9   : > { %v1823_v5 = vadd.f32 %v1805_v2, %v1571_v58  ;;  %v3522_v58 = vadd.f32 %v4595_v37, %v4604_v24 }
 0x1ba   : > { %v2259_v32 = vpop.permute.xlu0 %2258 }
 0x1bb   : > { %v2280_v44 = vadd.f32 %v2259_v32, %v1820_v48  ;;  %v3526_v48 = vadd.f32 %v4595_v37, %v4620_v15 }
 0x1bc   : > { %v2261_v19 = vpop.permute.xlu1 %2260 }
 0x1bd   : > { %v2281_v27 = vadd.f32 %v2261_v19, %v1821_v50 }
 0x1be   : > { %v2255_v16 = vpop.permute.xlu0 %2254 }
 0x1bf   : > { %v2278_v22 = vadd.f32 %v2255_v16, %v1818_v53 }
 0x1c0   : > { %v2257_v0 = vpop.permute.xlu1 %2256 }
 0x1c1   : > { %v2279_v21 = vadd.f32 %v2257_v0, %v1819_v4  ;;  %v3525_v4 = vadd.f32 %v4616_v30, %v4595_v37 }
 0x1c2   : > { %v4634_v56 = vpop.permute.xlu0 %2266 }
 0x1c4   : > { %v4636_v26 = vpop.permute.xlu1 %2268 }
 0x1c6   : > { %v2263_v43 = vpop.permute.xlu0 %2262 }
 0x1c7   : > { %v2282_v32 = vadd.f32 %v2263_v43, %v1822_v59 }
 0x1c8   : > { %v2265_v14 = vpop.permute.xlu1 %2264 }
 0x1ca   : > { %v2483_v36 = vpop.permute.xlu0 %2482 }
 0x1cb   : > { %v2504_v31 = vadd.f32 %v2483_v36, %v2280_v44  ;;  %v1824_v36 = vadd.f32 %v1807_v11, %v4628_v55 }
 0x1cc   : > { %v2485_v17 = vpop.permute.xlu1 %2484 }
 0x1cd   : > { %v2505_v25 = vadd.f32 %v2485_v17, %v2281_v27  ;;  %v2283_v17 = vadd.f32 %v2265_v14, %v1823_v5  ;;  %v3524_v14 = vadd.f32 %v4595_v37, %v4613_v6  ;;  %v3523_v27 = vadd.f32 %v4610_v60, %v4595_v37 }
 0x1ce   : > { %v2479_v28 = vpop.permute.xlu0 %2478 }
 0x1cf   : > { %v2502_v39 = vadd.f32 %v2479_v28, %v2278_v22 }
 0x1d0   : > { %v2481_v52 = vpop.permute.xlu1 %2480 }
 0x1d1   : > { %v2503_v35 = vadd.f32 %v2481_v52, %v2279_v21 }
 0x1d2   : > { %v4638_v62 = vpop.permute.xlu0 %2490 }
 0x1d4   : > { %v4640_v23 = vpop.permute.xlu1 %2492 }
 0x1d6   : > { %v2487_v46 = vpop.permute.xlu0 %2486 }
 0x1d7   : > { %v2506_v28 = vadd.f32 %v2487_v46, %v2282_v32  ;;  %v2285_v46 = vadd.f32 %v4636_v26, %v1825_v47 }
 0x1d8   : > { %v2489_v3 = vpop.permute.xlu1 %2488 }
 0x1d9   : > { %v2509_v44 = vadd.f32 %v4640_v23, %v2285_v46 }
 0x1da   : > { %v2707_v7 = vpop.permute.xlu0 %2706 }
 0x1db   : > { %v2728_v13 = vadd.f32 %v2707_v7, %v2504_v31 }
 0x1dc   : > { %v2709_v9 = vpop.permute.xlu1 %2708 }
 0x1dd   : > { %v2729_v51 = vadd.f32 %v2709_v9, %v2505_v25  ;;  %v2284_v9 = vadd.f32 %v4634_v56, %v1824_v36 }
 0x1de   : > { %v2703_v1 = vpop.permute.xlu0 %2702 }
 0x1df   : > { %v2726_v40 = vadd.f32 %v2703_v1, %v2502_v39  ;;  %v2507_v1 = vadd.f32 %v2489_v3, %v2283_v17  ;;  %v2508_v38 = vadd.f32 %v4638_v62, %v2284_v9 }
 0x1e0   : > { %v2705_v8 = vpop.permute.xlu1 %2704 }
 0x1e1   : > { %v2727_v29 = vadd.f32 %v2705_v8, %v2503_v35 }
 0x1e2   : > { %v4642_v33 = vpop.permute.xlu0 %2714 }
 0x1e3   : > { %v2732_v6 = vadd.f32 %v4642_v33, %v2508_v38 }
 0x1e4   : > { %v4644_v18 = vpop.permute.xlu1 %2716 }
 0x1e5   : > { %v2733_v15 = vadd.f32 %v4644_v18, %v2509_v44 }
 0x1e6   : > { %v2711_v49 = vpop.permute.xlu0 %2710 }
 0x1e7   : > { %v2730_v55 = vadd.f32 %v2711_v49, %v2506_v28 }
 0x1e8   : > { %v2713_v20 = vpop.permute.xlu1 %2712 }
 0x1e9   : > { %v2731_v41 = vadd.f32 %v2713_v20, %v2507_v1 }
 0x1ea   : > { %v2957_v61 = vpop.permute.xlu0 %2956 }
 0x1eb   : > { %v2978_v54 = vadd.f32 %v2957_v61, %v2728_v13 }
 0x1ec   : > { %v2959_v63 = vpop.permute.xlu1 %2958 }
 0x1ed   : > { %v2986_v57 = vsel %vm376_vm1, %v3519_v12, %v2978_v54  ;;  %v2979_v34 = vadd.f32 %v2959_v63, %v2729_v51 }
 0x1ee   : > { %v2994_v19 = vmax.f32 %v2986_v57, 0.0  ;;  %v2953_v16 = vpop.permute.xlu0 %2952 }
 0x1ef   : > { %v2987_v45 = vsel %vm376_vm1, %v3521_v10, %v2979_v34  ;;  %v2976_v0 = vadd.f32 %v2953_v16, %v2726_v40 }
 0x1f0   : > { %3003 = vst.msk [vmem:[%s4654_s23 + $0x10] sm:$0xff] %vm3000_vm5, %v2994_v19  ;;  %v2995_v52 = vmax.f32 %v2987_v45, 0.0  ;;  %v2955_v7 = vpop.permute.xlu1 %2954 }
 0x1f1   : > { %v2984_v2 = vsel %vm376_vm1, %v3520_v42, %v2976_v0  ;;  %v2977_v43 = vadd.f32 %v2955_v7, %v2727_v29 }
 0x1f2   : > { %3004 = vst.msk [vmem:[%s4654_s23 + $0x18] sm:$0xff] %vm3000_vm5, %v2995_v52  ;;  %v2992_v11 = vmax.f32 %v2984_v2, 0.0 }
 0x1f3   : > { %v2985_v24 = vsel %vm376_vm1, %v3522_v58, %v2977_v43  ;;  %v2961_v8 = vpop.permute.xlu0 %2960 }
 0x1f4   : > { %3001 = vst.msk [vmem:[%s4654_s23] sm:$0xff] %vm3000_vm5, %v2992_v11  ;;  %v2993_v56 = vmax.f32 %v2985_v24, 0.0  ;;  %v2980_v3 = vadd.f32 %v2961_v8, %v2730_v55 }
 0x1f5   : > { %v2963_v50 = vpop.permute.xlu1 %2962 }
 0x1f6   : > { %3002 = vst.msk [vmem:[%s4654_s23 + $0x8] sm:$0xff] %vm3000_vm5, %v2993_v56  ;;  %v2988_v26 = vsel %vm376_vm1, %v3524_v14, %v2980_v3  ;;  %v2981_v62 = vadd.f32 %v2963_v50, %v2731_v41 }
 0x1f7   : > { %v2996_v49 = vmax.f32 %v2988_v26, 0.0  ;;  %v2965_v53 = vpop.permute.xlu0 %2964 }
 0x1f8   : > { %v2989_v31 = vsel %vm376_vm1, %v3526_v48, %v2981_v62  ;;  %v2982_v23 = vadd.f32 %v2965_v53, %v2732_v6 }
 0x1f9   : > { %3005 = vst.msk [vmem:[%s4654_s23 + $0x20] sm:$0xff] %vm3000_vm5, %v2996_v49  ;;  %v2997_v33 = vmax.f32 %v2989_v31, 0.0  ;;  %v2967_v20 = vpop.permute.xlu1 %2966 }
 0x1fa   : > { %v2990_v22 = vsel %vm376_vm1, %v3523_v27, %v2982_v23  ;;  %v2983_v25 = vadd.f32 %v2967_v20, %v2733_v15 }
 0x1fb   : > { %3006 = vst.msk [vmem:[%s4654_s23 + $0x28] sm:$0xff] %vm3000_vm5, %v2997_v33  ;;  %v2998_v13 = vmax.f32 %v2990_v22, 0.0 }
 0x1fc   : > { %v2991_v60 = vsel %vm376_vm1, %v3525_v4, %v2983_v25 }
 0x1fd   : > { %3007 = vst.msk [vmem:[%s4654_s23 + $0x30] sm:$0xff] %vm3000_vm5, %v2998_v13  ;;  %v2999_v18 = vmax.f32 %v2991_v60, 0.0 }
 0x1ff   : > { %3008 = vst.msk [vmem:[%s4654_s23 + $0x38] sm:$0xff] %vm3000_vm5, %v2999_v18 }
 0x200 PF: > { %s15_s18 = sadd.s32 1, %s3673_s18  }
 0x201   : > { %p12_p4 = scmp.ge.s32.totalorder %s15_s18, 4  }
 0x203   :  { %14 = sbr.rel (!%p12_p4) target bundleno = 1 (0x1), region = 89 }

</bundles_post_ra>
